<compile_context>
chip_gen: v7x
topology: tpu7x:2x2x1
jax: 0.10.0
libtpu: 0.0.40
codegen_flags: <defaults>
</compile_context>

<pallas_src>
import functools
import numpy as np

import jax
import jax.numpy as jnp
from jax.experimental import pallas as pl
from jax.experimental.pallas import tpu as pltpu

_NEG = -1.0e30  # "-inf" for max-pool padding (every pool window has >=1 real value)


def _shifted(a, axis, r, out_size, fill):
    """out[..., i, ...] = a[..., i + r, ...] for i in [0, out_size); `fill` outside.

    Static shapes / static shift -> pure slice + concat on values (no stores).
    """
    n = a.shape[axis]
    lo = max(0, -r)
    src_start = max(0, r)
    src_stop = min(n, out_size + r)
    hi = out_size - lo - (src_stop - src_start)
    idx = [slice(None)] * a.ndim
    idx[axis] = slice(src_start, src_stop)
    core = a[tuple(idx)]

    def blk(sz):
        shp = list(a.shape)
        shp[axis] = sz
        return jnp.full(shp, fill, a.dtype)

    parts = ([blk(lo)] if lo else []) + [core] + ([blk(hi)] if hi else [])
    return parts[0] if len(parts) == 1 else jnp.concatenate(parts, axis=axis)


# -----------------------------------------------------------------------------
# Fused Block kernel (one grid step = one batch element)
# -----------------------------------------------------------------------------

def _block_kernel(
    # inputs
    x_ref, w_l1_ref, b_loc_ref, w_qkv_ref, rel_bias_ref,
    w_dw_ref, w_pw_ref, b_pw_ref, n1_s_ref, n1_t_ref,
    fc1_w_ref, fc1_b_ref, fc2_w_ref, fc2_b_ref,
    # output
    y_ref,
    *, H, W, C, ws, heads):
    f32 = jnp.float32
    bf16 = jnp.bfloat16
    d = C // heads
    nwh, nww = H // ws, W // ws
    HW = H * W
    pp = ws // 2 - 1          # max/avg pool padding
    pd = (ws - 1) // 2        # depthwise conv padding
    scale = float(d) ** (-0.5)

    x = x_ref[0].astype(f32)                                 # (HW, C), raster order
    n1 = x * n1_s_ref[...] + n1_t_ref[...]                   # norm1 (folded BN)
    n3 = n1.reshape(H, W, C)

    # -------- local branch: 3x3 conv (BN + the 1x1 conv folded in) as ONE matmul --------
    col_sh = {dj: _shifted(n3, 1, dj, W, 0.0) for dj in (-1, 0, 1)}
    taps = [_shifted(col_sh[dj], 0, di, H, 0.0)
            for di in (-1, 0, 1) for dj in (-1, 0, 1)]        # tap order (di+1)*3+(dj+1)
    im2col = jnp.concatenate(taps, axis=-1).reshape(HW, 9 * C)
    loc = jnp.dot(im2col.astype(bf16), w_l1_ref[...],
                  preferred_element_type=f32) + b_loc_ref[...]          # (HW, C)

    # -------- windowed multi-head attention (batched over windows) --------
    qkv = jnp.dot(n1.astype(bf16), w_qkv_ref[...],
                  preferred_element_type=f32)                           # (HW, 3C)
    # TODO(synk): window / head loops are Python-unrolled; at production H,W
    # move windows onto the grid or into lax.fori_loop to bound code size.
    wins = []
    for wi0 in range(nwh):
        for wj0 in range(nww):
            rows = []
            for r in range(ws):
                src = (wi0 * ws + r) * W + wj0 * ws
                rows.append(qkv[src:src + ws, :])
            wins.append(jnp.concatenate(rows, axis=0))        # (T, 3C), window-major
    qkv_w = jnp.stack(wins, axis=0)                           # (nW, T, 3C)

    q = qkv_w[..., 0:C] * scale
    k = qkv_w[..., C:2 * C]
    v = qkv_w[..., 2 * C:3 * C]
    head_outs = []
    for hd in range(heads):
        qh = q[..., hd * d:(hd + 1) * d]
        kh = k[..., hd * d:(hd + 1) * d]
        vh = v[..., hd * d:(hd + 1) * d]
        s = jnp.einsum('wqd,wkd->wqk', qh, kh, preferred_element_type=f32)
        s = s + rel_bias_ref[hd]
        s = s - jnp.max(s, axis=-1, keepdims=True)
        e = jnp.exp(s)
        p = e * pl.reciprocal(jnp.sum(e, axis=-1, keepdims=True), approx=True)
        head_outs.append(jnp.einsum('wqk,wkd->wqd', p, vh,
                                    preferred_element_type=f32))
    attn_w = jnp.concatenate(head_outs, axis=-1)              # (nW, T, C)

    # merge windows back to raster order with value concats (no scatter stores)
    raster_rows = []
    for wi0 in range(nwh):
        for r in range(ws):
            chunks = [attn_w[wi0 * nww + wj0][r * ws:(r + 1) * ws, :]
                      for wj0 in range(nww)]
            raster_rows.append(jnp.concatenate(chunks, axis=0))   # (W, C)
    att = jnp.concatenate(raster_rows, axis=0).reshape(H, W, C)

    # -------- directional max/avg pools (reflect +1; pad pp; avg divides by ws) --------
    att_v = jnp.concatenate([att, att[H - 2:H - 1]], axis=0)       # (H+1, W, C)
    att_h = jnp.concatenate([att, att[:, W - 2:W - 1, :]], axis=1)  # (H, W+1, C)
    mx_v = _shifted(att_v, 0, -pp, H, _NEG)
    av_v = _shifted(att_v, 0, -pp, H, 0.0)
    mx_h = _shifted(att_h, 1, -pp, W, _NEG)
    av_h = _shifted(att_h, 1, -pp, W, 0.0)
    for k_ in range(1, ws):
        r = k_ - pp
        mx_v = jnp.maximum(mx_v, _shifted(att_v, 0, r, H, _NEG))
        av_v = av_v + _shifted(att_v, 0, r, H, 0.0)
        mx_h = jnp.maximum(mx_h, _shifted(att_h, 1, r, W, _NEG))
        av_h = av_h + _shifted(att_h, 1, r, W, 0.0)
    # AvgPool2d default count_include_pad=True -> divide by ws including pads.
    pooled = mx_v + mx_h + (av_v + av_h) * (1.0 / ws)

    out_sp = pooled + loc.reshape(H, W, C)

    # -------- pad_out (reflect +1 right/bottom) + separable ws x ws projection --------
    po = jnp.concatenate([out_sp, out_sp[:, W - 2:W - 1, :]], axis=1)   # (H, W+1, C)
    po = jnp.concatenate([po, po[H - 2:H - 1]], axis=0)                 # (H+1, W+1, C)
    wdw = w_dw_ref[...]                                                 # (ws*ws, C)
    acc = None
    for b_ in range(ws):                     # column shifts built once, reused per row tap
        csh = _shifted(po, 1, b_ - pd, W, 0.0)                          # (H+1, W, C)
        for a_ in range(ws):
            tap = _shifted(csh, 0, a_ - pd, H, 0.0)                     # (H, W, C)
            contrib = tap * wdw[a_ * ws + b_][None, None, :]
            acc = contrib if acc is None else acc + contrib
    gla = jnp.dot(acc.reshape(HW, C).astype(bf16), w_pw_ref[...],
                  preferred_element_type=f32) + b_pw_ref[...]           # (HW, C)

    # -------- residuals + MLP (norm2 folded into fc1) --------
    x1 = x + gla
    hdn = jnp.dot(x1.astype(bf16), fc1_w_ref[...],
                  preferred_element_type=f32) + fc1_b_ref[...]
    hdn = jnp.clip(hdn, 0.0, 6.0)                            # ReLU6; dropout p=0
    y = x1 + jnp.dot(hdn.astype(bf16), fc2_w_ref[...],
                     preferred_element_type=f32) + fc2_b_ref[...]
    y_ref[0] = y.astype(y_ref.dtype)


# -----------------------------------------------------------------------------
# Wrapper
# -----------------------------------------------------------------------------

def block_forward(x_nchw, fp, *, num_heads, window_size):
    B, C, H, W = x_nchw.shape
    ws = window_size
    # TODO(synk): the reference reflect-pads H/W not divisible by window_size;
    # only the divisible case is implemented here.
    assert H % ws == 0 and W % ws == 0
    assert ws % 2 == 0 and C % num_heads == 0
    HW = H * W
    T = ws * ws
    hidden = fp["fc1_w"].shape[1]

    x = jnp.transpose(x_nchw, (0, 2, 3, 1)).reshape(B, HW, C)

    kernel = functools.partial(_block_kernel, H=H, W=W, C=C, ws=ws,
                               heads=num_heads)

    def bc2(shape):
        return pl.BlockSpec(shape, lambda b: (0, 0))

    def bc3(shape):
        return pl.BlockSpec(shape, lambda b: (0, 0, 0))

    in_specs = [
        pl.BlockSpec((1, HW, C), lambda b: (b, 0, 0)),       # x
        bc2((9 * C, C)),                                     # w_l1 (3x3 with 1x1 folded)
        bc2((1, C)),                                         # b_loc
        bc2((C, 3 * C)),                                     # w_qkv
        bc3((num_heads, T, T)),                              # rel_bias
        bc2((ws * ws, C)),                                   # w_dw (depthwise taps)
        bc2((C, C)),                                         # w_pw (BN folded)
        bc2((1, C)),                                         # b_pw
        bc2((1, C)),                                         # norm1 scale
        bc2((1, C)),                                         # norm1 shift
        bc2((C, hidden)),                                    # fc1_w (norm2 folded)
        bc2((1, hidden)),                                    # fc1_b
        bc2((hidden, C)),                                    # fc2_w
        bc2((1, C)),                                         # fc2_b
    ]

    # TODO(synk): for C < 128, packing 128//C pixels per lane-row (lane-dense
    # I/O) and a second parallel grid axis (v7x, B==1) are further wins.
    y = pl.pallas_call(
        kernel,
        out_shape=jax.ShapeDtypeStruct((B, HW, C), x.dtype),
        grid_spec=pltpu.PrefetchScalarGridSpec(
            num_scalar_prefetch=0,
            grid=(B,),
            in_specs=in_specs,
            out_specs=pl.BlockSpec((1, HW, C), lambda b: (b, 0, 0))),
        compiler_params=pltpu.CompilerParams(
            dimension_semantics=("parallel",),
            vmem_limit_bytes=48 * 1024 * 1024),
    )(x, fp["w_l1"], fp["b_loc"], fp["w_qkv"], fp["rel_bias"],
      fp["w_dw"], fp["w_pw"], fp["b_pw"], fp["n1_s"], fp["n1_t"],
      fp["fc1_w"], fp["fc1_b"], fp["fc2_w"], fp["fc2_b"])

    return jnp.transpose(y.reshape(B, H, W, C), (0, 3, 1, 2))


# -----------------------------------------------------------------------------
# Deterministic parameter construction + one-time folding
# -----------------------------------------------------------------------------

def make_params(key, dim, num_heads, ws, hidden):
    C = dim
    eps = 1e-5
    ks = list(jax.random.split(key, 16))

    def normal(k, shape, std):
        return std * jax.random.normal(k, shape, jnp.float32)

    def bn_fold(k, n):
        k1, k2, k3, k4 = jax.random.split(k, 4)
        gamma = 1.0 + 0.1 * jax.random.normal(k1, (n,), jnp.float32)
        beta = 0.1 * jax.random.normal(k2, (n,), jnp.float32)
        mean = 0.1 * jax.random.normal(k3, (n,), jnp.float32)
        var = 0.5 + jax.random.uniform(k4, (n,), jnp.float32)
        s = gamma / jnp.sqrt(var + eps)
        t = beta - mean * s
        return s, t

    p = {}
    p["norm1_s"], p["norm1_t"] = bn_fold(ks[0], C)
    p["norm2_s"], p["norm2_t"] = bn_fold(ks[1], C)
    p["local1_w"] = normal(ks[2], (9 * C, C), 0.05)      # 3x3 conv as (tap*Cin, Cout)
    p["local1_bn_s"], p["local1_bn_t"] = bn_fold(ks[3], C)
    p["local2_w"] = normal(ks[4], (C, C), 0.05)          # 1x1 conv as (Cin, Cout)
    p["local2_bn_s"], p["local2_bn_t"] = bn_fold(ks[5], C)
    p["qkv_w"] = normal(ks[6], (C, 3 * C), 0.05)
    # TODO(synk): trunc_normal_(std=0.02) approximated by a plain normal init.
    p["rel_bias_table"] = normal(ks[7], ((2 * ws - 1) * (2 * ws - 1), num_heads), 0.02)
    p["proj_dw_w"] = normal(ks[8], (ws * ws, C), 0.05)   # depthwise (tap, C)
    p["proj_pw_w"] = normal(ks[9], (C, C), 0.05)
    p["proj_bn_s"], p["proj_bn_t"] = bn_fold(ks[10], C)
    p["fc1_w"] = normal(ks[11], (C, hidden), 0.05)
    p["fc1_b"] = normal(ks[12], (hidden,), 0.02)
    p["fc2_w"] = normal(ks[13], (hidden, C), 0.05)
    p["fc2_b"] = normal(ks[14], (C,), 0.02)

    # relative position index (same construction as the PyTorch module)
    coords = np.stack(np.meshgrid(np.arange(ws), np.arange(ws), indexing="ij"))
    cf = coords.reshape(2, -1)
    rel = cf[:, :, None] - cf[:, None, :]
    rel = rel.transpose(1, 2, 0).astype(np.int64)
    rel[:, :, 0] += ws - 1
    rel[:, :, 1] += ws - 1
    rel[:, :, 0] *= 2 * ws - 1
    p["rel_index"] = jnp.asarray(rel.sum(-1), jnp.int32)
    return p


def fold_params(p, dim, num_heads, ws):
    """One-time folding of BN / norm layers into the consuming weights."""
    C = dim
    T = ws * ws
    bf16 = jnp.bfloat16
    fp = {}
    fp["n1_s"] = p["norm1_s"].reshape(1, C)
    fp["n1_t"] = p["norm1_t"].reshape(1, C)
    # local convs: conv (no bias) followed by BN -> W' = W * bn_s, b' = bn_t
    w_l1 = p["local1_w"] * p["local1_bn_s"][None, :]
    w_l2 = p["local2_w"] * p["local2_bn_s"][None, :]
    # fold the 1x1 conv into the centre tap (tap index 4) of the 3x3 conv
    w_l1 = w_l1.at[4 * C:5 * C, :].add(w_l2)
    fp["w_l1"] = w_l1.astype(bf16)
    fp["b_loc"] = (p["local1_bn_t"] + p["local2_bn_t"]).reshape(1, C)
    fp["w_qkv"] = p["qkv_w"].astype(bf16)
    rel = p["rel_bias_table"][p["rel_index"].reshape(-1)]
    fp["rel_bias"] = rel.reshape(T, T, num_heads).transpose(2, 0, 1).astype(jnp.float32)
    fp["w_dw"] = p["proj_dw_w"]
    fp["w_pw"] = (p["proj_pw_w"] * p["proj_bn_s"][None, :]).astype(bf16)
    fp["b_pw"] = p["proj_bn_t"].reshape(1, C)
    # fold norm2 into fc1:  fc1(norm2(x)) = x @ (fc1_w * s2) + (t2 @ fc1_w + fc1_b)
    fp["fc1_w"] = (p["fc1_w"] * p["norm2_s"][:, None]).astype(bf16)
    fp["fc1_b"] = (p["fc1_b"] + p["norm2_t"] @ p["fc1_w"]).reshape(1, -1)
    fp["fc2_w"] = p["fc2_w"].astype(bf16)
    fp["fc2_b"] = p["fc2_b"].reshape(1, C)
    return fp


# -----------------------------------------------------------------------------

if __name__ == "__main__":
    B, C, H, W = 2, 32, 8, 8
    num_heads, window_size, mlp_ratio = 4, 4, 4.0

    key = jax.random.PRNGKey(0)
    kx, kp = jax.random.split(key)
    x = jax.random.normal(kx, (B, C, H, W), jnp.float32)
    raw = make_params(kp, C, num_heads, window_size, int(C * mlp_ratio))
    fp = fold_params(raw, C, num_heads, window_size)

    fwd = jax.jit(functools.partial(block_forward, num_heads=num_heads,
                                    window_size=window_size))
    y = jax.block_until_ready(fwd(x, fp))

    assert y.shape == (B, C, H, W), y.shape
    assert bool(jnp.all(jnp.isfinite(y)))
    print("KERNEL_OK")
</pallas_src>

<mosaic_0001>
module attributes {stable_mosaic.version = 11 : i64} {
  func.func @_block_kernel(%arg0: i32, %arg1: memref<1x64x32xf32, #tpu.memory_space<vmem>>, %arg2: memref<288x32xbf16, #tpu.memory_space<vmem>>, %arg3: memref<1x32xf32, #tpu.memory_space<vmem>>, %arg4: memref<32x96xbf16, #tpu.memory_space<vmem>>, %arg5: memref<4x16x16xf32, #tpu.memory_space<vmem>>, %arg6: memref<16x32xf32, #tpu.memory_space<vmem>>, %arg7: memref<32x32xbf16, #tpu.memory_space<vmem>>, %arg8: memref<1x32xf32, #tpu.memory_space<vmem>>, %arg9: memref<1x32xf32, #tpu.memory_space<vmem>>, %arg10: memref<1x32xf32, #tpu.memory_space<vmem>>, %arg11: memref<32x128xbf16, #tpu.memory_space<vmem>>, %arg12: memref<1x128xf32, #tpu.memory_space<vmem>>, %arg13: memref<128x32xbf16, #tpu.memory_space<vmem>>, %arg14: memref<1x32xf32, #tpu.memory_space<vmem>>, %arg15: memref<1x64x32xf32, #tpu.memory_space<vmem>>) attributes {dimension_semantics = [#tpu.dimension_semantics<parallel>], iteration_bounds = array<i64: 2>, scalar_prefetch = 0 : i64, scratch_operands = 0 : i64, tpu.core_type = #tpu.core_type<tc>, window_params = [{transform_indices = @transform_0, window_bounds = array<i64: 1, 64, 32>}, {pipeline_mode = #tpu.pipeline_mode<synchronous>, transform_indices = @transform_1, window_bounds = array<i64: 288, 32>}, {pipeline_mode = #tpu.pipeline_mode<synchronous>, transform_indices = @transform_2, window_bounds = array<i64: 1, 32>}, {pipeline_mode = #tpu.pipeline_mode<synchronous>, transform_indices = @transform_3, window_bounds = array<i64: 32, 96>}, {pipeline_mode = #tpu.pipeline_mode<synchronous>, transform_indices = @transform_4, window_bounds = array<i64: 4, 16, 16>}, {pipeline_mode = #tpu.pipeline_mode<synchronous>, transform_indices = @transform_5, window_bounds = array<i64: 16, 32>}, {pipeline_mode = #tpu.pipeline_mode<synchronous>, transform_indices = @transform_6, window_bounds = array<i64: 32, 32>}, {pipeline_mode = #tpu.pipeline_mode<synchronous>, transform_indices = @transform_7, window_bounds = array<i64: 1, 32>}, {pipeline_mode = #tpu.pipeline_mode<synchronous>, transform_indices = @transform_8, window_bounds = array<i64: 1, 32>}, {pipeline_mode = #tpu.pipeline_mode<synchronous>, transform_indices = @transform_9, window_bounds = array<i64: 1, 32>}, {pipeline_mode = #tpu.pipeline_mode<synchronous>, transform_indices = @transform_10, window_bounds = array<i64: 32, 128>}, {pipeline_mode = #tpu.pipeline_mode<synchronous>, transform_indices = @transform_11, window_bounds = array<i64: 1, 128>}, {pipeline_mode = #tpu.pipeline_mode<synchronous>, transform_indices = @transform_12, window_bounds = array<i64: 128, 32>}, {pipeline_mode = #tpu.pipeline_mode<synchronous>, transform_indices = @transform_13, window_bounds = array<i64: 1, 32>}, {transform_indices = @transform_14, window_bounds = array<i64: 1, 64, 32>}]} {
    %c0 = arith.constant 0 : index
    %c0_0 = arith.constant 0 : index
    %c0_1 = arith.constant 0 : index
    %0 = vector.load %arg1[%c0, %c0_0, %c0_1] : memref<1x64x32xf32, #tpu.memory_space<vmem>>, vector<1x64x32xf32>
    %1 = vector.shape_cast %0 : vector<1x64x32xf32> to vector<64x32xf32>
    %c0_2 = arith.constant 0 : index
    %c0_3 = arith.constant 0 : index
    %2 = vector.load %arg9[%c0_2, %c0_3] : memref<1x32xf32, #tpu.memory_space<vmem>>, vector<1x32xf32>
    %3 = vector.broadcast %2 : vector<1x32xf32> to vector<64x32xf32>
    %4 = arith.mulf %1, %3 : vector<64x32xf32>
    %c0_4 = arith.constant 0 : index
    %c0_5 = arith.constant 0 : index
    %5 = vector.load %arg10[%c0_4, %c0_5] : memref<1x32xf32, #tpu.memory_space<vmem>>, vector<1x32xf32>
    %6 = vector.broadcast %5 : vector<1x32xf32> to vector<64x32xf32>
    %7 = arith.addf %4, %6 : vector<64x32xf32>
    %8 = vector.shape_cast %7 : vector<64x32xf32> to vector<8x8x32xf32>
    %9 = vector.extract_strided_slice %8 {offsets = [0, 0, 0], sizes = [8, 7, 32], strides = [1, 1, 1]} : vector<8x8x32xf32> to vector<8x7x32xf32>
    %cst = arith.constant 0.000000e+00 : f32
    %10 = vector.broadcast %cst : f32 to vector<8x1x32xf32>
    %11 = tpu.concatenate %10, %9 in 1 : vector<8x1x32xf32>, vector<8x7x32xf32> -> vector<8x8x32xf32>
    %12 = vector.extract_strided_slice %8 {offsets = [0, 1, 0], sizes = [8, 7, 32], strides = [1, 1, 1]} : vector<8x8x32xf32> to vector<8x7x32xf32>
    %cst_6 = arith.constant 0.000000e+00 : f32
    %13 = vector.broadcast %cst_6 : f32 to vector<8x1x32xf32>
    %14 = tpu.concatenate %12, %13 in 1 : vector<8x7x32xf32>, vector<8x1x32xf32> -> vector<8x8x32xf32>
    %15 = vector.extract_strided_slice %11 {offsets = [0, 0, 0], sizes = [7, 8, 32], strides = [1, 1, 1]} : vector<8x8x32xf32> to vector<7x8x32xf32>
    %cst_7 = arith.constant 0.000000e+00 : f32
    %16 = vector.broadcast %cst_7 : f32 to vector<1x8x32xf32>
    %17 = tpu.concatenate %16, %15 in 0 : vector<1x8x32xf32>, vector<7x8x32xf32> -> vector<8x8x32xf32>
    %18 = vector.extract_strided_slice %8 {offsets = [0, 0, 0], sizes = [7, 8, 32], strides = [1, 1, 1]} : vector<8x8x32xf32> to vector<7x8x32xf32>
    %cst_8 = arith.constant 0.000000e+00 : f32
    %19 = vector.broadcast %cst_8 : f32 to vector<1x8x32xf32>
    %20 = tpu.concatenate %19, %18 in 0 : vector<1x8x32xf32>, vector<7x8x32xf32> -> vector<8x8x32xf32>
    %21 = vector.extract_strided_slice %14 {offsets = [0, 0, 0], sizes = [7, 8, 32], strides = [1, 1, 1]} : vector<8x8x32xf32> to vector<7x8x32xf32>
    %cst_9 = arith.constant 0.000000e+00 : f32
    %22 = vector.broadcast %cst_9 : f32 to vector<1x8x32xf32>
    %23 = tpu.concatenate %22, %21 in 0 : vector<1x8x32xf32>, vector<7x8x32xf32> -> vector<8x8x32xf32>
    %24 = vector.extract_strided_slice %11 {offsets = [1, 0, 0], sizes = [7, 8, 32], strides = [1, 1, 1]} : vector<8x8x32xf32> to vector<7x8x32xf32>
    %cst_10 = arith.constant 0.000000e+00 : f32
    %25 = vector.broadcast %cst_10 : f32 to vector<1x8x32xf32>
    %26 = tpu.concatenate %24, %25 in 0 : vector<7x8x32xf32>, vector<1x8x32xf32> -> vector<8x8x32xf32>
    %27 = vector.extract_strided_slice %8 {offsets = [1, 0, 0], sizes = [7, 8, 32], strides = [1, 1, 1]} : vector<8x8x32xf32> to vector<7x8x32xf32>
    %cst_11 = arith.constant 0.000000e+00 : f32
    %28 = vector.broadcast %cst_11 : f32 to vector<1x8x32xf32>
    %29 = tpu.concatenate %27, %28 in 0 : vector<7x8x32xf32>, vector<1x8x32xf32> -> vector<8x8x32xf32>
    %30 = vector.extract_strided_slice %14 {offsets = [1, 0, 0], sizes = [7, 8, 32], strides = [1, 1, 1]} : vector<8x8x32xf32> to vector<7x8x32xf32>
    %cst_12 = arith.constant 0.000000e+00 : f32
    %31 = vector.broadcast %cst_12 : f32 to vector<1x8x32xf32>
    %32 = tpu.concatenate %30, %31 in 0 : vector<7x8x32xf32>, vector<1x8x32xf32> -> vector<8x8x32xf32>
    %33 = tpu.concatenate %17, %20, %23, %11, %8, %14, %26, %29, %32 in 2 : vector<8x8x32xf32>, vector<8x8x32xf32>, vector<8x8x32xf32>, vector<8x8x32xf32>, vector<8x8x32xf32>, vector<8x8x32xf32>, vector<8x8x32xf32>, vector<8x8x32xf32>, vector<8x8x32xf32> -> vector<8x8x288xf32>
    %34 = vector.shape_cast %33 : vector<8x8x288xf32> to vector<64x288xf32>
    %35 = arith.truncf %34 : vector<64x288xf32> to vector<64x288xbf16>
    %c0_13 = arith.constant 0 : index
    %c0_14 = arith.constant 0 : index
    %36 = vector.load %arg2[%c0_13, %c0_14] : memref<288x32xbf16, #tpu.memory_space<vmem>>, vector<288x32xbf16>
    %cst_15 = arith.constant dense<0.000000e+00> : vector<64x32xf32>
    %37 = tpu.matmul %35, %36, %cst_15 {dimension_numbers = #tpu.dot_dimension_numbers<[1], [0], [0], [1], [0, 0, 1, 1], [], []>} : vector<64x288xbf16>, vector<288x32xbf16>, vector<64x32xf32> -> vector<64x32xf32>
    %c0_16 = arith.constant 0 : index
    %c0_17 = arith.constant 0 : index
    %38 = vector.load %arg3[%c0_16, %c0_17] : memref<1x32xf32, #tpu.memory_space<vmem>>, vector<1x32xf32>
    %39 = vector.broadcast %38 : vector<1x32xf32> to vector<64x32xf32>
    %40 = arith.addf %37, %39 : vector<64x32xf32>
    %41 = arith.truncf %7 : vector<64x32xf32> to vector<64x32xbf16>
    %c0_18 = arith.constant 0 : index
    %c0_19 = arith.constant 0 : index
    %42 = vector.load %arg4[%c0_18, %c0_19] : memref<32x96xbf16, #tpu.memory_space<vmem>>, vector<32x96xbf16>
    %cst_20 = arith.constant dense<0.000000e+00> : vector<64x96xf32>
    %43 = tpu.matmul %41, %42, %cst_20 {dimension_numbers = #tpu.dot_dimension_numbers<[1], [0], [0], [1], [0, 0, 1, 1], [], []>} : vector<64x32xbf16>, vector<32x96xbf16>, vector<64x96xf32> -> vector<64x96xf32>
    %44 = vector.extract_strided_slice %43 {offsets = [0, 0], sizes = [4, 96], strides = [1, 1]} : vector<64x96xf32> to vector<4x96xf32>
    %45 = vector.extract_strided_slice %43 {offsets = [8, 0], sizes = [4, 96], strides = [1, 1]} : vector<64x96xf32> to vector<4x96xf32>
    %46 = vector.extract_strided_slice %43 {offsets = [16, 0], sizes = [4, 96], strides = [1, 1]} : vector<64x96xf32> to vector<4x96xf32>
    %47 = vector.extract_strided_slice %43 {offsets = [24, 0], sizes = [4, 96], strides = [1, 1]} : vector<64x96xf32> to vector<4x96xf32>
    %48 = tpu.concatenate %44, %45, %46, %47 in 0 : vector<4x96xf32>, vector<4x96xf32>, vector<4x96xf32>, vector<4x96xf32> -> vector<16x96xf32>
    %49 = vector.extract_strided_slice %43 {offsets = [4, 0], sizes = [4, 96], strides = [1, 1]} : vector<64x96xf32> to vector<4x96xf32>
    %50 = vector.extract_strided_slice %43 {offsets = [12, 0], sizes = [4, 96], strides = [1, 1]} : vector<64x96xf32> to vector<4x96xf32>
    %51 = vector.extract_strided_slice %43 {offsets = [20, 0], sizes = [4, 96], strides = [1, 1]} : vector<64x96xf32> to vector<4x96xf32>
    %52 = vector.extract_strided_slice %43 {offsets = [28, 0], sizes = [4, 96], strides = [1, 1]} : vector<64x96xf32> to vector<4x96xf32>
    %53 = tpu.concatenate %49, %50, %51, %52 in 0 : vector<4x96xf32>, vector<4x96xf32>, vector<4x96xf32>, vector<4x96xf32> -> vector<16x96xf32>
    %54 = vector.extract_strided_slice %43 {offsets = [32, 0], sizes = [4, 96], strides = [1, 1]} : vector<64x96xf32> to vector<4x96xf32>
    %55 = vector.extract_strided_slice %43 {offsets = [40, 0], sizes = [4, 96], strides = [1, 1]} : vector<64x96xf32> to vector<4x96xf32>
    %56 = vector.extract_strided_slice %43 {offsets = [48, 0], sizes = [4, 96], strides = [1, 1]} : vector<64x96xf32> to vector<4x96xf32>
    %57 = vector.extract_strided_slice %43 {offsets = [56, 0], sizes = [4, 96], strides = [1, 1]} : vector<64x96xf32> to vector<4x96xf32>
    %58 = tpu.concatenate %54, %55, %56, %57 in 0 : vector<4x96xf32>, vector<4x96xf32>, vector<4x96xf32>, vector<4x96xf32> -> vector<16x96xf32>
    %59 = vector.extract_strided_slice %43 {offsets = [36, 0], sizes = [4, 96], strides = [1, 1]} : vector<64x96xf32> to vector<4x96xf32>
    %60 = vector.extract_strided_slice %43 {offsets = [44, 0], sizes = [4, 96], strides = [1, 1]} : vector<64x96xf32> to vector<4x96xf32>
    %61 = vector.extract_strided_slice %43 {offsets = [52, 0], sizes = [4, 96], strides = [1, 1]} : vector<64x96xf32> to vector<4x96xf32>
    %62 = vector.extract_strided_slice %43 {offsets = [60, 0], sizes = [4, 96], strides = [1, 1]} : vector<64x96xf32> to vector<4x96xf32>
    %63 = tpu.concatenate %59, %60, %61, %62 in 0 : vector<4x96xf32>, vector<4x96xf32>, vector<4x96xf32>, vector<4x96xf32> -> vector<16x96xf32>
    %64 = vector.shape_cast %48 : vector<16x96xf32> to vector<1x16x96xf32>
    %65 = vector.shape_cast %53 : vector<16x96xf32> to vector<1x16x96xf32>
    %66 = vector.shape_cast %58 : vector<16x96xf32> to vector<1x16x96xf32>
    %67 = vector.shape_cast %63 : vector<16x96xf32> to vector<1x16x96xf32>
    %68 = tpu.concatenate %64, %65, %66, %67 in 0 : vector<1x16x96xf32>, vector<1x16x96xf32>, vector<1x16x96xf32>, vector<1x16x96xf32> -> vector<4x16x96xf32>
    %69 = vector.extract_strided_slice %68 {offsets = [0, 0, 0], sizes = [4, 16, 32], strides = [1, 1, 1]} : vector<4x16x96xf32> to vector<4x16x32xf32>
    %cst_21 = arith.constant 0.353553385 : f32
    %70 = vector.broadcast %cst_21 : f32 to vector<4x16x32xf32>
    %71 = arith.mulf %69, %70 : vector<4x16x32xf32>
    %72 = vector.extract_strided_slice %68 {offsets = [0, 0, 32], sizes = [4, 16, 32], strides = [1, 1, 1]} : vector<4x16x96xf32> to vector<4x16x32xf32>
    %73 = vector.extract_strided_slice %68 {offsets = [0, 0, 64], sizes = [4, 16, 32], strides = [1, 1, 1]} : vector<4x16x96xf32> to vector<4x16x32xf32>
    %74 = vector.extract_strided_slice %71 {offsets = [0, 0, 0], sizes = [4, 16, 8], strides = [1, 1, 1]} : vector<4x16x32xf32> to vector<4x16x8xf32>
    %75 = vector.extract_strided_slice %72 {offsets = [0, 0, 0], sizes = [4, 16, 8], strides = [1, 1, 1]} : vector<4x16x32xf32> to vector<4x16x8xf32>
    %76 = vector.extract_strided_slice %73 {offsets = [0, 0, 0], sizes = [4, 16, 8], strides = [1, 1, 1]} : vector<4x16x32xf32> to vector<4x16x8xf32>
    "tpu.trace_start"() <{level = 10 : i32, message = "wqd,wkd->wqk"}> : () -> ()
    %cst_22 = arith.constant dense<0.000000e+00> : vector<4x16x16xf32>
    %77 = tpu.matmul %74, %75, %cst_22 {dimension_numbers = #tpu.dot_dimension_numbers<[2], [2], [1], [1], [0, 0, 0, 1, 1, 1], [0], [0]>} : vector<4x16x8xf32>, vector<4x16x8xf32>, vector<4x16x16xf32> -> vector<4x16x16xf32>
    "tpu.trace_stop"() : () -> ()
    %c0_23 = arith.constant 0 : index
    %c0_24 = arith.constant 0 : index
    %c0_25 = arith.constant 0 : index
    %78 = vector.load %arg5[%c0_23, %c0_24, %c0_25] : memref<4x16x16xf32, #tpu.memory_space<vmem>>, vector<1x16x16xf32>
    %79 = vector.shape_cast %78 : vector<1x16x16xf32> to vector<16x16xf32>
    %80 = vector.shape_cast %79 : vector<16x16xf32> to vector<1x16x16xf32>
    %81 = vector.broadcast %80 : vector<1x16x16xf32> to vector<4x16x16xf32>
    %82 = arith.addf %77, %81 : vector<4x16x16xf32>
    %cst_26 = arith.constant dense<0xFF800000> : vector<4x16xf32>
    %83 = vector.multi_reduction <maximumf>, %82, %cst_26 [2] : vector<4x16x16xf32> to vector<4x16xf32>
    %84 = vector.shape_cast %83 : vector<4x16xf32> to vector<4x16x1xf32>
    %85 = vector.broadcast %84 : vector<4x16x1xf32> to vector<4x16x16xf32>
    %86 = arith.subf %82, %85 : vector<4x16x16xf32>
    %87 = math.exp %86 : vector<4x16x16xf32>
    %cst_27 = arith.constant dense<0.000000e+00> : vector<4x16xf32>
    %88 = vector.multi_reduction <add>, %87, %cst_27 [2] : vector<4x16x16xf32> to vector<4x16xf32>
    %89 = vector.shape_cast %88 : vector<4x16xf32> to vector<4x16x1xf32>
    %90 = tpu.reciprocal %89 {approx = true} : vector<4x16x1xf32> -> vector<4x16x1xf32>
    %91 = vector.broadcast %90 : vector<4x16x1xf32> to vector<4x16x16xf32>
    %92 = arith.mulf %87, %91 : vector<4x16x16xf32>
    "tpu.trace_start"() <{level = 10 : i32, message = "wqk,wkd->wqd"}> : () -> ()
    %cst_28 = arith.constant dense<0.000000e+00> : vector<4x16x8xf32>
    %93 = tpu.matmul %92, %76, %cst_28 {dimension_numbers = #tpu.dot_dimension_numbers<[2], [1], [1], [2], [0, 0, 0, 1, 1, 2], [0], [0]>} : vector<4x16x16xf32>, vector<4x16x8xf32>, vector<4x16x8xf32> -> vector<4x16x8xf32>
    "tpu.trace_stop"() : () -> ()
    %94 = vector.extract_strided_slice %71 {offsets = [0, 0, 8], sizes = [4, 16, 8], strides = [1, 1, 1]} : vector<4x16x32xf32> to vector<4x16x8xf32>
    %95 = vector.extract_strided_slice %72 {offsets = [0, 0, 8], sizes = [4, 16, 8], strides = [1, 1, 1]} : vector<4x16x32xf32> to vector<4x16x8xf32>
    %96 = vector.extract_strided_slice %73 {offsets = [0, 0, 8], sizes = [4, 16, 8], strides = [1, 1, 1]} : vector<4x16x32xf32> to vector<4x16x8xf32>
    "tpu.trace_start"() <{level = 10 : i32, message = "wqd,wkd->wqk"}> : () -> ()
    %cst_29 = arith.constant dense<0.000000e+00> : vector<4x16x16xf32>
    %97 = tpu.matmul %94, %95, %cst_29 {dimension_numbers = #tpu.dot_dimension_numbers<[2], [2], [1], [1], [0, 0, 0, 1, 1, 1], [0], [0]>} : vector<4x16x8xf32>, vector<4x16x8xf32>, vector<4x16x16xf32> -> vector<4x16x16xf32>
    "tpu.trace_stop"() : () -> ()
    %c1 = arith.constant 1 : index
    %c0_30 = arith.constant 0 : index
    %c0_31 = arith.constant 0 : index
    %98 = vector.load %arg5[%c1, %c0_30, %c0_31] : memref<4x16x16xf32, #tpu.memory_space<vmem>>, vector<1x16x16xf32>
    %99 = vector.shape_cast %98 : vector<1x16x16xf32> to vector<16x16xf32>
    %100 = vector.shape_cast %99 : vector<16x16xf32> to vector<1x16x16xf32>
    %101 = vector.broadcast %100 : vector<1x16x16xf32> to vector<4x16x16xf32>
    %102 = arith.addf %97, %101 : vector<4x16x16xf32>
    %cst_32 = arith.constant dense<0xFF800000> : vector<4x16xf32>
    %103 = vector.multi_reduction <maximumf>, %102, %cst_32 [2] : vector<4x16x16xf32> to vector<4x16xf32>
    %104 = vector.shape_cast %103 : vector<4x16xf32> to vector<4x16x1xf32>
    %105 = vector.broadcast %104 : vector<4x16x1xf32> to vector<4x16x16xf32>
    %106 = arith.subf %102, %105 : vector<4x16x16xf32>
    %107 = math.exp %106 : vector<4x16x16xf32>
    %cst_33 = arith.constant dense<0.000000e+00> : vector<4x16xf32>
    %108 = vector.multi_reduction <add>, %107, %cst_33 [2] : vector<4x16x16xf32> to vector<4x16xf32>
    %109 = vector.shape_cast %108 : vector<4x16xf32> to vector<4x16x1xf32>
    %110 = tpu.reciprocal %109 {approx = true} : vector<4x16x1xf32> -> vector<4x16x1xf32>
    %111 = vector.broadcast %110 : vector<4x16x1xf32> to vector<4x16x16xf32>
    %112 = arith.mulf %107, %111 : vector<4x16x16xf32>
    "tpu.trace_start"() <{level = 10 : i32, message = "wqk,wkd->wqd"}> : () -> ()
    %cst_34 = arith.constant dense<0.000000e+00> : vector<4x16x8xf32>
    %113 = tpu.matmul %112, %96, %cst_34 {dimension_numbers = #tpu.dot_dimension_numbers<[2], [1], [1], [2], [0, 0, 0, 1, 1, 2], [0], [0]>} : vector<4x16x16xf32>, vector<4x16x8xf32>, vector<4x16x8xf32> -> vector<4x16x8xf32>
    "tpu.trace_stop"() : () -> ()
    %114 = vector.extract_strided_slice %71 {offsets = [0, 0, 16], sizes = [4, 16, 8], strides = [1, 1, 1]} : vector<4x16x32xf32> to vector<4x16x8xf32>
    %115 = vector.extract_strided_slice %72 {offsets = [0, 0, 16], sizes = [4, 16, 8], strides = [1, 1, 1]} : vector<4x16x32xf32> to vector<4x16x8xf32>
    %116 = vector.extract_strided_slice %73 {offsets = [0, 0, 16], sizes = [4, 16, 8], strides = [1, 1, 1]} : vector<4x16x32xf32> to vector<4x16x8xf32>
    "tpu.trace_start"() <{level = 10 : i32, message = "wqd,wkd->wqk"}> : () -> ()
    %cst_35 = arith.constant dense<0.000000e+00> : vector<4x16x16xf32>
    %117 = tpu.matmul %114, %115, %cst_35 {dimension_numbers = #tpu.dot_dimension_numbers<[2], [2], [1], [1], [0, 0, 0, 1, 1, 1], [0], [0]>} : vector<4x16x8xf32>, vector<4x16x8xf32>, vector<4x16x16xf32> -> vector<4x16x16xf32>
    "tpu.trace_stop"() : () -> ()
    %c2 = arith.constant 2 : index
    %c0_36 = arith.constant 0 : index
    %c0_37 = arith.constant 0 : index
    %118 = vector.load %arg5[%c2, %c0_36, %c0_37] : memref<4x16x16xf32, #tpu.memory_space<vmem>>, vector<1x16x16xf32>
    %119 = vector.shape_cast %118 : vector<1x16x16xf32> to vector<16x16xf32>
    %120 = vector.shape_cast %119 : vector<16x16xf32> to vector<1x16x16xf32>
    %121 = vector.broadcast %120 : vector<1x16x16xf32> to vector<4x16x16xf32>
    %122 = arith.addf %117, %121 : vector<4x16x16xf32>
    %cst_38 = arith.constant dense<0xFF800000> : vector<4x16xf32>
    %123 = vector.multi_reduction <maximumf>, %122, %cst_38 [2] : vector<4x16x16xf32> to vector<4x16xf32>
    %124 = vector.shape_cast %123 : vector<4x16xf32> to vector<4x16x1xf32>
    %125 = vector.broadcast %124 : vector<4x16x1xf32> to vector<4x16x16xf32>
    %126 = arith.subf %122, %125 : vector<4x16x16xf32>
    %127 = math.exp %126 : vector<4x16x16xf32>
    %cst_39 = arith.constant dense<0.000000e+00> : vector<4x16xf32>
    %128 = vector.multi_reduction <add>, %127, %cst_39 [2] : vector<4x16x16xf32> to vector<4x16xf32>
    %129 = vector.shape_cast %128 : vector<4x16xf32> to vector<4x16x1xf32>
    %130 = tpu.reciprocal %129 {approx = true} : vector<4x16x1xf32> -> vector<4x16x1xf32>
    %131 = vector.broadcast %130 : vector<4x16x1xf32> to vector<4x16x16xf32>
    %132 = arith.mulf %127, %131 : vector<4x16x16xf32>
    "tpu.trace_start"() <{level = 10 : i32, message = "wqk,wkd->wqd"}> : () -> ()
    %cst_40 = arith.constant dense<0.000000e+00> : vector<4x16x8xf32>
    %133 = tpu.matmul %132, %116, %cst_40 {dimension_numbers = #tpu.dot_dimension_numbers<[2], [1], [1], [2], [0, 0, 0, 1, 1, 2], [0], [0]>} : vector<4x16x16xf32>, vector<4x16x8xf32>, vector<4x16x8xf32> -> vector<4x16x8xf32>
    "tpu.trace_stop"() : () -> ()
    %134 = vector.extract_strided_slice %71 {offsets = [0, 0, 24], sizes = [4, 16, 8], strides = [1, 1, 1]} : vector<4x16x32xf32> to vector<4x16x8xf32>
    %135 = vector.extract_strided_slice %72 {offsets = [0, 0, 24], sizes = [4, 16, 8], strides = [1, 1, 1]} : vector<4x16x32xf32> to vector<4x16x8xf32>
    %136 = vector.extract_strided_slice %73 {offsets = [0, 0, 24], sizes = [4, 16, 8], strides = [1, 1, 1]} : vector<4x16x32xf32> to vector<4x16x8xf32>
    "tpu.trace_start"() <{level = 10 : i32, message = "wqd,wkd->wqk"}> : () -> ()
    %cst_41 = arith.constant dense<0.000000e+00> : vector<4x16x16xf32>
    %137 = tpu.matmul %134, %135, %cst_41 {dimension_numbers = #tpu.dot_dimension_numbers<[2], [2], [1], [1], [0, 0, 0, 1, 1, 1], [0], [0]>} : vector<4x16x8xf32>, vector<4x16x8xf32>, vector<4x16x16xf32> -> vector<4x16x16xf32>
    "tpu.trace_stop"() : () -> ()
    %c3 = arith.constant 3 : index
    %c0_42 = arith.constant 0 : index
    %c0_43 = arith.constant 0 : index
    %138 = vector.load %arg5[%c3, %c0_42, %c0_43] : memref<4x16x16xf32, #tpu.memory_space<vmem>>, vector<1x16x16xf32>
    %139 = vector.shape_cast %138 : vector<1x16x16xf32> to vector<16x16xf32>
    %140 = vector.shape_cast %139 : vector<16x16xf32> to vector<1x16x16xf32>
    %141 = vector.broadcast %140 : vector<1x16x16xf32> to vector<4x16x16xf32>
    %142 = arith.addf %137, %141 : vector<4x16x16xf32>
    %cst_44 = arith.constant dense<0xFF800000> : vector<4x16xf32>
    %143 = vector.multi_reduction <maximumf>, %142, %cst_44 [2] : vector<4x16x16xf32> to vector<4x16xf32>
    %144 = vector.shape_cast %143 : vector<4x16xf32> to vector<4x16x1xf32>
    %145 = vector.broadcast %144 : vector<4x16x1xf32> to vector<4x16x16xf32>
    %146 = arith.subf %142, %145 : vector<4x16x16xf32>
    %147 = math.exp %146 : vector<4x16x16xf32>
    %cst_45 = arith.constant dense<0.000000e+00> : vector<4x16xf32>
    %148 = vector.multi_reduction <add>, %147, %cst_45 [2] : vector<4x16x16xf32> to vector<4x16xf32>
    %149 = vector.shape_cast %148 : vector<4x16xf32> to vector<4x16x1xf32>
    %150 = tpu.reciprocal %149 {approx = true} : vector<4x16x1xf32> -> vector<4x16x1xf32>
    %151 = vector.broadcast %150 : vector<4x16x1xf32> to vector<4x16x16xf32>
    %152 = arith.mulf %147, %151 : vector<4x16x16xf32>
    "tpu.trace_start"() <{level = 10 : i32, message = "wqk,wkd->wqd"}> : () -> ()
    %cst_46 = arith.constant dense<0.000000e+00> : vector<4x16x8xf32>
    %153 = tpu.matmul %152, %136, %cst_46 {dimension_numbers = #tpu.dot_dimension_numbers<[2], [1], [1], [2], [0, 0, 0, 1, 1, 2], [0], [0]>} : vector<4x16x16xf32>, vector<4x16x8xf32>, vector<4x16x8xf32> -> vector<4x16x8xf32>
    "tpu.trace_stop"() : () -> ()
    %154 = tpu.concatenate %93, %113, %133, %153 in 2 : vector<4x16x8xf32>, vector<4x16x8xf32>, vector<4x16x8xf32>, vector<4x16x8xf32> -> vector<4x16x32xf32>
    %155 = vector.extract_strided_slice %154 {offsets = [0, 0, 0], sizes = [1, 16, 32], strides = [1, 1, 1]} : vector<4x16x32xf32> to vector<1x16x32xf32>
    %156 = vector.shape_cast %155 : vector<1x16x32xf32> to vector<16x32xf32>
    %157 = vector.extract_strided_slice %156 {offsets = [0, 0], sizes = [4, 32], strides = [1, 1]} : vector<16x32xf32> to vector<4x32xf32>
    %158 = vector.extract_strided_slice %154 {offsets = [1, 0, 0], sizes = [1, 16, 32], strides = [1, 1, 1]} : vector<4x16x32xf32> to vector<1x16x32xf32>
    %159 = vector.shape_cast %158 : vector<1x16x32xf32> to vector<16x32xf32>
    %160 = vector.extract_strided_slice %159 {offsets = [0, 0], sizes = [4, 32], strides = [1, 1]} : vector<16x32xf32> to vector<4x32xf32>
    %161 = tpu.concatenate %157, %160 in 0 : vector<4x32xf32>, vector<4x32xf32> -> vector<8x32xf32>
    %162 = vector.extract_strided_slice %154 {offsets = [0, 0, 0], sizes = [1, 16, 32], strides = [1, 1, 1]} : vector<4x16x32xf32> to vector<1x16x32xf32>
    %163 = vector.shape_cast %162 : vector<1x16x32xf32> to vector<16x32xf32>
    %164 = vector.extract_strided_slice %163 {offsets = [4, 0], sizes = [4, 32], strides = [1, 1]} : vector<16x32xf32> to vector<4x32xf32>
    %165 = vector.extract_strided_slice %154 {offsets = [1, 0, 0], sizes = [1, 16, 32], strides = [1, 1, 1]} : vector<4x16x32xf32> to vector<1x16x32xf32>
    %166 = vector.shape_cast %165 : vector<1x16x32xf32> to vector<16x32xf32>
    %167 = vector.extract_strided_slice %166 {offsets = [4, 0], sizes = [4, 32], strides = [1, 1]} : vector<16x32xf32> to vector<4x32xf32>
    %168 = tpu.concatenate %164, %167 in 0 : vector<4x32xf32>, vector<4x32xf32> -> vector<8x32xf32>
    %169 = vector.extract_strided_slice %154 {offsets = [0, 0, 0], sizes = [1, 16, 32], strides = [1, 1, 1]} : vector<4x16x32xf32> to vector<1x16x32xf32>
    %170 = vector.shape_cast %169 : vector<1x16x32xf32> to vector<16x32xf32>
    %171 = vector.extract_strided_slice %170 {offsets = [8, 0], sizes = [4, 32], strides = [1, 1]} : vector<16x32xf32> to vector<4x32xf32>
    %172 = vector.extract_strided_slice %154 {offsets = [1, 0, 0], sizes = [1, 16, 32], strides = [1, 1, 1]} : vector<4x16x32xf32> to vector<1x16x32xf32>
    %173 = vector.shape_cast %172 : vector<1x16x32xf32> to vector<16x32xf32>
    %174 = vector.extract_strided_slice %173 {offsets = [8, 0], sizes = [4, 32], strides = [1, 1]} : vector<16x32xf32> to vector<4x32xf32>
    %175 = tpu.concatenate %171, %174 in 0 : vector<4x32xf32>, vector<4x32xf32> -> vector<8x32xf32>
    %176 = vector.extract_strided_slice %154 {offsets = [0, 0, 0], sizes = [1, 16, 32], strides = [1, 1, 1]} : vector<4x16x32xf32> to vector<1x16x32xf32>
    %177 = vector.shape_cast %176 : vector<1x16x32xf32> to vector<16x32xf32>
    %178 = vector.extract_strided_slice %177 {offsets = [12, 0], sizes = [4, 32], strides = [1, 1]} : vector<16x32xf32> to vector<4x32xf32>
    %179 = vector.extract_strided_slice %154 {offsets = [1, 0, 0], sizes = [1, 16, 32], strides = [1, 1, 1]} : vector<4x16x32xf32> to vector<1x16x32xf32>
    %180 = vector.shape_cast %179 : vector<1x16x32xf32> to vector<16x32xf32>
    %181 = vector.extract_strided_slice %180 {offsets = [12, 0], sizes = [4, 32], strides = [1, 1]} : vector<16x32xf32> to vector<4x32xf32>
    %182 = tpu.concatenate %178, %181 in 0 : vector<4x32xf32>, vector<4x32xf32> -> vector<8x32xf32>
    %183 = vector.extract_strided_slice %154 {offsets = [2, 0, 0], sizes = [1, 16, 32], strides = [1, 1, 1]} : vector<4x16x32xf32> to vector<1x16x32xf32>
    %184 = vector.shape_cast %183 : vector<1x16x32xf32> to vector<16x32xf32>
    %185 = vector.extract_strided_slice %184 {offsets = [0, 0], sizes = [4, 32], strides = [1, 1]} : vector<16x32xf32> to vector<4x32xf32>
    %186 = vector.extract_strided_slice %154 {offsets = [3, 0, 0], sizes = [1, 16, 32], strides = [1, 1, 1]} : vector<4x16x32xf32> to vector<1x16x32xf32>
    %187 = vector.shape_cast %186 : vector<1x16x32xf32> to vector<16x32xf32>
    %188 = vector.extract_strided_slice %187 {offsets = [0, 0], sizes = [4, 32], strides = [1, 1]} : vector<16x32xf32> to vector<4x32xf32>
    %189 = tpu.concatenate %185, %188 in 0 : vector<4x32xf32>, vector<4x32xf32> -> vector<8x32xf32>
    %190 = vector.extract_strided_slice %154 {offsets = [2, 0, 0], sizes = [1, 16, 32], strides = [1, 1, 1]} : vector<4x16x32xf32> to vector<1x16x32xf32>
    %191 = vector.shape_cast %190 : vector<1x16x32xf32> to vector<16x32xf32>
    %192 = vector.extract_strided_slice %191 {offsets = [4, 0], sizes = [4, 32], strides = [1, 1]} : vector<16x32xf32> to vector<4x32xf32>
    %193 = vector.extract_strided_slice %154 {offsets = [3, 0, 0], sizes = [1, 16, 32], strides = [1, 1, 1]} : vector<4x16x32xf32> to vector<1x16x32xf32>
    %194 = vector.shape_cast %193 : vector<1x16x32xf32> to vector<16x32xf32>
    %195 = vector.extract_strided_slice %194 {offsets = [4, 0], sizes = [4, 32], strides = [1, 1]} : vector<16x32xf32> to vector<4x32xf32>
    %196 = tpu.concatenate %192, %195 in 0 : vector<4x32xf32>, vector<4x32xf32> -> vector<8x32xf32>
    %197 = vector.extract_strided_slice %154 {offsets = [2, 0, 0], sizes = [1, 16, 32], strides = [1, 1, 1]} : vector<4x16x32xf32> to vector<1x16x32xf32>
    %198 = vector.shape_cast %197 : vector<1x16x32xf32> to vector<16x32xf32>
    %199 = vector.extract_strided_slice %198 {offsets = [8, 0], sizes = [4, 32], strides = [1, 1]} : vector<16x32xf32> to vector<4x32xf32>
    %200 = vector.extract_strided_slice %154 {offsets = [3, 0, 0], sizes = [1, 16, 32], strides = [1, 1, 1]} : vector<4x16x32xf32> to vector<1x16x32xf32>
    %201 = vector.shape_cast %200 : vector<1x16x32xf32> to vector<16x32xf32>
    %202 = vector.extract_strided_slice %201 {offsets = [8, 0], sizes = [4, 32], strides = [1, 1]} : vector<16x32xf32> to vector<4x32xf32>
    %203 = tpu.concatenate %199, %202 in 0 : vector<4x32xf32>, vector<4x32xf32> -> vector<8x32xf32>
    %204 = vector.extract_strided_slice %154 {offsets = [2, 0, 0], sizes = [1, 16, 32], strides = [1, 1, 1]} : vector<4x16x32xf32> to vector<1x16x32xf32>
    %205 = vector.shape_cast %204 : vector<1x16x32xf32> to vector<16x32xf32>
    %206 = vector.extract_strided_slice %205 {offsets = [12, 0], sizes = [4, 32], strides = [1, 1]} : vector<16x32xf32> to vector<4x32xf32>
    %207 = vector.extract_strided_slice %154 {offsets = [3, 0, 0], sizes = [1, 16, 32], strides = [1, 1, 1]} : vector<4x16x32xf32> to vector<1x16x32xf32>
    %208 = vector.shape_cast %207 : vector<1x16x32xf32> to vector<16x32xf32>
    %209 = vector.extract_strided_slice %208 {offsets = [12, 0], sizes = [4, 32], strides = [1, 1]} : vector<16x32xf32> to vector<4x32xf32>
    %210 = tpu.concatenate %206, %209 in 0 : vector<4x32xf32>, vector<4x32xf32> -> vector<8x32xf32>
    %211 = tpu.concatenate %161, %168, %175, %182, %189, %196, %203, %210 in 0 : vector<8x32xf32>, vector<8x32xf32>, vector<8x32xf32>, vector<8x32xf32>, vector<8x32xf32>, vector<8x32xf32>, vector<8x32xf32>, vector<8x32xf32> -> vector<64x32xf32>
    %212 = vector.shape_cast %211 : vector<64x32xf32> to vector<8x8x32xf32>
    %213 = vector.extract_strided_slice %212 {offsets = [6, 0, 0], sizes = [1, 8, 32], strides = [1, 1, 1]} : vector<8x8x32xf32> to vector<1x8x32xf32>
    %214 = tpu.concatenate %212, %213 in 0 : vector<8x8x32xf32>, vector<1x8x32xf32> -> vector<9x8x32xf32>
    %215 = vector.extract_strided_slice %212 {offsets = [0, 6, 0], sizes = [8, 1, 32], strides = [1, 1, 1]} : vector<8x8x32xf32> to vector<8x1x32xf32>
    %216 = tpu.concatenate %212, %215 in 1 : vector<8x8x32xf32>, vector<8x1x32xf32> -> vector<8x9x32xf32>
    %217 = vector.extract_strided_slice %214 {offsets = [0, 0, 0], sizes = [7, 8, 32], strides = [1, 1, 1]} : vector<9x8x32xf32> to vector<7x8x32xf32>
    %cst_47 = arith.constant -1.000000e+30 : f32
    %218 = vector.broadcast %cst_47 : f32 to vector<1x8x32xf32>
    %219 = tpu.concatenate %218, %217 in 0 : vector<1x8x32xf32>, vector<7x8x32xf32> -> vector<8x8x32xf32>
    %220 = vector.extract_strided_slice %214 {offsets = [0, 0, 0], sizes = [7, 8, 32], strides = [1, 1, 1]} : vector<9x8x32xf32> to vector<7x8x32xf32>
    %cst_48 = arith.constant 0.000000e+00 : f32
    %221 = vector.broadcast %cst_48 : f32 to vector<1x8x32xf32>
    %222 = tpu.concatenate %221, %220 in 0 : vector<1x8x32xf32>, vector<7x8x32xf32> -> vector<8x8x32xf32>
    %223 = vector.extract_strided_slice %216 {offsets = [0, 0, 0], sizes = [8, 7, 32], strides = [1, 1, 1]} : vector<8x9x32xf32> to vector<8x7x32xf32>
    %cst_49 = arith.constant -1.000000e+30 : f32
    %224 = vector.broadcast %cst_49 : f32 to vector<8x1x32xf32>
    %225 = tpu.concatenate %224, %223 in 1 : vector<8x1x32xf32>, vector<8x7x32xf32> -> vector<8x8x32xf32>
    %226 = vector.extract_strided_slice %216 {offsets = [0, 0, 0], sizes = [8, 7, 32], strides = [1, 1, 1]} : vector<8x9x32xf32> to vector<8x7x32xf32>
    %cst_50 = arith.constant 0.000000e+00 : f32
    %227 = vector.broadcast %cst_50 : f32 to vector<8x1x32xf32>
    %228 = tpu.concatenate %227, %226 in 1 : vector<8x1x32xf32>, vector<8x7x32xf32> -> vector<8x8x32xf32>
    %229 = vector.extract_strided_slice %214 {offsets = [0, 0, 0], sizes = [8, 8, 32], strides = [1, 1, 1]} : vector<9x8x32xf32> to vector<8x8x32xf32>
    %230 = arith.maximumf %219, %229 : vector<8x8x32xf32>
    %231 = vector.extract_strided_slice %214 {offsets = [0, 0, 0], sizes = [8, 8, 32], strides = [1, 1, 1]} : vector<9x8x32xf32> to vector<8x8x32xf32>
    %232 = arith.addf %222, %231 : vector<8x8x32xf32>
    %233 = vector.extract_strided_slice %216 {offsets = [0, 0, 0], sizes = [8, 8, 32], strides = [1, 1, 1]} : vector<8x9x32xf32> to vector<8x8x32xf32>
    %234 = arith.maximumf %225, %233 : vector<8x8x32xf32>
    %235 = vector.extract_strided_slice %216 {offsets = [0, 0, 0], sizes = [8, 8, 32], strides = [1, 1, 1]} : vector<8x9x32xf32> to vector<8x8x32xf32>
    %236 = arith.addf %228, %235 : vector<8x8x32xf32>
    %237 = vector.extract_strided_slice %214 {offsets = [1, 0, 0], sizes = [8, 8, 32], strides = [1, 1, 1]} : vector<9x8x32xf32> to vector<8x8x32xf32>
    %238 = arith.maximumf %230, %237 : vector<8x8x32xf32>
    %239 = vector.extract_strided_slice %214 {offsets = [1, 0, 0], sizes = [8, 8, 32], strides = [1, 1, 1]} : vector<9x8x32xf32> to vector<8x8x32xf32>
    %240 = arith.addf %232, %239 : vector<8x8x32xf32>
    %241 = vector.extract_strided_slice %216 {offsets = [0, 1, 0], sizes = [8, 8, 32], strides = [1, 1, 1]} : vector<8x9x32xf32> to vector<8x8x32xf32>
    %242 = arith.maximumf %234, %241 : vector<8x8x32xf32>
    %243 = vector.extract_strided_slice %216 {offsets = [0, 1, 0], sizes = [8, 8, 32], strides = [1, 1, 1]} : vector<8x9x32xf32> to vector<8x8x32xf32>
    %244 = arith.addf %236, %243 : vector<8x8x32xf32>
    %245 = vector.extract_strided_slice %214 {offsets = [2, 0, 0], sizes = [7, 8, 32], strides = [1, 1, 1]} : vector<9x8x32xf32> to vector<7x8x32xf32>
    %cst_51 = arith.constant -1.000000e+30 : f32
    %246 = vector.broadcast %cst_51 : f32 to vector<1x8x32xf32>
    %247 = tpu.concatenate %245, %246 in 0 : vector<7x8x32xf32>, vector<1x8x32xf32> -> vector<8x8x32xf32>
    %248 = arith.maximumf %238, %247 : vector<8x8x32xf32>
    %249 = vector.extract_strided_slice %214 {offsets = [2, 0, 0], sizes = [7, 8, 32], strides = [1, 1, 1]} : vector<9x8x32xf32> to vector<7x8x32xf32>
    %cst_52 = arith.constant 0.000000e+00 : f32
    %250 = vector.broadcast %cst_52 : f32 to vector<1x8x32xf32>
    %251 = tpu.concatenate %249, %250 in 0 : vector<7x8x32xf32>, vector<1x8x32xf32> -> vector<8x8x32xf32>
    %252 = arith.addf %240, %251 : vector<8x8x32xf32>
    %253 = vector.extract_strided_slice %216 {offsets = [0, 2, 0], sizes = [8, 7, 32], strides = [1, 1, 1]} : vector<8x9x32xf32> to vector<8x7x32xf32>
    %cst_53 = arith.constant -1.000000e+30 : f32
    %254 = vector.broadcast %cst_53 : f32 to vector<8x1x32xf32>
    %255 = tpu.concatenate %253, %254 in 1 : vector<8x7x32xf32>, vector<8x1x32xf32> -> vector<8x8x32xf32>
    %256 = arith.maximumf %242, %255 : vector<8x8x32xf32>
    %257 = vector.extract_strided_slice %216 {offsets = [0, 2, 0], sizes = [8, 7, 32], strides = [1, 1, 1]} : vector<8x9x32xf32> to vector<8x7x32xf32>
    %cst_54 = arith.constant 0.000000e+00 : f32
    %258 = vector.broadcast %cst_54 : f32 to vector<8x1x32xf32>
    %259 = tpu.concatenate %257, %258 in 1 : vector<8x7x32xf32>, vector<8x1x32xf32> -> vector<8x8x32xf32>
    %260 = arith.addf %244, %259 : vector<8x8x32xf32>
    %261 = arith.addf %248, %256 : vector<8x8x32xf32>
    %262 = arith.addf %252, %260 : vector<8x8x32xf32>
    %cst_55 = arith.constant 2.500000e-01 : f32
    %263 = vector.broadcast %cst_55 : f32 to vector<8x8x32xf32>
    %264 = arith.mulf %262, %263 : vector<8x8x32xf32>
    %265 = arith.addf %261, %264 : vector<8x8x32xf32>
    %266 = vector.shape_cast %40 : vector<64x32xf32> to vector<8x8x32xf32>
    %267 = arith.addf %265, %266 : vector<8x8x32xf32>
    %268 = vector.extract_strided_slice %267 {offsets = [0, 6, 0], sizes = [8, 1, 32], strides = [1, 1, 1]} : vector<8x8x32xf32> to vector<8x1x32xf32>
    %269 = tpu.concatenate %267, %268 in 1 : vector<8x8x32xf32>, vector<8x1x32xf32> -> vector<8x9x32xf32>
    %270 = vector.extract_strided_slice %269 {offsets = [6, 0, 0], sizes = [1, 9, 32], strides = [1, 1, 1]} : vector<8x9x32xf32> to vector<1x9x32xf32>
    %271 = tpu.concatenate %269, %270 in 0 : vector<8x9x32xf32>, vector<1x9x32xf32> -> vector<9x9x32xf32>
    %c0_56 = arith.constant 0 : index
    %c0_57 = arith.constant 0 : index
    %272 = vector.load %arg6[%c0_56, %c0_57] : memref<16x32xf32, #tpu.memory_space<vmem>>, vector<16x32xf32>
    %273 = vector.extract_strided_slice %271 {offsets = [0, 0, 0], sizes = [9, 7, 32], strides = [1, 1, 1]} : vector<9x9x32xf32> to vector<9x7x32xf32>
    %cst_58 = arith.constant 0.000000e+00 : f32
    %274 = vector.broadcast %cst_58 : f32 to vector<9x1x32xf32>
    %275 = tpu.concatenate %274, %273 in 1 : vector<9x1x32xf32>, vector<9x7x32xf32> -> vector<9x8x32xf32>
    %276 = vector.extract_strided_slice %275 {offsets = [0, 0, 0], sizes = [7, 8, 32], strides = [1, 1, 1]} : vector<9x8x32xf32> to vector<7x8x32xf32>
    %cst_59 = arith.constant 0.000000e+00 : f32
    %277 = vector.broadcast %cst_59 : f32 to vector<1x8x32xf32>
    %278 = tpu.concatenate %277, %276 in 0 : vector<1x8x32xf32>, vector<7x8x32xf32> -> vector<8x8x32xf32>
    %279 = vector.extract_strided_slice %272 {offsets = [0, 0], sizes = [1, 32], strides = [1, 1]} : vector<16x32xf32> to vector<1x32xf32>
    %280 = vector.shape_cast %279 : vector<1x32xf32> to vector<32xf32>
    %281 = vector.shape_cast %280 : vector<32xf32> to vector<1x1x32xf32>
    %282 = vector.broadcast %281 : vector<1x1x32xf32> to vector<8x8x32xf32>
    %283 = arith.mulf %278, %282 : vector<8x8x32xf32>
    %284 = vector.extract_strided_slice %275 {offsets = [0, 0, 0], sizes = [8, 8, 32], strides = [1, 1, 1]} : vector<9x8x32xf32> to vector<8x8x32xf32>
    %285 = vector.extract_strided_slice %272 {offsets = [4, 0], sizes = [1, 32], strides = [1, 1]} : vector<16x32xf32> to vector<1x32xf32>
    %286 = vector.shape_cast %285 : vector<1x32xf32> to vector<32xf32>
    %287 = vector.shape_cast %286 : vector<32xf32> to vector<1x1x32xf32>
    %288 = vector.broadcast %287 : vector<1x1x32xf32> to vector<8x8x32xf32>
    %289 = arith.mulf %284, %288 : vector<8x8x32xf32>
    %290 = arith.addf %283, %289 : vector<8x8x32xf32>
    %291 = vector.extract_strided_slice %275 {offsets = [1, 0, 0], sizes = [8, 8, 32], strides = [1, 1, 1]} : vector<9x8x32xf32> to vector<8x8x32xf32>
    %292 = vector.extract_strided_slice %272 {offsets = [8, 0], sizes = [1, 32], strides = [1, 1]} : vector<16x32xf32> to vector<1x32xf32>
    %293 = vector.shape_cast %292 : vector<1x32xf32> to vector<32xf32>
    %294 = vector.shape_cast %293 : vector<32xf32> to vector<1x1x32xf32>
    %295 = vector.broadcast %294 : vector<1x1x32xf32> to vector<8x8x32xf32>
    %296 = arith.mulf %291, %295 : vector<8x8x32xf32>
    %297 = arith.addf %290, %296 : vector<8x8x32xf32>
    %298 = vector.extract_strided_slice %275 {offsets = [2, 0, 0], sizes = [7, 8, 32], strides = [1, 1, 1]} : vector<9x8x32xf32> to vector<7x8x32xf32>
    %cst_60 = arith.constant 0.000000e+00 : f32
    %299 = vector.broadcast %cst_60 : f32 to vector<1x8x32xf32>
    %300 = tpu.concatenate %298, %299 in 0 : vector<7x8x32xf32>, vector<1x8x32xf32> -> vector<8x8x32xf32>
    %301 = vector.extract_strided_slice %272 {offsets = [12, 0], sizes = [1, 32], strides = [1, 1]} : vector<16x32xf32> to vector<1x32xf32>
    %302 = vector.shape_cast %301 : vector<1x32xf32> to vector<32xf32>
    %303 = vector.shape_cast %302 : vector<32xf32> to vector<1x1x32xf32>
    %304 = vector.broadcast %303 : vector<1x1x32xf32> to vector<8x8x32xf32>
    %305 = arith.mulf %300, %304 : vector<8x8x32xf32>
    %306 = arith.addf %297, %305 : vector<8x8x32xf32>
    %307 = vector.extract_strided_slice %271 {offsets = [0, 0, 0], sizes = [9, 8, 32], strides = [1, 1, 1]} : vector<9x9x32xf32> to vector<9x8x32xf32>
    %308 = vector.extract_strided_slice %307 {offsets = [0, 0, 0], sizes = [7, 8, 32], strides = [1, 1, 1]} : vector<9x8x32xf32> to vector<7x8x32xf32>
    %cst_61 = arith.constant 0.000000e+00 : f32
    %309 = vector.broadcast %cst_61 : f32 to vector<1x8x32xf32>
    %310 = tpu.concatenate %309, %308 in 0 : vector<1x8x32xf32>, vector<7x8x32xf32> -> vector<8x8x32xf32>
    %311 = vector.extract_strided_slice %272 {offsets = [1, 0], sizes = [1, 32], strides = [1, 1]} : vector<16x32xf32> to vector<1x32xf32>
    %312 = vector.shape_cast %311 : vector<1x32xf32> to vector<32xf32>
    %313 = vector.shape_cast %312 : vector<32xf32> to vector<1x1x32xf32>
    %314 = vector.broadcast %313 : vector<1x1x32xf32> to vector<8x8x32xf32>
    %315 = arith.mulf %310, %314 : vector<8x8x32xf32>
    %316 = arith.addf %306, %315 : vector<8x8x32xf32>
    %317 = vector.extract_strided_slice %307 {offsets = [0, 0, 0], sizes = [8, 8, 32], strides = [1, 1, 1]} : vector<9x8x32xf32> to vector<8x8x32xf32>
    %318 = vector.extract_strided_slice %272 {offsets = [5, 0], sizes = [1, 32], strides = [1, 1]} : vector<16x32xf32> to vector<1x32xf32>
    %319 = vector.shape_cast %318 : vector<1x32xf32> to vector<32xf32>
    %320 = vector.shape_cast %319 : vector<32xf32> to vector<1x1x32xf32>
    %321 = vector.broadcast %320 : vector<1x1x32xf32> to vector<8x8x32xf32>
    %322 = arith.mulf %317, %321 : vector<8x8x32xf32>
    %323 = arith.addf %316, %322 : vector<8x8x32xf32>
    %324 = vector.extract_strided_slice %307 {offsets = [1, 0, 0], sizes = [8, 8, 32], strides = [1, 1, 1]} : vector<9x8x32xf32> to vector<8x8x32xf32>
    %325 = vector.extract_strided_slice %272 {offsets = [9, 0], sizes = [1, 32], strides = [1, 1]} : vector<16x32xf32> to vector<1x32xf32>
    %326 = vector.shape_cast %325 : vector<1x32xf32> to vector<32xf32>
    %327 = vector.shape_cast %326 : vector<32xf32> to vector<1x1x32xf32>
    %328 = vector.broadcast %327 : vector<1x1x32xf32> to vector<8x8x32xf32>
    %329 = arith.mulf %324, %328 : vector<8x8x32xf32>
    %330 = arith.addf %323, %329 : vector<8x8x32xf32>
    %331 = vector.extract_strided_slice %307 {offsets = [2, 0, 0], sizes = [7, 8, 32], strides = [1, 1, 1]} : vector<9x8x32xf32> to vector<7x8x32xf32>
    %cst_62 = arith.constant 0.000000e+00 : f32
    %332 = vector.broadcast %cst_62 : f32 to vector<1x8x32xf32>
    %333 = tpu.concatenate %331, %332 in 0 : vector<7x8x32xf32>, vector<1x8x32xf32> -> vector<8x8x32xf32>
    %334 = vector.extract_strided_slice %272 {offsets = [13, 0], sizes = [1, 32], strides = [1, 1]} : vector<16x32xf32> to vector<1x32xf32>
    %335 = vector.shape_cast %334 : vector<1x32xf32> to vector<32xf32>
    %336 = vector.shape_cast %335 : vector<32xf32> to vector<1x1x32xf32>
    %337 = vector.broadcast %336 : vector<1x1x32xf32> to vector<8x8x32xf32>
    %338 = arith.mulf %333, %337 : vector<8x8x32xf32>
    %339 = arith.addf %330, %338 : vector<8x8x32xf32>
    %340 = vector.extract_strided_slice %271 {offsets = [0, 1, 0], sizes = [9, 8, 32], strides = [1, 1, 1]} : vector<9x9x32xf32> to vector<9x8x32xf32>
    %341 = vector.extract_strided_slice %340 {offsets = [0, 0, 0], sizes = [7, 8, 32], strides = [1, 1, 1]} : vector<9x8x32xf32> to vector<7x8x32xf32>
    %cst_63 = arith.constant 0.000000e+00 : f32
    %342 = vector.broadcast %cst_63 : f32 to vector<1x8x32xf32>
    %343 = tpu.concatenate %342, %341 in 0 : vector<1x8x32xf32>, vector<7x8x32xf32> -> vector<8x8x32xf32>
    %344 = vector.extract_strided_slice %272 {offsets = [2, 0], sizes = [1, 32], strides = [1, 1]} : vector<16x32xf32> to vector<1x32xf32>
    %345 = vector.shape_cast %344 : vector<1x32xf32> to vector<32xf32>
    %346 = vector.shape_cast %345 : vector<32xf32> to vector<1x1x32xf32>
    %347 = vector.broadcast %346 : vector<1x1x32xf32> to vector<8x8x32xf32>
    %348 = arith.mulf %343, %347 : vector<8x8x32xf32>
    %349 = arith.addf %339, %348 : vector<8x8x32xf32>
    %350 = vector.extract_strided_slice %340 {offsets = [0, 0, 0], sizes = [8, 8, 32], strides = [1, 1, 1]} : vector<9x8x32xf32> to vector<8x8x32xf32>
    %351 = vector.extract_strided_slice %272 {offsets = [6, 0], sizes = [1, 32], strides = [1, 1]} : vector<16x32xf32> to vector<1x32xf32>
    %352 = vector.shape_cast %351 : vector<1x32xf32> to vector<32xf32>
    %353 = vector.shape_cast %352 : vector<32xf32> to vector<1x1x32xf32>
    %354 = vector.broadcast %353 : vector<1x1x32xf32> to vector<8x8x32xf32>
    %355 = arith.mulf %350, %354 : vector<8x8x32xf32>
    %356 = arith.addf %349, %355 : vector<8x8x32xf32>
    %357 = vector.extract_strided_slice %340 {offsets = [1, 0, 0], sizes = [8, 8, 32], strides = [1, 1, 1]} : vector<9x8x32xf32> to vector<8x8x32xf32>
    %358 = vector.extract_strided_slice %272 {offsets = [10, 0], sizes = [1, 32], strides = [1, 1]} : vector<16x32xf32> to vector<1x32xf32>
    %359 = vector.shape_cast %358 : vector<1x32xf32> to vector<32xf32>
    %360 = vector.shape_cast %359 : vector<32xf32> to vector<1x1x32xf32>
    %361 = vector.broadcast %360 : vector<1x1x32xf32> to vector<8x8x32xf32>
    %362 = arith.mulf %357, %361 : vector<8x8x32xf32>
    %363 = arith.addf %356, %362 : vector<8x8x32xf32>
    %364 = vector.extract_strided_slice %340 {offsets = [2, 0, 0], sizes = [7, 8, 32], strides = [1, 1, 1]} : vector<9x8x32xf32> to vector<7x8x32xf32>
    %cst_64 = arith.constant 0.000000e+00 : f32
    %365 = vector.broadcast %cst_64 : f32 to vector<1x8x32xf32>
    %366 = tpu.concatenate %364, %365 in 0 : vector<7x8x32xf32>, vector<1x8x32xf32> -> vector<8x8x32xf32>
    %367 = vector.extract_strided_slice %272 {offsets = [14, 0], sizes = [1, 32], strides = [1, 1]} : vector<16x32xf32> to vector<1x32xf32>
    %368 = vector.shape_cast %367 : vector<1x32xf32> to vector<32xf32>
    %369 = vector.shape_cast %368 : vector<32xf32> to vector<1x1x32xf32>
    %370 = vector.broadcast %369 : vector<1x1x32xf32> to vector<8x8x32xf32>
    %371 = arith.mulf %366, %370 : vector<8x8x32xf32>
    %372 = arith.addf %363, %371 : vector<8x8x32xf32>
    %373 = vector.extract_strided_slice %271 {offsets = [0, 2, 0], sizes = [9, 7, 32], strides = [1, 1, 1]} : vector<9x9x32xf32> to vector<9x7x32xf32>
    %cst_65 = arith.constant 0.000000e+00 : f32
    %374 = vector.broadcast %cst_65 : f32 to vector<9x1x32xf32>
    %375 = tpu.concatenate %373, %374 in 1 : vector<9x7x32xf32>, vector<9x1x32xf32> -> vector<9x8x32xf32>
    %376 = vector.extract_strided_slice %375 {offsets = [0, 0, 0], sizes = [7, 8, 32], strides = [1, 1, 1]} : vector<9x8x32xf32> to vector<7x8x32xf32>
    %cst_66 = arith.constant 0.000000e+00 : f32
    %377 = vector.broadcast %cst_66 : f32 to vector<1x8x32xf32>
    %378 = tpu.concatenate %377, %376 in 0 : vector<1x8x32xf32>, vector<7x8x32xf32> -> vector<8x8x32xf32>
    %379 = vector.extract_strided_slice %272 {offsets = [3, 0], sizes = [1, 32], strides = [1, 1]} : vector<16x32xf32> to vector<1x32xf32>
    %380 = vector.shape_cast %379 : vector<1x32xf32> to vector<32xf32>
    %381 = vector.shape_cast %380 : vector<32xf32> to vector<1x1x32xf32>
    %382 = vector.broadcast %381 : vector<1x1x32xf32> to vector<8x8x32xf32>
    %383 = arith.mulf %378, %382 : vector<8x8x32xf32>
    %384 = arith.addf %372, %383 : vector<8x8x32xf32>
    %385 = vector.extract_strided_slice %375 {offsets = [0, 0, 0], sizes = [8, 8, 32], strides = [1, 1, 1]} : vector<9x8x32xf32> to vector<8x8x32xf32>
    %386 = vector.extract_strided_slice %272 {offsets = [7, 0], sizes = [1, 32], strides = [1, 1]} : vector<16x32xf32> to vector<1x32xf32>
    %387 = vector.shape_cast %386 : vector<1x32xf32> to vector<32xf32>
    %388 = vector.shape_cast %387 : vector<32xf32> to vector<1x1x32xf32>
    %389 = vector.broadcast %388 : vector<1x1x32xf32> to vector<8x8x32xf32>
    %390 = arith.mulf %385, %389 : vector<8x8x32xf32>
    %391 = arith.addf %384, %390 : vector<8x8x32xf32>
    %392 = vector.extract_strided_slice %375 {offsets = [1, 0, 0], sizes = [8, 8, 32], strides = [1, 1, 1]} : vector<9x8x32xf32> to vector<8x8x32xf32>
    %393 = vector.extract_strided_slice %272 {offsets = [11, 0], sizes = [1, 32], strides = [1, 1]} : vector<16x32xf32> to vector<1x32xf32>
    %394 = vector.shape_cast %393 : vector<1x32xf32> to vector<32xf32>
    %395 = vector.shape_cast %394 : vector<32xf32> to vector<1x1x32xf32>
    %396 = vector.broadcast %395 : vector<1x1x32xf32> to vector<8x8x32xf32>
    %397 = arith.mulf %392, %396 : vector<8x8x32xf32>
    %398 = arith.addf %391, %397 : vector<8x8x32xf32>
    %399 = vector.extract_strided_slice %375 {offsets = [2, 0, 0], sizes = [7, 8, 32], strides = [1, 1, 1]} : vector<9x8x32xf32> to vector<7x8x32xf32>
    %cst_67 = arith.constant 0.000000e+00 : f32
    %400 = vector.broadcast %cst_67 : f32 to vector<1x8x32xf32>
    %401 = tpu.concatenate %399, %400 in 0 : vector<7x8x32xf32>, vector<1x8x32xf32> -> vector<8x8x32xf32>
    %402 = vector.extract_strided_slice %272 {offsets = [15, 0], sizes = [1, 32], strides = [1, 1]} : vector<16x32xf32> to vector<1x32xf32>
    %403 = vector.shape_cast %402 : vector<1x32xf32> to vector<32xf32>
    %404 = vector.shape_cast %403 : vector<32xf32> to vector<1x1x32xf32>
    %405 = vector.broadcast %404 : vector<1x1x32xf32> to vector<8x8x32xf32>
    %406 = arith.mulf %401, %405 : vector<8x8x32xf32>
    %407 = arith.addf %398, %406 : vector<8x8x32xf32>
    %408 = vector.shape_cast %407 : vector<8x8x32xf32> to vector<64x32xf32>
    %409 = arith.truncf %408 : vector<64x32xf32> to vector<64x32xbf16>
    %c0_68 = arith.constant 0 : index
    %c0_69 = arith.constant 0 : index
    %410 = vector.load %arg7[%c0_68, %c0_69] : memref<32x32xbf16, #tpu.memory_space<vmem>>, vector<32x32xbf16>
    %cst_70 = arith.constant dense<0.000000e+00> : vector<64x32xf32>
    %411 = tpu.matmul %409, %410, %cst_70 {dimension_numbers = #tpu.dot_dimension_numbers<[1], [0], [0], [1], [0, 0, 1, 1], [], []>} : vector<64x32xbf16>, vector<32x32xbf16>, vector<64x32xf32> -> vector<64x32xf32>
    %c0_71 = arith.constant 0 : index
    %c0_72 = arith.constant 0 : index
    %412 = vector.load %arg8[%c0_71, %c0_72] : memref<1x32xf32, #tpu.memory_space<vmem>>, vector<1x32xf32>
    %413 = vector.broadcast %412 : vector<1x32xf32> to vector<64x32xf32>
    %414 = arith.addf %411, %413 : vector<64x32xf32>
    %415 = arith.addf %1, %414 : vector<64x32xf32>
    %416 = arith.truncf %415 : vector<64x32xf32> to vector<64x32xbf16>
    %c0_73 = arith.constant 0 : index
    %c0_74 = arith.constant 0 : index
    %417 = vector.load %arg11[%c0_73, %c0_74] : memref<32x128xbf16, #tpu.memory_space<vmem>>, vector<32x128xbf16>
    %cst_75 = arith.constant dense<0.000000e+00> : vector<64x128xf32>
    %418 = tpu.matmul %416, %417, %cst_75 {dimension_numbers = #tpu.dot_dimension_numbers<[1], [0], [0], [1], [0, 0, 1, 1], [], []>} : vector<64x32xbf16>, vector<32x128xbf16>, vector<64x128xf32> -> vector<64x128xf32>
    %c0_76 = arith.constant 0 : index
    %c0_77 = arith.constant 0 : index
    %419 = vector.load %arg12[%c0_76, %c0_77] : memref<1x128xf32, #tpu.memory_space<vmem>>, vector<1x128xf32>
    %420 = vector.broadcast %419 : vector<1x128xf32> to vector<64x128xf32>
    %421 = arith.addf %418, %420 : vector<64x128xf32>
    %cst_78 = arith.constant 0.000000e+00 : f32
    %cst_79 = arith.constant 6.000000e+00 : f32
    %422 = vector.broadcast %cst_78 : f32 to vector<64x128xf32>
    %423 = arith.maximumf %422, %421 : vector<64x128xf32>
    %424 = vector.broadcast %cst_79 : f32 to vector<64x128xf32>
    %425 = arith.minimumf %424, %423 : vector<64x128xf32>
    %426 = arith.truncf %425 : vector<64x128xf32> to vector<64x128xbf16>
    %c0_80 = arith.constant 0 : index
    %c0_81 = arith.constant 0 : index
    %427 = vector.load %arg13[%c0_80, %c0_81] : memref<128x32xbf16, #tpu.memory_space<vmem>>, vector<128x32xbf16>
    %cst_82 = arith.constant dense<0.000000e+00> : vector<64x32xf32>
    %428 = tpu.matmul %426, %427, %cst_82 {dimension_numbers = #tpu.dot_dimension_numbers<[1], [0], [0], [1], [0, 0, 1, 1], [], []>} : vector<64x128xbf16>, vector<128x32xbf16>, vector<64x32xf32> -> vector<64x32xf32>
    %429 = arith.addf %415, %428 : vector<64x32xf32>
    %c0_83 = arith.constant 0 : index
    %c0_84 = arith.constant 0 : index
    %430 = vector.load %arg14[%c0_83, %c0_84] : memref<1x32xf32, #tpu.memory_space<vmem>>, vector<1x32xf32>
    %431 = vector.broadcast %430 : vector<1x32xf32> to vector<64x32xf32>
    %432 = arith.addf %429, %431 : vector<64x32xf32>
    %c0_85 = arith.constant 0 : index
    %c0_86 = arith.constant 0 : index
    %c0_87 = arith.constant 0 : index
    %433 = vector.load %arg15[%c0_85, %c0_86, %c0_87] : memref<1x64x32xf32, #tpu.memory_space<vmem>>, vector<1x64x32xf32>
    %434 = vector.shape_cast %433 : vector<1x64x32xf32> to vector<64x32xf32>
    %435 = vector.shape_cast %432 : vector<64x32xf32> to vector<1x64x32xf32>
    tpu.vector_store %arg15[%c0_85, %c0_86, %c0_87], %435 {strides = array<i32>} : memref<1x64x32xf32, #tpu.memory_space<vmem>>, vector<1x64x32xf32>,
    return
  }
  func.func @transform_0(%arg0: i32) -> (i32, i32, i32) {
    %c0_i32 = arith.constant 0 : i32
    %c0_i32_0 = arith.constant 0 : i32
    %c0_i32_1 = arith.constant 0 : i32
    return %arg0, %c0_i32, %c0_i32_0 : i32, i32, i32
  }
  func.func @transform_1(%arg0: i32) -> (i32, i32) {
    %c0_i32 = arith.constant 0 : i32
    %c0_i32_0 = arith.constant 0 : i32
    %c0_i32_1 = arith.constant 0 : i32
    return %c0_i32, %c0_i32_0 : i32, i32
  }
  func.func @transform_2(%arg0: i32) -> (i32, i32) {
    %c0_i32 = arith.constant 0 : i32
    %c0_i32_0 = arith.constant 0 : i32
    %c0_i32_1 = arith.constant 0 : i32
    return %c0_i32, %c0_i32_0 : i32, i32
  }
  func.func @transform_3(%arg0: i32) -> (i32, i32) {
    %c0_i32 = arith.constant 0 : i32
    %c0_i32_0 = arith.constant 0 : i32
    %c0_i32_1 = arith.constant 0 : i32
    return %c0_i32, %c0_i32_0 : i32, i32
  }
  func.func @transform_4(%arg0: i32) -> (i32, i32, i32) {
    %c0_i32 = arith.constant 0 : i32
    %c0_i32_0 = arith.constant 0 : i32
    %c0_i32_1 = arith.constant 0 : i32
    %c0_i32_2 = arith.constant 0 : i32
    return %c0_i32, %c0_i32_0, %c0_i32_1 : i32, i32, i32
  }
  func.func @transform_5(%arg0: i32) -> (i32, i32) {
    %c0_i32 = arith.constant 0 : i32
    %c0_i32_0 = arith.constant 0 : i32
    %c0_i32_1 = arith.constant 0 : i32
    return %c0_i32, %c0_i32_0 : i32, i32
  }
  func.func @transform_6(%arg0: i32) -> (i32, i32) {
    %c0_i32 = arith.constant 0 : i32
    %c0_i32_0 = arith.constant 0 : i32
    %c0_i32_1 = arith.constant 0 : i32
    return %c0_i32, %c0_i32_0 : i32, i32
  }
  func.func @transform_7(%arg0: i32) -> (i32, i32) {
    %c0_i32 = arith.constant 0 : i32
    %c0_i32_0 = arith.constant 0 : i32
    %c0_i32_1 = arith.constant 0 : i32
    return %c0_i32, %c0_i32_0 : i32, i32
  }
  func.func @transform_8(%arg0: i32) -> (i32, i32) {
    %c0_i32 = arith.constant 0 : i32
    %c0_i32_0 = arith.constant 0 : i32
    %c0_i32_1 = arith.constant 0 : i32
    return %c0_i32, %c0_i32_0 : i32, i32
  }
  func.func @transform_9(%arg0: i32) -> (i32, i32) {
    %c0_i32 = arith.constant 0 : i32
    %c0_i32_0 = arith.constant 0 : i32
    %c0_i32_1 = arith.constant 0 : i32
    return %c0_i32, %c0_i32_0 : i32, i32
  }
  func.func @transform_10(%arg0: i32) -> (i32, i32) {
    %c0_i32 = arith.constant 0 : i32
    %c0_i32_0 = arith.constant 0 : i32
    %c0_i32_1 = arith.constant 0 : i32
    return %c0_i32, %c0_i32_0 : i32, i32
  }
  func.func @transform_11(%arg0: i32) -> (i32, i32) {
    %c0_i32 = arith.constant 0 : i32
    %c0_i32_0 = arith.constant 0 : i32
    %c0_i32_1 = arith.constant 0 : i32
    return %c0_i32, %c0_i32_0 : i32, i32
  }
  func.func @transform_12(%arg0: i32) -> (i32, i32) {
    %c0_i32 = arith.constant 0 : i32
    %c0_i32_0 = arith.constant 0 : i32
    %c0_i32_1 = arith.constant 0 : i32
    return %c0_i32, %c0_i32_0 : i32, i32
  }
  func.func @transform_13(%arg0: i32) -> (i32, i32) {
    %c0_i32 = arith.constant 0 : i32
    %c0_i32_0 = arith.constant 0 : i32
    %c0_i32_1 = arith.constant 0 : i32
    return %c0_i32, %c0_i32_0 : i32, i32
  }
  func.func @transform_14(%arg0: i32) -> (i32, i32, i32) {
    %c0_i32 = arith.constant 0 : i32
    %c0_i32_0 = arith.constant 0 : i32
    %c0_i32_1 = arith.constant 0 : i32
    return %arg0, %c0_i32, %c0_i32_0 : i32, i32, i32
  }
}

</mosaic_0001>

<bundles_post_ra>
// kernel: block_forward.1
= control target key start
LH: loop header
LB: loop body
LE: loop exit
PB: predicated region body
PF: predicated region fallthrough
CT: control target
= control target key end

     0   :  { %s9852_s0 = inlined_call_operand.vmem [shape: f32[2,64,32], index: 0, kind: input, shape index: {}]   ;;  %s9853_s1 = inlined_call_operand.vmem [shape: bf16[288,32], index: 1, kind: input, shape index: {}]   ;;  %s9854_s2 = inlined_call_operand.vmem [shape: f32[1,32], index: 2, kind: input, shape index: {}]   ;;  %s9855_s3 = inlined_call_operand.vmem [shape: bf16[32,96], index: 3, kind: input, shape index: {}]   ;;  %s9856_s4 = inlined_call_operand.vmem [shape: f32[4,16,16], index: 4, kind: input, shape index: {}]   ;;  %s9857_s5 = inlined_call_operand.vmem [shape: f32[16,32], index: 5, kind: input, shape index: {}]   ;;  %s9858_s6 = inlined_call_operand.vmem [shape: bf16[32,32], index: 6, kind: input, shape index: {}]   ;;  %s9859_s7 = inlined_call_operand.vmem [shape: f32[1,32], index: 7, kind: input, shape index: {}]   ;;  %s9860_s8 = inlined_call_operand.hbm [shape: f32[1,32], index: 8, kind: input, shape index: {}]   ;;  %s9861_s9 = inlined_call_operand.hbm [shape: f32[1,32], index: 9, kind: input, shape index: {}]   ;;  %s9862_s10 = inlined_call_operand.hbm [shape: bf16[32,128], index: 10, kind: input, shape index: {}]   ;;  %s9863_s11 = inlined_call_operand.hbm [shape: f32[1,128], index: 11, kind: input, shape index: {}]   ;;  %s9864_s12 = inlined_call_operand.vmem [shape: bf16[128,32], index: 12, kind: input, shape index: {}]   ;;  %s9865_s13 = inlined_call_operand.hbm [shape: f32[1,32], index: 13, kind: input, shape index: {}]   ;;  %s9866_s14 = inlined_call_operand.hbm [shape: f32[2,64,32], index: 14, kind: output, shape index: {}]  }
   0x1   :  { %9892 = sst [smem:[#allocation45_spill]] %s9860_s8 }
   0x2   :  { %9893 = sst [smem:[#allocation46_spill]] %s9861_s9 }
   0x3   :  { %9894 = sst [smem:[#allocation47_spill]] %s9866_s14 }
   0x4   :  { %19 = vsyncpa [#allocation3], 0 }
   0x5   :  { %20 = vsyncpa [#allocation6], 0 }
   0x6   :  { %21 = vsyncpa [#allocation9], 0 }
   0x7   :  { %22 = vsyncpa [#allocation4], 0 }
   0x8   :  { %24 = vsyncpa [#allocation4 + $0x1], 0  ;;  %s7714_s29 = smov 0   ;;  %s7716_s30 = smov 0  }
   0x9   :  { %s7718_s15 = smov 0   ;;  %s7720_s16 = smov 0  }
   0xa LB: > { %9895 = sst [smem:[#allocation16_spill]] %s7600_s29  ;;  %s7735_s17 = sadd.s32 4294967295, %s7612_s16   ;;  %s7612_s16 = sphi %s7720_s16, %s9975_s16   ;;  %s7608_s15 = sphi %s7718_s15, %s9980_s15   ;;  %s7604_s30 = sphi %s7716_s30, %s9979_s30   ;;  %s7600_s29 = sphi %s7714_s29, %s9978_s29  }
   0xb   : > { %9896 = sst [smem:[#allocation17_spill]] %s7608_s15  ;;  %s6006_s18 = sadd.s32 4294967294, %s7612_s16  }
   0xc   : > { %9897 = sst [smem:[#allocation18_spill]] %s7612_s16  ;;  %s7739_s19 = sadd.s32 1, %s7612_s16  }
   0xd   : > { %9898 = sst [smem:[#allocation19_spill]] %s7739_s19  ;;  %s336_s20 = sadd.s32 1, %s7608_s15 }
   0xe   : > { %s333_s21 = ssub.s32 %s7612_s16, %s7739_s19  ;;  %p346_p0 = scmp.ne.s32.totalorder %s7608_s15, %s7604_s30 }
   0xf   : > { %p334_p1 = scmp.eq.s32.totalorder %s333_s21, 0  ;;  %p347_p2 = scmp.eq.s32.totalorder %s7735_s17, 1 }
  0x10   : > { %p352_p3 = scmp.ne.s32.totalorder %s7604_s30, %s7600_s29  ;;  %p353_p4 = scmp.eq.s32.totalorder %s6006_s18, 1 }
  0x11   : > { %s7750_s22 = scalar_select %p334_p1, %s7608_s15, %s336_s20  }
  0x12   : > { %p7752_p5 = por %p347_p2, %p346_p0  ;;  %p7756_p6 = por %p353_p4, %p352_p3 }
  0x13   : > { %9899 = sst [smem:[#allocation20_spill]] %s7750_s22  ;;  %p6007_p7 = scmp.ge.s32.totalorder %s7612_s16, 1 }
  0x14   : > { %s9900_s23 = scalar_select %p7752_p5, 1, 0 }
  0x15   : > { %s9902_s24 = scalar_select %p7756_p6, 1, 0 }
  0x16   : > { %9901 = sst [smem:[#allocation21_spill]] %s9900_s23  ;;  %p360_p8 = scmp.lt.s32.totalorder %s7612_s16, 3 }
  0x17   : > { %9903 = sst [smem:[#allocation22_spill]] %s9902_s24  ;;  %p9873_p9 = scmp.eq.s32.totalorder %s7735_s17, 0 }
  0x18   : > { %p7763_p10 = pnand %p6007_p7, %p360_p8  ;;  %s7614_s26 = smov [#allocation5]  }
  0x19   : > { %s405_s27 = sshll.u32 %s7614_s26, 4  ;;  %s7615_s28 = smov [#allocation8]   ;;  %s406_s27 = int_to_ptr.vmem [resolvable:$true] %s405_s27 }
  0x1a   : > { %s9904_s25 = scalar_select %p7763_p10, 1, 0 }
  0x1b   : > { %p6868_p11 = pneg %p7763_p10  ;;  %s429_s18 = sshll.u32 %s7615_s28, 4  ;;  %s7775_s18 = int_to_ptr.vmem [resolvable:$true] %s429_s18 }
  0x1c   : > { %s7616_s21 = smov [#allocation2]   ;;  %s9906_s9 = sld [smem:[#allocation46_spill]] }
  0x1d   : > { %p7771_p12 = pnand %p9873_p9, %p6868_p11  ;;  %s394_s22 = sshll.u32 %s7616_s21, 4  ;;  %s7777_s22 = int_to_ptr.vmem [resolvable:$true] %s394_s22 }
  0x1f   : > { %p7787_p0 = pneg %p7771_p12 }
  0x22   : > { %s7398_s26 = scalar_lea.hbm %s9906_s9, 16 }
  0x23   : > { %p7399_p13 = scmp.ne.s32.totalorder %s9906_s9, %s7398_s26  ;;  %p7405_p3 = scmp.lt.u32.totalorder %s7398_s26, %s9906_s9 }
  0x25   : > { %p7401_p1 = pnand %p7787_p0, %p7399_p13 }
  0x27   : > { %p7402_p2 = pneg %p7401_p1 }
  0x29   : > { %p7407_p4 = pnand %p7405_p3, %p7402_p2 }
  0x2b   : > { %7410 = shalt.err (!%p7407_p4)
}
  0x2c   : > { %s7411_s15 = scalar_lea.vmem %s406_s27, 16  ;;  %s7418_s29 = scalar_lea.vmem %s406_s27, 32 }
  0x2d   : > { %p7412_p7 = scmp.ne.s32.totalorder %s406_s27, %s7411_s15  ;;  %p7419_p9 = scmp.lt.s32.totalorder %s406_s27, %s406_s27 }
  0x2e   : > { %p7420_p6 = scmp.lt.s32.totalorder %s7418_s29, %s7411_s15 }
  0x2f   : > { %p7414_p8 = pnand %p7412_p7, %p7787_p0 }
  0x30   : > { %p7421_p5 = por %p7420_p6, %p7419_p9 }
  0x31   : > { %p7415_p11 = pneg %p7414_p8 }
  0x33   : > { %p7422_p10 = pnand %p7421_p5, %p7415_p11 }
  0x35   : > { %7425 = shalt.err (!%p7422_p10)
}
  0x36   : > { %6874 = dma.hbm_to_vmem [thread:$0]  (!%p7771_p12), %s9906_s9, 16, %s406_s27, [#allocation6]  }
  0x37   : > { %s7426_s21 = scalar_lea.hbm %s9863_s11, 16 }
  0x38   : > { %p7427_p13 = scmp.ne.s32.totalorder %s9863_s11, %s7426_s21  ;;  %p7433_p5 = scmp.lt.u32.totalorder %s7426_s21, %s9863_s11 }
  0x3a   : > { %p7429_p1 = pnand %p7427_p13, %p7787_p0 }
  0x3c   : > { %p7430_p6 = pneg %p7429_p1 }
  0x3e   : > { %p7435_p9 = pnand %p7433_p5, %p7430_p6 }
  0x40   : > { %7438 = shalt.err (!%p7435_p9)
}
  0x41   : > { %s7439_s27 = scalar_lea.vmem %s7775_s18, 16  ;;  %s7446_s14 = scalar_lea.vmem %s7775_s18, 32 }
  0x42   : > { %p7440_p10 = scmp.ne.s32.totalorder %s7775_s18, %s7439_s27  ;;  %p7447_p4 = scmp.lt.s32.totalorder %s7775_s18, %s7775_s18 }
  0x43   : > { %p7448_p7 = scmp.lt.s32.totalorder %s7446_s14, %s7439_s27 }
  0x44   : > { %p7442_p2 = pnand %p7440_p10, %p7787_p0 }
  0x45   : > { %p7449_p8 = por %p7448_p7, %p7447_p4 }
  0x46   : > { %p7443_p3 = pneg %p7442_p2 }
  0x48   : > { %p7450_p11 = pnand %p7449_p8, %p7443_p3 }
  0x4a   : > { %7453 = shalt.err (!%p7450_p11)
}
  0x4b   : > { %6880 = dma.hbm_to_vmem [thread:$0]  (!%p7771_p12), %s9863_s11, 16, %s7775_s18, [#allocation9]  }
  0x4c   : > { %s9908_s8 = sld [smem:[#allocation45_spill]] }
  0x52   : > { %s7454_s26 = scalar_lea.hbm %s9908_s8, 16 }
  0x53   : > { %p7455_p13 = scmp.ne.s32.totalorder %s9908_s8, %s7454_s26  ;;  %p7461_p5 = scmp.lt.u32.totalorder %s7454_s26, %s9908_s8 }
  0x55   : > { %p7457_p1 = pnand %p7455_p13, %p7787_p0 }
  0x57   : > { %p7458_p6 = pneg %p7457_p1 }
  0x59   : > { %p7463_p9 = pnand %p7461_p5, %p7458_p6 }
  0x5b   : > { %7466 = shalt.err (!%p7463_p9)
}
  0x5c   : > { %s7467_s18 = scalar_lea.vmem %s7777_s22, 16  ;;  %s7474_s14 = scalar_lea.vmem %s7777_s22, 32 }
  0x5d   : > { %p7468_p10 = scmp.ne.s32.totalorder %s7777_s22, %s7467_s18  ;;  %p7475_p4 = scmp.lt.s32.totalorder %s7777_s22, %s7777_s22 }
  0x5e   : > { %p7476_p7 = scmp.lt.s32.totalorder %s7474_s14, %s7467_s18 }
  0x5f   : > { %p7470_p2 = pnand %p7468_p10, %p7787_p0 }
  0x60   : > { %p7477_p8 = por %p7476_p7, %p7475_p4 }
  0x61   : > { %p7471_p3 = pneg %p7470_p2 }
  0x63   : > { %p7478_p11 = pnand %p7477_p8, %p7471_p3 }
  0x65   : > { %7481 = shalt.err (!%p7478_p11)
}
  0x66   : > { %6871 = dma.hbm_to_vmem [thread:$0]  (!%p7771_p12), %s9908_s8, 16, %s7777_s22, [#allocation3]  }
  0x67   : > { %s7617_s24 = smov [#allocation7]   ;;  %s7482_s15 = scalar_lea.hbm %s9862_s10, 256 }
  0x68   : > { %s415_s16 = sshll.u32 %s7617_s24, 4  ;;  %p7483_p13 = scmp.ne.s32.totalorder %s9862_s10, %s7482_s15  ;;  %s416_s16 = int_to_ptr.vmem [resolvable:$true] %s415_s16 }
  0x69   : > { %p7489_p5 = scmp.lt.u32.totalorder %s7482_s15, %s9862_s10 }
  0x6a   : > { %p7485_p1 = pnand %p7483_p13, %p7787_p0 }
  0x6c   : > { %p7486_p6 = pneg %p7485_p1 }
  0x6e   : > { %p7491_p9 = pnand %p7489_p5, %p7486_p6 }
  0x70   : > { %7494 = shalt.err (!%p7491_p9)
}
  0x71   : > { %s7495_s22 = scalar_lea.vmem %s416_s16, 256  ;;  %p7503_p4 = scmp.lt.s32.totalorder %s416_s16, %s416_s16 }
  0x72   : > { %p7496_p10 = scmp.ne.s32.totalorder %s416_s16, %s7495_s22  ;;  %p7504_p7 = scmp.lt.s32.totalorder %s7495_s22, %s7495_s22 }
  0x74   : > { %p7498_p2 = pnand %p7496_p10, %p7787_p0  ;;  %p7505_p8 = por %p7504_p7, %p7503_p4 }
  0x76   : > { %p7499_p3 = pneg %p7498_p2 }
  0x78   : > { %p7506_p11 = pnand %p7505_p8, %p7499_p3 }
  0x7a   : > { %7509 = shalt.err (!%p7506_p11)
}
  0x7b   : > { %s7618_s23 = smov 64   ;;  %s7619_s19 = smov 4  }
  0x7c   : > { %6877 = dma.hbm_to_vmem [thread:$0]  (!%p7771_p12), %s9862_s10, 256, %s416_s16, [#allocation6], %s7618_s23, %s7618_s23, %s7619_s19  }
  0x7d   : > { %s7620_s21 = smov [#allocation10]   ;;  %s7510_s18 = scalar_lea.hbm %s9865_s13, 16 }
  0x7e   : > { %s443_s15 = sshll.u32 %s7620_s21, 4  ;;  %p7511_p13 = scmp.ne.s32.totalorder %s9865_s13, %s7510_s18  ;;  %s444_s15 = int_to_ptr.vmem [resolvable:$true] %s443_s15 }
  0x7f   : > { %p7517_p5 = scmp.lt.u32.totalorder %s7510_s18, %s9865_s13 }
  0x80   : > { %p7513_p1 = pnand %p7511_p13, %p7787_p0 }
  0x82   : > { %p7514_p6 = pneg %p7513_p1 }
  0x84   : > { %p7519_p9 = pnand %p7517_p5, %p7514_p6 }
  0x86   : > { %7522 = shalt.err (!%p7519_p9)
}
  0x87   : > { %s7523_s16 = scalar_lea.vmem %s444_s15, 16  ;;  %s7530_s23 = scalar_lea.vmem %s444_s15, 32 }
  0x88   : > { %p7524_p10 = scmp.ne.s32.totalorder %s444_s15, %s7523_s16  ;;  %p7531_p4 = scmp.lt.s32.totalorder %s444_s15, %s444_s15 }
  0x89   : > { %p7532_p7 = scmp.lt.s32.totalorder %s7530_s23, %s7523_s16 }
  0x8a   : > { %p7526_p2 = pnand %p7524_p10, %p7787_p0 }
  0x8b   : > { %p7533_p8 = por %p7532_p7, %p7531_p4 }
  0x8c   : > { %p7527_p3 = pneg %p7526_p2 }
  0x8e   : > { %p7534_p11 = pnand %p7533_p8, %p7527_p3 }
  0x90   : > { %7537 = shalt.err (!%p7534_p11)
}
  0x91   : > { %6883 = dma.hbm_to_vmem [thread:$0]  (!%p7771_p12), %s9865_s13, 16, %s444_s15, [#allocation9]  }
  0x92   : > { %p9909_p13 = scmp.ne.s32.totalorder %s9904_s25, 0 }
  0x94   : > { %464 = sbr.rel (%p9909_p13) target bundleno = 4027 (0xfbb), region = 76 }
  0x9b   : > { %p9910_p1 = scmp.eq.s32.totalorder %s7735_s17, 0 }
  0x9d   : > { %7583 = dma.done.wait (%p9910_p1), [#allocation3], 16   ;;  %p9911_p0 = pmov %p9910_p1 }
  0x9f   : > { %7585 = vsyncadd (%p9911_p0), [#allocation3], 4294967280  ;;  %p9912_p6 = pmov %p9911_p0 }
  0xa0   : > { %p9913_p5 = pmov %p9911_p0 }
  0xa1   : > { %7587 = dma.done.wait (%p9912_p6), [#allocation6], 272  }
  0xa2   : > { %7589 = vsyncadd (%p9913_p5), [#allocation6], 4294967024  ;;  %p9914_p9 = pmov %p9911_p0 }
  0xa3   : > { %p9915_p12 = pmov %p9911_p0 }
  0xa4   : > { %7591 = dma.done.wait (%p9914_p9), [#allocation9], 32  }
  0xa5   : > { %7593 = vsyncadd (%p9915_p12), [#allocation9], 4294967264  ;;  %p526_p10 = scmp.lt.s32.totalorder %s7735_s17, 1  ;;  %v7230_v0 = vld [vmem:[%s9853_s1 + $0x80] sm:$0xff]   ;;  %v7231_v1 = vld [vmem:[%s9853_s1 + $0x88] sm:$0xff]   ;;  %vm619_vm0 = vcmask 1046528  }
  0xa6   : > { %6390 = vmatprep.subr.bf16.mxu1 %v7230_v0  ;;  %v6023_v4 = vld [vmem:[#allocation2] ss:$0 sm:$0xff]  ;;  %v6024_v7 = vld [vmem:[#allocation5] ss:$0 sm:$0xff]  ;;  %vm786_vm1 = vcmask 261120   ;;  %vm594_vm2 = vcmask 1040384  }
  0xa7   : > { %s527_s8 = scalar_select %p526_p10, %s7735_s17, 1  ;;  %6391 = vmatpush3.bf16.msra.mxu1 %v7230_v0  ;;  %v7232_v24 = vld [vmem:[%s9855_s3] sm:$0xff]   ;;  %v7621_v30 = vmov 0.0   ;;  %v7236_v39 = vld [vmem:[%s9853_s1 + $0x48] sm:$0xff]   ;;  %v7238_v61 = vld [vmem:[%s9853_s1 + $0x50] sm:$0xff]   ;;  %vm795_vm3 = vcmask 523264  }
  0xa8   : > { %6392 = vmatprep.subr.bf16.mxu1 %v7231_v1  ;;  %v7234_v29 = vld [vmem:[%s9853_s1 + $0x40] sm:$0xff]   ;;  %s7622_s19 = smov 32   ;;  %v7233_v44 = vld [vmem:[%s9855_s3 + $0x8] sm:$0xff]   ;;  %s7623_s21 = smov 64   ;;  %vm804_vm4 = vcmask 785408   ;;  %vm1245_vm5 = vcmask 1043456  }
  0xa9   : > { %s6184_s9 = sshll.u32 %s527_s8, 6  ;;  %v7235_v35 = vld [vmem:[%s9853_s1] sm:$0xff]   ;;  %6186 = vmatprep.subr.bf16.mxu0 %v7234_v29  ;;  %v7237_v45 = vld [vmem:[%s9853_s1 + $0x8] sm:$0xff]   ;;  %s7624_s15 = smov 96   ;;  %v7247_v29 = vld [vmem:[%s9853_s1 + $0x30] sm:$0xff]   ;;  %vm1288_vm6 = vcmask 64512  }
  0xaa   : > { %s7906_s28 = scalar_lea.vmem %s9852_s0, %s6184_s9  ;;  %6187 = vmatpush3.bf16.msra.mxu0 %v7235_v35  ;;  %vm8265_vm7 = vmpackc.low %vm1288_vm6, %vm1288_vm6  ;;  %vm1647_vm8 = vcmask 130048   ;;  %s7626_s14 = smov 120   ;;  %vm4605_vm9 = vcmask 195584   ;;  %vm4806_vm10 = vcmask 1045504  }
  0xab   : > { %v533_v2 = vld [vmem:[%s7906_s28 + $0x8] sm:$0xff]  ;;  %v534_v3 = vld [vmem:[%s7906_s28 + $0x10] sm:$0xff]  ;;  %v532_v8 = vld [vmem:[%s7906_s28] sm:$0xff]  ;;  %6393 = vmatpush3.bf16.msra.mxu1 %v7231_v1  ;;  %6188 = vmatprep.subr.bf16.mxu0 %v7236_v39  ;;  %s7627_s8 = smov 56   ;;  %s7628_s9 = smov 80  }
  0xac   : > { %v548_v5 = vmul.f32 %v6023_v4, %v533_v2  ;;  %v549_v6 = vmul.f32 %v6023_v4, %v534_v3  ;;  %v535_v9 = vld [vmem:[%s7906_s28 + $0x18] sm:$0xff]  ;;  %v547_v10 = vmul.f32 %v6023_v4, %v532_v8  ;;  %v536_v11 = vld [vmem:[%s7906_s28 + $0x20] sm:$0xff]  ;;  %v537_v13 = vld [vmem:[%s7906_s28 + $0x28] sm:$0xff]  ;;  %6402 = vmatprep.subr.bf16.mxu1 %v7232_v24  ;;  %s7630_s25 = smov 48   ;;  %s7631_s27 = smov 72  }
  0xad   : > { %v550_v12 = vmul.f32 %v6023_v4, %v535_v9  ;;  %v538_v14 = vld [vmem:[%s7906_s28 + $0x30] sm:$0xff]  ;;  %v551_v17 = vmul.f32 %v6023_v4, %v536_v11  ;;  %v552_v18 = vmul.f32 %v6023_v4, %v537_v13  ;;  %v539_v19 = vld [vmem:[%s7906_s28 + $0x38] sm:$0xff]  ;;  %s7632_s18 = smov 104   ;;  %s7633_s23 = smov 40  }
  0xae   : > { %v7921_v15 = vadd.f32 %v6024_v7, %v548_v5  ;;  %v7923_v16 = vadd.f32 %v6024_v7, %v549_v6  ;;  %v7926_v20 = vadd.f32 %v6024_v7, %v547_v10  ;;  %v553_v22 = vmul.f32 %v6023_v4, %v538_v14  ;;  %6189 = vmatpush3.bf16.msra.mxu0 %v7237_v45  ;;  %v7239_v1 = vld [vmem:[%s9853_s1 + $0x10] sm:$0xff]   ;;  %v7240_v6 = vld [vmem:[%s9853_s1 + $0x58] sm:$0xff]   ;;  %v7242_v14 = vld [vmem:[%s9853_s1 + $0x60] sm:$0xff]   ;;  %s7634_s24 = smov 8   ;;  %s523_s22 = sand.u32 1, %s7604_s30  }
  0xaf   : > { %v7928_v21 = vadd.f32 %v6024_v7, %v550_v12  ;;  %v554_v23 = vmul.f32 %v6023_v4, %v539_v19  ;;  %v7937_v28 = vadd.f32 %v6024_v7, %v551_v17  ;;  %v7985_v49 = vadd.f32 %v6024_v7, %v552_v18  ;;  %6190 = vmatprep.subr.bf16.mxu0 %v7238_v61  ;;  %v7241_v12 = vld [vmem:[%s9853_s1 + $0x18] sm:$0xff]   ;;  %v7243_v18 = vld [vmem:[%s9853_s1 + $0x20] sm:$0xff]   ;;  %s6020_s16 = sshll.u32 %s523_s22, 6  ;;  %s9969_s26 = sld [smem:[#allocation47_spill]] }
  0xb0   : > { %v6965_v25 = vpack.i.bf16 %v7923_v16, %v7921_v15  ;;  %v604_v26 = vrot.slane %v7921_v15, 1  ;;  %v605_v27 = vrot.slane %v7923_v16, 1  ;;  %v6955_v31 = vpack.i.bf16 %v7926_v20, %v7621_v30 }
  0xb1   : > { %v606_v32 = vrot.slane %v7928_v21, 1  ;;  %v579_v33 = vrot.slane %v7921_v15, 7  ;;  %v580_v34 = vrot.slane %v7923_v16, 7  ;;  %v607_v38 = vrot.slane %v7937_v28, 1 }
  0xb2   : > { %6966 = vrot.lane.b32.xlu1 %v6965_v25, %s7622_s19  ;;  %v7952_v36 = vsel %vm619_vm0, %v604_v26, 0.0  ;;  %v7955_v37 = vsel %vm619_vm0, %v605_v27, 0.0  ;;  %6956 = vrot.lane.b32.xlu0 %v6955_v31, %s7622_s19  ;;  %v603_v48 = vrot.slane %v7926_v20, 1  ;;  %v7990_v51 = vadd.f32 %v6024_v7, %v553_v22  ;;  %v7244_v22 = vld [vmem:[%s9853_s1 + $0x68] sm:$0xff]   ;;  %v7246_v27 = vld [vmem:[%s9853_s1 + $0x70] sm:$0xff]  }
  0xb3   : > { %v839_v40 = vpack.c.bf16 %v7955_v37, %v7952_v36  ;;  %v7965_v41 = vsel %vm619_vm0, %v606_v32, 0.0  ;;  %v7968_v42 = vsel %vm594_vm2, 0.0, %v579_v33  ;;  %v7971_v43 = vsel %vm594_vm2, 0.0, %v580_v34  ;;  %6191 = vmatpush3.bf16.msra.mxu0 %v7239_v1  ;;  %v7248_v31 = vld [vmem:[%s9853_s1 + $0x78] sm:$0xff]  }
  0xb4   : > { %v7980_v46 = vsel %vm619_vm0, %v607_v38, 0.0  ;;  %v6975_v47 = vpack.i.bf16 %v7971_v43, %v7968_v42  ;;  %v7992_v52 = vadd.f32 %v6024_v7, %v554_v23  ;;  %v620_v53 = vsel %vm619_vm0, %v603_v48, 0.0  ;;  %6192 = vmatprep.subr.bf16.mxu0 %v7240_v6  ;;  %v7249_v33 = vld [vmem:[%s9853_s1 + $0x38] sm:$0xff]  }
  0xb5   : > { %6394 = vmatprep.mubr.msk.bf16.mxu1 %vm786_vm1, %v839_v40  ;;  %v842_v50 = vpack.c.bf16 %v7980_v46, %v7965_v41  ;;  %v608_v54 = vrot.slane %v7985_v49, 1  ;;  %v578_v55 = vrot.slane %v7926_v20, 7  ;;  %v581_v56 = vrot.slane %v7928_v21, 7 }
  0xb6   : > { %6976 = vrot.lane.b32.xlu1 %v6975_v47, %s7623_s21  ;;  %6961 = vrot.lane.b32.xlu0 %v6965_v25, %s7624_s15  ;;  %v6980_v57 = vpack.i.bf16 %v620_v53, %v7621_v30  ;;  %v6970_v58 = vpack.i.bf16 %v7952_v36, %v620_v53  ;;  %v609_v59 = vrot.slane %v7990_v51, 1  ;;  %v610_v60 = vrot.slane %v7992_v52, 1  ;;  %v7245_v25 = vld [vmem:[%s9853_s1 + $0x28] sm:$0xff]  }
  0xb7   : > { %6395 = vmatmul.mubr.msk.bf16.vlgmr.msra.gmra.mrb[0].mxu1 %vm786_vm1, %v842_v50  ;;  %v8009_v62 = vsel %vm619_vm0, %v608_v54, 0.0  ;;  %v8012_v63 = vsel %vm594_vm2, 0.0, %v578_v55  ;;  %v582_v0 = vrot.slane %v7937_v28, 7  ;;  %v6990_v8 = vpack.i.bf16 %v7965_v41, %v7955_v37  ;;  %6193 = vmatpush3.bf16.msra.mxu0 %v7241_v12 }
  0xb8   : > { %6403 = vmatpush3.bf16.msra.mxu1 %v7232_v24  ;;  %v8019_v2 = vsel %vm619_vm0, %v609_v59, 0.0  ;;  %v8022_v3 = vsel %vm619_vm0, %v610_v60, 0.0  ;;  %v6985_v5 = vpack.i.bf16 %v7968_v42, %v8012_v63  ;;  %v8039_v9 = vsel %vm594_vm2, 0.0, %v581_v56  ;;  %6194 = vmatprep.subr.bf16.mxu0 %v7242_v14 }
  0xb9   : > { %6404 = vmatprep.subr.bf16.mxu1 %v7233_v44  ;;  %v845_v4 = vpack.c.bf16 %v8019_v2, %v8009_v62  ;;  %v848_v7 = vpack.c.bf16 %v7621_v30, %v8022_v3  ;;  %v8042_v10 = vsel %vm594_vm2, 0.0, %v582_v0  ;;  %v1142_v11 = vpack.c.bf16 %v7921_v15, %v7926_v20 }
  0xba   : > { %6981 = vrot.lane.b32.xlu1 %v6980_v57, %s7623_s21  ;;  %6971 = vrot.lane.b32.xlu0 %v6970_v58, %s7622_s19  ;;  %v7000_v13 = vpack.i.bf16 %v7955_v37, %v7952_v36  ;;  %v6995_v17 = vpack.i.bf16 %v8042_v10, %v8039_v9  ;;  %v7010_v19 = vpack.i.bf16 %v8039_v9, %v7971_v43  ;;  %v583_v35 = vrot.slane %v7985_v49, 7 }
  0xbb   : > { %6398 = vmatprep.mubr.msk.bf16.mxu1 %vm786_vm1, %v845_v4  ;;  %v1143_v23 = vpack.c.bf16 %v7928_v21, %v7923_v16  ;;  %v7005_v24 = vpack.i.bf16 %v7937_v28, %v7928_v21  ;;  %v1144_v26 = vpack.c.bf16 %v7985_v49, %v7937_v28  ;;  %6195 = vmatpush3.bf16.msra.mxu0 %v7243_v18  ;;  %v584_v36 = vrot.slane %v7990_v51, 7 }
  0xbc   : > { %6405 = vmatpush3.bf16.msra.mxu1 %v7233_v44  ;;  %6196 = vmatprep.subr.bf16.mxu0 %v7244_v22  ;;  %v1145_v32 = vpack.c.bf16 %v7992_v52, %v7990_v51  ;;  %v7015_v34 = vpack.i.bf16 %v8009_v62, %v7980_v46  ;;  %v8104_v37 = vsel %vm594_vm2, 0.0, %v583_v35  ;;  %v7030_v40 = vpack.i.bf16 %v7980_v46, %v7965_v41 }
  0xbd   : > { %v8107_v38 = vsel %vm594_vm2, 0.0, %v584_v36  ;;  %v8117_v44 = vpack.i.bf16 %v7990_v51, %v7985_v49 }
  0xbe   : > { %6986 = vrot.lane.b32.xlu1 %v6985_v5, %s7624_s15  ;;  %6991 = vrot.lane.b32.xlu0 %v6990_v8, %s7622_s19  ;;  %v7025_v39 = vpack.i.bf16 %v8107_v38, %v8104_v37 }
  0xbf   : > { %6399 = vmatmul.mubr.msk.bf16.gmra.mrb[4].mxu1 %vm786_vm1, %v848_v7  ;;  %6197 = vmatpush3.bf16.msra.mxu0 %v7245_v25 }
  0xc0   : > { %6406 = vmatprep.mubr.msk.bf16.mxu1 %vm786_vm1, %v1142_v11  ;;  %6198 = vmatprep.subr.bf16.mxu0 %v7246_v27 }
  0xc2   : > { %7001 = vrot.lane.b32.xlu1 %v7000_v13, %s7623_s21  ;;  %6996 = vrot.lane.b32.xlu0 %v6995_v17, %s7623_s21 }
  0xc3   : > { %6199 = vmatpush3.bf16.msra.mxu0 %v7247_v29 }
  0xc4   : > { %6200 = vmatprep.subr.bf16.mxu0 %v7248_v31 }
  0xc6   : > { %7011 = vrot.lane.b32.xlu1 %v7010_v19, %s7624_s15  ;;  %7006 = vrot.lane.b32.xlu0 %v7005_v24, %s7624_s15 }
  0xc7   : > { %6407 = vmatmul.mubr.msk.bf16.vlgmr.msra.gmra.mrb[8].mxu1 %vm786_vm1, %v1143_v23  ;;  %6201 = vmatpush3.bf16.msra.mxu0 %v7249_v33 }
  0xc8   : > { %6410 = vmatprep.mubr.msk.bf16.mxu1 %vm786_vm1, %v1144_v26 }
  0xca   : > { %7016 = vrot.lane.b32.xlu1 %v7015_v34, %s7622_s19  ;;  %7021 = vrot.lane.b32.xlu0 %v7005_v24, %s7622_s19 }
  0xce   : > { %7026 = vrot.lane.b32.xlu1 %v7025_v39, %s7623_s21  ;;  %7031 = vrot.lane.b32.xlu0 %v7030_v40, %s7623_s21 }
  0xcf   : > { %6411 = vmatmul.mubr.msk.bf16.gmra.mrb[12].mxu1 %vm786_vm1, %v1145_v32 }
  0xd2   : > { %7036 = vrot.lane.b32.xlu1 %v8117_v44, %s7624_s15 }
 0x124   : > { %v6967_v45 = vpop.permute.xlu1 %6966  ;;  %v6957_v47 = vpop.permute.xlu0 %6956 }
 0x125   : > { %v6959_v48 = vunpack.i.h.bf16 %v6957_v47  ;;  %v6958_v50 = vunpack.i.l.bf16 %v6957_v47  ;;  %v6969_v5 = vunpack.i.h.bf16 %v6967_v45  ;;  %v6968_v6 = vunpack.i.l.bf16 %v6967_v45 }
 0x127   : > { %v787_v55 = vsel %vm786_vm1, 0.0, %v6958_v50  ;;  %v788_v41 = vsel %vm786_vm1, %v8012_v63, %v6959_v48  ;;  %v790_v31 = vsel %vm786_vm1, %v7971_v43, %v6969_v5  ;;  %v789_v32 = vsel %vm786_vm1, %v7968_v42, %v6968_v6 }
 0x128   : > { %v6977_v53 = vpop.permute.xlu1 %6976  ;;  %v6962_v54 = vpop.permute.xlu0 %6961 }
 0x129   : > { %v6979_v56 = vunpack.i.h.bf16 %v6977_v53  ;;  %v6978_v57 = vunpack.i.l.bf16 %v6977_v53  ;;  %v6964_v61 = vunpack.i.h.bf16 %v6962_v54  ;;  %v6963_v0 = vunpack.i.l.bf16 %v6962_v54 }
 0x12c   : > { %v8125_v46 = vpop.permute.xlu1 %6981  ;;  %v6972_v60 = vpop.permute.xlu0 %6971 }
 0x12d   : > { %v6984_v58 = vunpack.i.h.bf16 %v8125_v46  ;;  %v6983_v59 = vunpack.i.l.bf16 %v8125_v46  ;;  %v6974_v1 = vunpack.i.h.bf16 %v6972_v60  ;;  %v6973_v4 = vunpack.i.l.bf16 %v6972_v60 }
 0x12f   : > { %v813_v63 = vsel %vm786_vm1, %v7926_v20, %v6973_v4  ;;  %v814_v8 = vsel %vm786_vm1, %v7921_v15, %v6974_v1  ;;  %v796_v11 = vsel %vm795_vm3, %v787_v55, %v6983_v59  ;;  %v797_v12 = vsel %vm795_vm3, %v788_v41, %v6984_v58 }
 0x130   : > { %v6987_v7 = vpop.permute.xlu1 %6986  ;;  %v6992_v13 = vpop.permute.xlu0 %6991  ;;  %v821_v18 = vsel %vm795_vm3, %v813_v63, %v6978_v57  ;;  %v822_v19 = vsel %vm795_vm3, %v814_v8, %v6979_v56 }
 0x131   : > { %v6989_v14 = vunpack.i.h.bf16 %v6987_v7  ;;  %v6988_v17 = vunpack.i.l.bf16 %v6987_v7  ;;  %v6994_v22 = vunpack.i.h.bf16 %v6992_v13  ;;  %v6993_v23 = vunpack.i.l.bf16 %v6992_v13 }
 0x132   : > { %v829_v20 = vsel %vm804_vm4, %v821_v18, %v6963_v0  ;;  %v830_v24 = vsel %vm804_vm4, %v822_v19, %v6964_v61 }
 0x133   : > { %v838_v15 = vpack.c.bf16 %v830_v24, %v829_v20  ;;  %v805_v25 = vsel %vm804_vm4, %v796_v11, %v6988_v17  ;;  %v806_v26 = vsel %vm804_vm4, %v797_v12, %v6989_v14  ;;  %v816_v36 = vsel %vm786_vm1, %v7928_v21, %v6994_v22 }
 0x134   : > { %v7002_v27 = vpop.permute.xlu1 %7001  ;;  %v837_v29 = vpack.c.bf16 %v806_v26, %v805_v25  ;;  %v6997_v33 = vpop.permute.xlu0 %6996  ;;  %v815_v39 = vsel %vm786_vm1, %v7923_v16, %v6993_v23 }
 0x135   : > { %1044 = vmatprep.mubr.bf16.mxu0 %v838_v15  ;;  %v7004_v34 = vunpack.i.h.bf16 %v7002_v27  ;;  %v7003_v35 = vunpack.i.l.bf16 %v7002_v27  ;;  %v6999_v40 = vunpack.i.h.bf16 %v6997_v33  ;;  %v6998_v45 = vunpack.i.l.bf16 %v6997_v33 }
 0x136   : > { %1045 = vmatmul.mubr.bf16.vlgmr.msra.gmra.mrb[0].mxu0 %v837_v29 }
 0x137   : > { %v798_v48 = vsel %vm795_vm3, %v789_v32, %v7003_v35  ;;  %v799_v43 = vsel %vm795_vm3, %v790_v31, %v7004_v34  ;;  %v823_v54 = vsel %vm795_vm3, %v815_v39, %v6998_v45  ;;  %v824_v55 = vsel %vm795_vm3, %v816_v36, %v6999_v40 }
 0x138   : > { %v7012_v47 = vpop.permute.xlu1 %7011  ;;  %v7007_v50 = vpop.permute.xlu0 %7006  ;;  %v7045_v45 = vpack.i.bf16 %v8104_v37, %v8042_v10 }
 0x139   : > { %v7014_v42 = vunpack.i.h.bf16 %v7012_v47  ;;  %v7013_v53 = vunpack.i.l.bf16 %v7012_v47  ;;  %v7009_v41 = vunpack.i.h.bf16 %v7007_v50  ;;  %v7008_v21 = vunpack.i.l.bf16 %v7007_v50 }
 0x13a   : > { %v585_v50 = vrot.slane %v7992_v52, 7 }
 0x13b   : > { %v807_v56 = vsel %vm804_vm4, %v798_v48, %v7013_v53  ;;  %v808_v16 = vsel %vm804_vm4, %v799_v43, %v7014_v42  ;;  %v831_v57 = vsel %vm804_vm4, %v823_v54, %v7008_v21  ;;  %v832_v58 = vsel %vm804_vm4, %v824_v55, %v7009_v41 }
 0x13c   : > { %v840_v60 = vpack.c.bf16 %v808_v16, %v807_v56  ;;  %v841_v61 = vpack.c.bf16 %v832_v58, %v831_v57  ;;  %v7017_v0 = vpop.permute.xlu1 %7016 }
 0x13d   : > { %v7019_v63 = vunpack.i.h.bf16 %v7017_v0  ;;  %v7018_v8 = vunpack.i.l.bf16 %v7017_v0 }
 0x13e   : > { %1052 = vmatprep.mubr.bf16.mxu0 %v841_v61 }
 0x13f   : > { %1053 = vmatmul.mubr.bf16.gmra.mrb[4].mxu0 %v840_v60  ;;  %v818_v14 = vsel %vm786_vm1, %v7985_v49, %v7019_v63  ;;  %v817_v17 = vsel %vm786_vm1, %v7937_v28, %v7018_v8  ;;  %v602_v60 = vsel %vm594_vm2, 0.0, %v585_v50 }
 0x140   : > { %v7027_v5 = vpop.permute.xlu1 %7026 }
 0x141   : > { %v7029_v11 = vunpack.i.h.bf16 %v7027_v5  ;;  %v7028_v12 = vunpack.i.l.bf16 %v7027_v5  ;;  %v7055_v5 = vpack.i.bf16 %v8022_v3, %v8019_v2 }
 0x143   : > { %v825_v24 = vsel %vm795_vm3, %v817_v17, %v7028_v12  ;;  %v826_v15 = vsel %vm795_vm3, %v818_v14, %v7029_v11  ;;  %v7065_v11 = vpack.i.bf16 %v8009_v62, %v602_v60  ;;  %v7075_v12 = vpack.i.bf16 %v602_v60, %v8107_v38  ;;  %v7022_v17 = vpop.permute.xlu0 %7021 }
 0x144   : > { %v7037_v13 = vpop.permute.xlu1 %7036 }
 0x145   : > { %v7039_v18 = vunpack.i.h.bf16 %v7037_v13  ;;  %v7038_v19 = vunpack.i.l.bf16 %v7037_v13  ;;  %v7070_v13 = vpack.i.bf16 %v7621_v30, %v7992_v52 }
 0x147   : > { %v833_v26 = vsel %vm804_vm4, %v825_v24, %v7038_v19  ;;  %v834_v49 = vsel %vm804_vm4, %v826_v15, %v7039_v18 }
 0x148   : > { %v844_v27 = vpack.c.bf16 %v834_v49, %v833_v26 }
 0x14a   : > { %1060 = vmatprep.mubr.bf16.mxu0 %v844_v27 }
 0x18a   : > { %v8159_v1 = vpop.f32.mrb[0].mxu1 }
 0x18b   : > { %v8161_v4 = vpop.f32.mrb[1].mxu1 }
 0x18c   : > { %v8163_v6 = vpop.f32.mrb[2].mxu1 }
 0x18d   : > { %v8165_v7 = vpop.f32.mrb[3].mxu1 }
 0x192   : > { %v8171_v22 = vpop.f32.mrb[4].mxu1 }
 0x193   : > { %v8173_v23 = vpop.f32.mrb[5].mxu1 }
 0x194   : > { %v8175_v20 = vpop.f32.mrb[6].mxu1 }
 0x195   : > { %v8179_v25 = vpop.f32.mrb[7].mxu1 }
 0x19a   : > { %v6408_v28 = vpop.f32.mrb[8].mxu1 }
 0x19b   : > { %v1252_v29 = vrot.slane %v6408_v28, 4  ;;  %v1208_v31 = vpop.f32.mrb[9].mxu1 }
 0x19c   : > { %v1249_v32 = vrot.slane %v1208_v31, 4  ;;  %v6409_v33 = vpop.f32.mrb[10].mxu1 }
 0x19d   : > { %v1243_v34 = vrot.slane %v6409_v33, 4  ;;  %v8184_v35 = vsel %vm1245_vm5, %v1252_v29, %v6409_v33  ;;  %v1211_v36 = vpop.f32.mrb[11].mxu1  ;;  %v7023_v33 = vunpack.i.l.bf16 %v7022_v17 }
 0x19e   : > { %v1240_v39 = vrot.slane %v1211_v36, 4  ;;  %v8187_v40 = vsel %vm1245_vm5, %v1249_v32, %v1211_v36  ;;  %v7024_v32 = vunpack.i.h.bf16 %v7022_v17 }
 0x19f   : > { %v8192_v47 = vsel %vm1245_vm5, %v6408_v28, %v1243_v34  ;;  %v8196_v48 = vpack.i.bf16 %v8184_v35, %v8187_v40  ;;  %v7032_v28 = vpop.permute.xlu0 %7031 }
 0x1a0   : > { %v1246_v43 = vsel %vm1245_vm5, %v1208_v31, %v1240_v39  ;;  %v792_v60 = vsel %vm786_vm1, %v8042_v10, %v7024_v32 }
 0x1a1   : > { %7051 = vrot.lane.b32.xlu1 %v8196_v48, %s7624_s15  ;;  %v8202_v42 = vmul.f32 0.35355338, %v1246_v43  ;;  %v8205_v53 = vpack.i.bf16 %v8192_v47, %v1246_v43 }
 0x1a2   : > { %v6412_v54 = vpop.f32.mrb[12].mxu1 }
 0x1a3   : > { %6418 = vmatprep.mubr.msk.f32.mxu1 %vm1288_vm6, %v8202_v42  ;;  %7041 = vrot.lane.b32.xlu0 %v8205_v53, %s7624_s15  ;;  %v1268_v55 = vrot.slane %v6412_v54, 4  ;;  %v1224_v41 = vpop.f32.mrb[13].mxu1 }
 0x1a4   : > { %v1265_v21 = vrot.slane %v1224_v41, 4  ;;  %v6413_v56 = vpop.f32.mrb[14].mxu1 }
 0x1a5   : > { %7061 = vrot.lane.b32.xlu1 %v8117_v44, %s7622_s19  ;;  %v1260_v16 = vrot.slane %v6413_v56, 4  ;;  %v8214_v57 = vsel %vm1245_vm5, %v1268_v55, %v6413_v56  ;;  %v1227_v58 = vpop.f32.mrb[15].mxu1 }
 0x1a6   : > { %v1257_v61 = vrot.slane %v1227_v58, 4  ;;  %v8218_v0 = vsel %vm1245_vm5, %v1265_v21, %v1227_v58  ;;  %v7033_v21 = vunpack.i.l.bf16 %v7032_v28 }
 0x1a7   : > { %7046 = vrot.lane.b32.xlu0 %v7045_v45, %s7624_s15  ;;  %v8224_v63 = vsel %vm1245_vm5, %v6412_v54, %v1260_v16  ;;  %v8228_v44 = vpack.i.bf16 %v8214_v57, %v8218_v0 }
 0x1a8   : > { %v8231_v8 = vsel %vm1245_vm5, %v1224_v41, %v1257_v61  ;;  %v7034_v41 = vunpack.i.h.bf16 %v7032_v28  ;;  %v791_v61 = vsel %vm786_vm1, %v8039_v9, %v7023_v33 }
 0x1a9   : > { %674 = vrot.lane.b32.xlu1 %v8019_v2, %s7623_s21  ;;  %v8239_v3 = vpack.i.bf16 %v8224_v63, %v8231_v8  ;;  %v8252_v2 = vld [vmem:[%s9854_s2] ss:$0 sm:$0xff]  ;;  %v800_v10 = vsel %vm795_vm3, %v791_v61, %v7033_v21 }
 0x1ab   : > { %7056 = vrot.lane.b32.xlu0 %v7055_v5, %s7622_s19 }
 0x1ad   : > { %7076 = vrot.lane.b32.xlu1 %v7075_v12, %s7624_s15 }
 0x1af   : > { %7066 = vrot.lane.b32.xlu0 %v7065_v11, %s7623_s21 }
 0x1b3   : > { %7071 = vrot.lane.b32.xlu0 %v7070_v13, %s7624_s15 }
 0x1b7   : > { %7081 = vrot.lane.b32.xlu0 %v8228_v44, %s7624_s15 }
 0x209   : > { %v6202_v62 = vpop.f32.mrb[0].mxu0 }
 0x20a   : > { %v6203_v14 = vpop.f32.mrb[1].mxu0 }
 0x20b   : > { %v6204_v18 = vadd.f32 %v6203_v14, %v6202_v62  ;;  %v6205_v19 = vpop.f32.mrb[2].mxu0 }
 0x20c   : > { %v6206_v24 = vpop.f32.mrb[3].mxu0 }
 0x20d   : > { %v1047_v15 = vadd.f32 %v6204_v18, %v8252_v2  ;;  %v6207_v26 = vadd.f32 %v6206_v24, %v6205_v19 }
 0x20f   : > { %v8256_v30 = vadd.f32 %v8161_v4, %v1047_v15  ;;  %v1050_v49 = vadd.f32 %v6207_v26, %v8252_v2 }
 0x211   : > { %v8260_v27 = vadd.f32 %v8165_v7, %v1050_v49 }
 0x212   : > { %v6208_v31 = vpop.f32.mrb[4].mxu0 }
 0x213   : > { %v7052_v29 = vpop.permute.xlu1 %7051  ;;  %v6209_v34 = vpop.f32.mrb[5].mxu0 }
 0x214   : > { %v6210_v36 = vadd.f32 %v6209_v34, %v6208_v31  ;;  %v6211_v45 = vpop.f32.mrb[6].mxu0  ;;  %v7054_v43 = vunpack.i.h.bf16 %v7052_v29  ;;  %v7053_v50 = vunpack.i.l.bf16 %v7052_v29  ;;  %v8291_v29 = vmul.f32 0.35355338, %v8192_v47 }
 0x215   : > { %v7042_v39 = vpop.permute.xlu0 %7041  ;;  %v6212_v4 = vpop.f32.mrb[7].mxu0 }
 0x216   : > { %v7044_v54 = vunpack.i.h.bf16 %v7042_v39  ;;  %v7043_v55 = vunpack.i.l.bf16 %v7042_v39  ;;  %v1055_v56 = vadd.f32 %v6210_v36, %v8252_v2  ;;  %v6213_v7 = vadd.f32 %v6212_v4, %v6211_v45 }
 0x217   : > { %v7062_v58 = vpop.permute.xlu1 %7061  ;;  %v6692_v62 = vpack.c.bf16 %v7054_v43, %v7053_v50  ;;  %v8298_v36 = vmul.f32 0.35355338, %v8187_v40 }
 0x218   : > { %v6686_v5 = vpack.c.bf16 %v7044_v54, %v7043_v55  ;;  %v8274_v11 = vadd.f32 %v8159_v1, %v1055_v56  ;;  %v1058_v12 = vadd.f32 %v6213_v7, %v8252_v2  ;;  %v801_v1 = vsel %vm795_vm3, %v792_v60, %v7034_v41 }
 0x219   : > { %v7047_v13 = vpop.permute.xlu0 %7046  ;;  %v7064_v15 = vunpack.i.h.bf16 %v7062_v58  ;;  %v7063_v26 = vunpack.i.l.bf16 %v7062_v58  ;;  %v8319_v58 = vmul.f32 0.35355338, %v8184_v35  ;;  %v8331_v35 = vmul.f32 0.35355338, %v8218_v0 }
 0x21a   : > { %v7049_v14 = vunpack.i.h.bf16 %v7047_v13  ;;  %v7048_v17 = vunpack.i.l.bf16 %v7047_v13  ;;  %6688 = vmatprep.subr.msk.bf16.mxu1 %vm8265_vm7, %v6686_v5  ;;  %v8280_v18 = vadd.f32 %v8163_v6, %v1058_v12  ;;  %v8324_v12 = vmul.f32 0.35355338, %v8231_v8 }
 0x21b   : > { %6691 = vmatpush3.bf16.xpose.msk.msra.mxu1 %vm8265_vm7, %v6686_v5  ;;  %v675_v9 = vpop.permute.xlu1 %674  ;;  %v793_v32 = vsel %vm786_vm1, %v8104_v37, %v7063_v26  ;;  %v794_v33 = vsel %vm786_vm1, %v8107_v38, %v7064_v15  ;;  %v8340_v8 = vmul.f32 0.35355338, %v8214_v57 }
 0x21c   : > { %6694 = vmatprep.subr.msk.bf16.mxu1 %vm8265_vm7, %v6692_v62  ;;  %v809_v19 = vsel %vm804_vm4, %v800_v10, %v7048_v17  ;;  %v810_v24 = vsel %vm804_vm4, %v801_v1, %v7049_v14  ;;  %v803_v38 = vsel %vm795_vm3, %v794_v33, %v675_v9  ;;  %v8347_v17 = vld [vmem:[%s9856_s4 + $0x8] sm:$0xff]  ;;  %v8352_v1 = vld [vmem:[%s9856_s4] sm:$0xff] }
 0x21d   : > { %v7057_v49 = vpop.permute.xlu0 %7056  ;;  %v843_v6 = vpack.c.bf16 %v810_v24, %v809_v19 }
 0x21e   : > { %v7059_v28 = vunpack.i.h.bf16 %v7057_v49  ;;  %v7058_v39 = vunpack.i.l.bf16 %v7057_v49 }
 0x21f   : > { %1061 = vmatmul.mubr.bf16.gmra.mrb[8].mxu0 %v843_v6  ;;  %v7077_v31 = vpop.permute.xlu1 %7076 }
 0x220   : > { %v7079_v50 = vunpack.i.h.bf16 %v7077_v31  ;;  %v7078_v47 = vunpack.i.l.bf16 %v7077_v31  ;;  %v820_v37 = vsel %vm786_vm1, %v7992_v52, %v7059_v28  ;;  %v819_v55 = vsel %vm786_vm1, %v7990_v51, %v7058_v39 }
 0x221   : > { %v7067_v34 = vpop.permute.xlu0 %7066  ;;  %v828_v56 = vsel %vm795_vm3, %v820_v37, %v6983_v59 }
 0x222   : > { %v7069_v45 = vunpack.i.h.bf16 %v7067_v34  ;;  %6419 = vmatmul.mubr.msk.f32.vlgmr.msra.gmra.mrb[16].mxu1 %vm1288_vm6, %v8291_v29  ;;  %v7068_v43 = vunpack.i.l.bf16 %v7067_v34  ;;  %v812_v52 = vsel %vm804_vm4, %v803_v38, %v7079_v50 }
 0x223   : > { %6697 = vmatpush3.bf16.xpose.msk.msra.mxu1 %vm8265_vm7, %v6692_v62  ;;  %6425 = vmatprep.mubr.msk.f32.mxu1 %vm1288_vm6, %v8298_v36 }
 0x224   : > { %v802_v40 = vsel %vm795_vm3, %v793_v32, %v7069_v45  ;;  %v827_v21 = vsel %vm795_vm3, %v819_v55, %v7068_v43 }
 0x225   : > { %v7072_v54 = vpop.permute.xlu0 %7071  ;;  %v811_v7 = vsel %vm804_vm4, %v802_v40, %v7078_v47 }
 0x226   : > { %v7074_v4 = vunpack.i.h.bf16 %v7072_v54  ;;  %v7073_v41 = vunpack.i.l.bf16 %v7072_v54  ;;  %v846_v59 = vpack.c.bf16 %v812_v52, %v811_v7 }
 0x228   : > { %v835_v60 = vsel %vm804_vm4, %v827_v21, %v7073_v41  ;;  %v836_v61 = vsel %vm804_vm4, %v828_v56, %v7074_v4 }
 0x229   : > { %v7082_v51 = vpop.permute.xlu0 %7081  ;;  %v847_v5 = vpack.c.bf16 %v836_v61, %v835_v60 }
 0x22a   : > { %v7084_v13 = vunpack.i.h.bf16 %v7082_v51  ;;  %v7083_v46 = vunpack.i.l.bf16 %v7082_v51  ;;  %6426 = vmatmul.mubr.msk.f32.vlgmr.msra.gmra.mrb[18].mxu1 %vm1288_vm6, %v8319_v58 }
 0x22b   : > { %1068 = vmatprep.mubr.bf16.mxu0 %v847_v5  ;;  %6432 = vmatprep.mubr.msk.f32.mxu1 %vm1288_vm6, %v8324_v12 }
 0x22c   : > { %v6704_v62 = vpack.c.bf16 %v7084_v13, %v7083_v46  ;;  %1069 = vmatmul.mubr.bf16.gmra.mrb[12].mxu0 %v846_v59 }
 0x22d   : > { %6439 = vmatprep.mubr.msk.f32.mxu0 %vm1288_vm6, %v8331_v35 }
 0x22e   : > { %6706 = vmatprep.subr.msk.bf16.mxu0 %vm8265_vm7, %v6704_v62 }
 0x22f   : > { %6709 = vmatpush3.bf16.xpose.msk.msra.mxu0 %vm8265_vm7, %v6704_v62 }
 0x236   : > { %6440 = vmatmul.mubr.msk.f32.vlgmr.msra.gmra.mrb[16].mxu0 %vm1288_vm6, %v8340_v8 }
 0x2f2   : > { %v6214_v14 = vpop.f32.mrb[8].mxu0 }
 0x2f3   : > { %v6215_v0 = vpop.f32.mrb[9].mxu0 }
 0x2f4   : > { %v6216_v9 = vadd.f32 %v6215_v0, %v6214_v14  ;;  %v6217_v10 = vpop.f32.mrb[10].mxu0 }
 0x2f5   : > { %v6218_v19 = vpop.f32.mrb[11].mxu0  ;;  %v6420_v57 = vpop.f32.mrb[16].mxu1 }
 0x2f6   : > { %v1063_v24 = vadd.f32 %v6216_v9, %v8252_v2  ;;  %v6219_v15 = vadd.f32 %v6218_v19, %v6217_v10  ;;  %v1371_v26 = vadd.f32 %v6420_v57, %v8347_v17  ;;  %v1365_v49 = vpop.f32.mrb[17].mxu1 }
 0x2f7   : > { %v1366_v6 = vadd.f32 %v1365_v49, %v8352_v1 }
 0x2f8   : > { %v8358_v28 = vadd.f32 %v8173_v23, %v1063_v24  ;;  %v1066_v31 = vadd.f32 %v6219_v15, %v8252_v2  ;;  %v1651_v32 = vsel %vm1647_vm8, %v1371_v26, -inf }
 0x2f9   : > { %1652 = vmax.xlane.f32.xlu0 %v1651_v32  ;;  %v1648_v33 = vsel %vm1647_vm8, %v1366_v6, -inf }
 0x2fa   : > { %9918 = vst [vmem:[#allocation23_spill] sm:$0xff] %v8358_v28  ;;  %v8364_v34 = vadd.f32 %v8179_v25, %v1066_v31  ;;  %1649 = vmax.xlane.f32.xlu1 %v1648_v33 }
 0x2fd   : > { %v6427_v39 = vpop.f32.mrb[18].mxu1 }
 0x2fe   : > { %v8367_v45 = vadd.f32 %v6427_v39, %v8347_v17  ;;  %v1456_v43 = vpop.f32.mrb[19].mxu1 }
 0x2ff   : > { %v1457_v50 = vadd.f32 %v1456_v43, %v8352_v1  ;;  %v6220_v23 = vpop.f32.mrb[12].mxu0 }
 0x300   : > { %v6221_v47 = vpop.f32.mrb[13].mxu0  ;;  %v1657_v37 = vsel %vm1647_vm8, %v8367_v45, -inf }
 0x301   : > { %v6222_v38 = vadd.f32 %v6221_v47, %v6220_v23  ;;  %1658 = vmax.xlane.f32.xlu1 %v1657_v37  ;;  %v6223_v40 = vpop.f32.mrb[14].mxu0  ;;  %v1654_v54 = vsel %vm1647_vm8, %v1457_v50, -inf }
 0x302   : > { %1655 = vmax.xlane.f32.xlu0 %v1654_v54  ;;  %v6224_v25 = vpop.f32.mrb[15].mxu0 }
 0x303   : > { %v1071_v55 = vadd.f32 %v6222_v38, %v8252_v2  ;;  %v6225_v4 = vadd.f32 %v6224_v25, %v6223_v40 }
 0x305   : > { %v8375_v41 = vadd.f32 %v8171_v22, %v1071_v55  ;;  %v1074_v21 = vadd.f32 %v6225_v4, %v8252_v2 }
 0x307   : > { %v8379_v56 = vadd.f32 %v8175_v20, %v1074_v21 }
 0x309   : > { %9919 = vst [vmem:[#allocation24_spill] sm:$0xff] %v8379_v56  ;;  %v6441_v7 = vpop.f32.mrb[16].mxu0 }
 0x30a   : > { %v1644_v52 = vadd.f32 %v6441_v7, %v8347_v17  ;;  %v1638_v60 = vpop.f32.mrb[17].mxu0 }
 0x30b   : > { %v1639_v61 = vadd.f32 %v1638_v60, %v8352_v1  ;;  %v8413_v60 = vmul.f32 0.35355338, %v8224_v63 }
 0x30c   : > { %v1669_v51 = vsel %vm1647_vm8, %v1644_v52, -inf }
 0x30d   : > { %1670 = vmax.xlane.f32.xlu1 %v1669_v51  ;;  %v1666_v5 = vsel %vm1647_vm8, %v1639_v61, -inf }
 0x30e   : > { %1667 = vmax.xlane.f32.xlu0 %v1666_v5 }
 0x31e   : > { %7091 = vrot.lane.b32.xlu1 %v8205_v53, %s7623_s21 }
 0x324   : > { %7086 = vrot.lane.b32.xlu0 %v8239_v3, %s7624_s15  ;;  %s7625_s15 = smov 88  }
 0x328   : > { %7096 = vrot.lane.b32.xlu0 %v8196_v48, %s7623_s21 }
 0x386   : > { %v1653_v22 = vpop.xlane.xlu0 %1652 }
 0x387   : > { %v1673_v20 = vsub.f32 %v1371_v26, %v1653_v22  ;;  %v1650_v2 = vpop.xlane.xlu1 %1649 }
 0x388   : > { %v1672_v13 = vsub.f32 %v1366_v6, %v1650_v2 }
 0x389   : > { %v1682_v46 = vmul.f32 1.442695, %v1673_v20 }
 0x38a   : > { %v1680_v59 = vmul.f32 1.442695, %v1672_v13 }
 0x38b   : > { %7262 = vpow2.f32 %v1682_v46 }
 0x38c   : > { %7264 = vpow2.f32 %v1680_v59 }
 0x38e   : > { %v1659_v19 = vpop.xlane.xlu1 %1658 }
 0x38f   : > { %v1656_v62 = vpop.xlane.xlu0 %1655  ;;  %v1675_v31 = vsub.f32 %v8367_v45, %v1659_v19 }
 0x390   : > { %v1674_v14 = vsub.f32 %v1457_v50, %v1656_v62 }
 0x391   : > { %v1686_v54 = vmul.f32 1.442695, %v1675_v31 }
 0x392   : > { %v1684_v0 = vmul.f32 1.442695, %v1674_v14 }
 0x394   : > { %7266 = vpow2.f32 %v1684_v0 }
 0x395   : > { %v8391_v9 = vpop.eup %7262 }
 0x396   : > { %v8393_v10 = vpop.eup %7264  ;;  %v1699_v57 = vsel %vm1647_vm8, %v8391_v9, 0.0 }
 0x397   : > { %1700 = vadd.xlane.f32.xlu1 %v1699_v57  ;;  %v1696_v24 = vsel %vm1647_vm8, %v8393_v10, 0.0 }
 0x398   : > { %1697 = vadd.xlane.f32.xlu0 %v1696_v24 }
 0x39a   : > { %v1671_v15 = vpop.xlane.xlu1 %1670 }
 0x39b   : > { %v1679_v26 = vsub.f32 %v1644_v52, %v1671_v15  ;;  %v1668_v49 = vpop.xlane.xlu0 %1667 }
 0x39c   : > { %v1678_v6 = vsub.f32 %v1639_v61, %v1668_v49 }
 0x39d   : > { %v1694_v32 = vmul.f32 1.442695, %v1679_v26 }
 0x39e   : > { %v8400_v33 = vpop.eup %7266  ;;  %v1692_v39 = vmul.f32 1.442695, %v1678_v6  ;;  %v7092_v43 = vpop.permute.xlu1 %7091 }
 0x39f   : > { %7268 = vpow2.f32 %v1694_v32  ;;  %v7087_v50 = vpop.permute.xlu0 %7086  ;;  %v1702_v23 = vsel %vm1647_vm8, %v8400_v33, 0.0  ;;  %v7094_v47 = vunpack.i.h.bf16 %v7092_v43  ;;  %v7093_v37 = vunpack.i.l.bf16 %v7092_v43 }
 0x3a0   : > { %v7089_v38 = vunpack.i.h.bf16 %v7087_v50  ;;  %v7088_v40 = vunpack.i.l.bf16 %v7087_v50  ;;  %1703 = vadd.xlane.f32.xlu0 %v1702_v23  ;;  %7270 = vpow2.f32 %v1692_v39 }
 0x3a1   : > { %v6710_v45 = vpack.c.bf16 %v7094_v47, %v7093_v37  ;;  %7272 = vpow2.f32 %v1686_v54 }
 0x3a2   : > { %v6698_v25 = vpack.c.bf16 %v7089_v38, %v7088_v40 }
 0x3a3   : > { %v7097_v55 = vpop.permute.xlu0 %7096 }
 0x3a4   : > { %6700 = vmatprep.subr.msk.bf16.mxu1 %vm8265_vm7, %v6698_v25  ;;  %v7099_v4 = vunpack.i.h.bf16 %v7097_v55  ;;  %v7098_v21 = vunpack.i.l.bf16 %v7097_v55 }
 0x3a5   : > { %6703 = vmatpush3.bf16.xpose.msk.msra.mxu1 %vm8265_vm7, %v6698_v25 }
 0x3a6   : > { %6711 = vmatprep.subr.bf16.mxu1 %v6710_v45  ;;  %v6714_v51 = vpack.c.bf16 %v7099_v4, %v7098_v21 }
 0x3a9   : > { %v8408_v7 = vpop.eup %7268 }
 0x3aa   : > { %v1717_v52 = vsel %vm1647_vm8, %v8408_v7, 0.0  ;;  %v7271_v61 = vpop.eup %7270 }
 0x3ab   : > { %1718 = vadd.xlane.f32.xlu1 %v1717_v52  ;;  %v1714_v5 = vsel %vm1647_vm8, %v7271_v61, 0.0  ;;  %v7273_v22 = vpop.eup %7272 }
 0x3ac   : > { %6433 = vmatmul.mubr.msk.f32.vlgmr.msra.gmra.mrb[20].mxu1 %vm1288_vm6, %v8413_v60  ;;  %v1705_v20 = vsel %vm1647_vm8, %v7273_v22, 0.0 }
 0x3ad   : > { %6713 = vmatpush3.bf16.msra.mxu1 %v6710_v45 }
 0x3ae   : > { %6715 = vmatprep.subr.bf16.mxu1 %v6714_v51 }
 0x3af   : > { %1715 = vadd.xlane.f32.xlu1 %v1714_v5 }
 0x3b3   : > { %1706 = vadd.xlane.f32.xlu1 %v1705_v20 }
 0x3b6   : > { %7101 = vrot.lane.b32.xlu0 %v8228_v44, %s7623_s21 }
 0x3ba   : > { %7111 = vrot.lane.b32.xlu0 %v8196_v48, %s7625_s15 }
 0x3be   : > { %2089 = vrot.lane.b32.xlu0 %v8291_v29, %s7626_s14 }
 0x3c2   : > { %2178 = vrot.lane.b32.xlu0 %v8298_v36, %s7626_s14 }
 0x3c4   : > { %7106 = vrot.lane.b32.xlu1 %v8205_v53, %s7625_s15 }
 0x3c6   : > { %7121 = vrot.lane.b32.xlu0 %v8228_v44, %s7625_s15 }
 0x3c8   : > { %2087 = vrot.lane.b32.xlu1 %v8202_v42, %s7626_s14 }
 0x3ca   : > { %2271 = vrot.lane.b32.xlu0 %v8413_v60, %s7626_s14 }
 0x3cc   : > { %7116 = vrot.lane.b32.xlu1 %v8239_v3, %s7625_s15 }
 0x3ce   : > { %2362 = vrot.lane.b32.xlu0 %v8340_v8, %s7626_s14 }
 0x3d0   : > { %2180 = vrot.lane.b32.xlu1 %v8319_v58, %s7626_s14 }
 0x3d4   : > { %2269 = vrot.lane.b32.xlu1 %v8324_v12, %s7626_s14 }
 0x3d8   : > { %2360 = vrot.lane.b32.xlu1 %v8331_v35, %s7626_s14 }
 0x424   : > { %v1701_v63 = vpop.xlane.xlu1 %1700 }
 0x425   : > { %7274 = vrcp.f32 %v1701_v63  ;;  %v1698_v2 = vpop.xlane.xlu0 %1697 }
 0x426   : > { %7276 = vrcp.f32 %v1698_v2 }
 0x42d   : > { %v1704_v13 = vpop.xlane.xlu0 %1703 }
 0x42e   : > { %7278 = vrcp.f32 %v1704_v13 }
 0x42f   : > { %v7275_v46 = vpop.eup %7274 }
 0x430   : > { %v7277_v59 = vpop.eup %7276  ;;  %v1729_v57 = vmul.f32 %v7275_v46, %v8391_v9 }
 0x431   : > { %v7102_v62 = vpop.permute.xlu0 %7101  ;;  %v1728_v14 = vmul.f32 %v7277_v59, %v8393_v10 }
 0x432   : > { %v7104_v0 = vunpack.i.h.bf16 %v7102_v62  ;;  %v7103_v19 = vunpack.i.l.bf16 %v7102_v62 }
 0x433   : > { %6446 = vmatprep.mubr.msk.f32.mxu1 %vm1647_vm8, %v1728_v14 }
 0x434   : > { %6447 = vmatmul.mubr.msk.f32.vlgmr.msra.gmra.mrb[22].mxu1 %vm1647_vm8, %v1729_v57  ;;  %v6722_v24 = vpack.c.bf16 %v7104_v0, %v7103_v19 }
 0x435   : > { %6717 = vmatpush3.bf16.msra.mxu1 %v6714_v51  ;;  %v7112_v37 = vpop.permute.xlu0 %7111 }
 0x436   : > { %6723 = vmatprep.subr.bf16.mxu1 %v6722_v24  ;;  %v7114_v54 = vunpack.i.h.bf16 %v7112_v37  ;;  %v7113_v25 = vunpack.i.l.bf16 %v7112_v37 }
 0x438   : > { %v7279_v15 = vpop.eup %7278  ;;  %v1719_v26 = vpop.xlane.xlu1 %1718  ;;  %v6732_v55 = vpack.c.bf16 %v7114_v54, %v7113_v25 }
 0x439   : > { %v1730_v49 = vmul.f32 %v7279_v15, %v8400_v33  ;;  %v2090_v45 = vpop.permute.xlu0 %2089 }
 0x43b   : > { %6453 = vmatprep.mubr.msk.f32.mxu1 %vm1647_vm8, %v1730_v49 }
 0x43c   : > { %v1716_v6 = vpop.xlane.xlu1 %1715 }
 0x43d   : > { %7280 = vrcp.f32 %v1716_v6  ;;  %v2179_v21 = vpop.permute.xlu0 %2178 }
 0x440   : > { %v1707_v10 = vpop.xlane.xlu1 %1706 }
 0x441   : > { %7282 = vrcp.f32 %v1707_v10  ;;  %v7122_v51 = vpop.permute.xlu0 %7121 }
 0x442   : > { %7284 = vrcp.f32 %v1719_v26  ;;  %v7123_v20 = vunpack.i.l.bf16 %v7122_v51 }
 0x444   : > { %v7107_v31 = vpop.permute.xlu1 %7106 }
 0x445   : > { %v7109_v32 = vunpack.i.h.bf16 %v7107_v31  ;;  %v7108_v39 = vunpack.i.l.bf16 %v7107_v31  ;;  %v2272_v13 = vpop.permute.xlu0 %2271 }
 0x447   : > { %v7281_v9 = vpop.eup %7280  ;;  %v6726_v38 = vpack.c.bf16 %v7109_v32, %v7108_v39  ;;  %v6078_v39 = vld [vmem:[%s9856_s4 + $0x10] sm:$0xff] }
 0x448   : > { %v1734_v47 = vmul.f32 %v7281_v9, %v7271_v61  ;;  %v2088_v40 = vpop.permute.xlu1 %2087  ;;  %v6079_v9 = vld [vmem:[%s9856_s4 + $0x18] sm:$0xff] }
 0x449   : > { %v2363_v59 = vpop.permute.xlu0 %2362 }
 0x44b   : > { %v7283_v43 = vpop.eup %7282 }
 0x44c   : > { %v1731_v50 = vmul.f32 %v7283_v43, %v7273_v22  ;;  %v7285_v23 = vpop.eup %7284  ;;  %v7117_v4 = vpop.permute.xlu1 %7116  ;;  %v7124_v22 = vunpack.i.h.bf16 %v7122_v51 }
 0x44d   : > { %v1735_v33 = vmul.f32 %v7285_v23, %v8408_v7  ;;  %v7119_v52 = vunpack.i.h.bf16 %v7117_v4  ;;  %v7118_v61 = vunpack.i.l.bf16 %v7117_v4 }
 0x44e   : > { %6454 = vmatmul.mubr.msk.f32.vlgmr.msra.gmra.mrb[24].mxu1 %vm1647_vm8, %v1731_v50  ;;  %v6744_v63 = vpack.c.bf16 %v7124_v22, %v7123_v20 }
 0x44f   : > { %6725 = vmatpush3.bf16.msra.mxu1 %v6722_v24  ;;  %6467 = vmatprep.mubr.msk.f32.mxu1 %vm1647_vm8, %v1734_v47  ;;  %v6738_v7 = vpack.c.bf16 %v7119_v52, %v7118_v61 }
 0x450   : > { %6728 = vmatprep.subr.msk.bf16.mxu1 %vm8265_vm7, %v6726_v38  ;;  %v2181_v5 = vpop.permute.xlu1 %2180 }
 0x452   : > { %6468 = vmatmul.mubr.msk.f32.vlgmr.msra.gmra.mrb[26].mxu1 %vm1647_vm8, %v1735_v33 }
 0x453   : > { %6474 = vmatprep.mubr.msk.f32.mxu1 %vm1288_vm6, %v2088_v40 }
 0x454   : > { %v2270_v2 = vpop.permute.xlu1 %2269 }
 0x458   : > { %6731 = vmatpush3.bf16.xpose.msk.msra.mxu1 %vm8265_vm7, %v6726_v38  ;;  %v2361_v46 = vpop.permute.xlu1 %2360 }
 0x459   : > { %6734 = vmatprep.subr.msk.bf16.mxu1 %vm8265_vm7, %v6732_v55 }
 0x45f   : > { %6475 = vmatmul.mubr.msk.f32.vlgmr.msra.gmra.mrb[28].mxu1 %vm1288_vm6, %v2090_v45 }
 0x460   : > { %6737 = vmatpush3.bf16.xpose.msk.msra.mxu1 %vm8265_vm7, %v6732_v55  ;;  %6481 = vmatprep.mubr.msk.f32.mxu1 %vm1288_vm6, %v2179_v21 }
 0x461   : > { %6740 = vmatprep.subr.msk.bf16.mxu1 %vm8265_vm7, %v6738_v7 }
 0x467   : > { %6482 = vmatmul.mubr.msk.f32.vlgmr.msra.gmra.mrb[30].mxu1 %vm1288_vm6, %v2181_v5 }
 0x468   : > { %6743 = vmatpush3.bf16.xpose.msk.msra.mxu1 %vm8265_vm7, %v6738_v7  ;;  %6488 = vmatprep.mubr.msk.f32.mxu1 %vm1288_vm6, %v2270_v2 }
 0x469   : > { %6746 = vmatprep.subr.msk.bf16.mxu1 %vm8265_vm7, %v6744_v63 }
 0x46f   : > { %6489 = vmatmul.mubr.msk.f32.vlgmr.msra.gmra.mrb[32].mxu1 %vm1288_vm6, %v2272_v13 }
 0x470   : > { %6749 = vmatpush3.bf16.xpose.msk.msra.mxu1 %vm8265_vm7, %v6744_v63  ;;  %6495 = vmatprep.mubr.msk.f32.mxu1 %vm1288_vm6, %v2361_v46 }
 0x477   : > { %6496 = vmatmul.mubr.msk.f32.vlgmr.msra.gmra.mrb[34].mxu1 %vm1288_vm6, %v2363_v59 }
 0x47f   : > { %v6434_v62 = vpop.f32.mrb[20].mxu1 }
 0x480   : > { %v1553_v14 = vadd.f32 %v6434_v62, %v8347_v17  ;;  %v1547_v0 = vpop.f32.mrb[21].mxu1 }
 0x481   : > { %v1548_v19 = vadd.f32 %v1547_v0, %v8352_v1 }
 0x482   : > { %v1663_v57 = vsel %vm1647_vm8, %v1553_v14, -inf }
 0x483   : > { %1664 = vmax.xlane.f32.xlu0 %v1663_v57  ;;  %v1660_v24 = vsel %vm1647_vm8, %v1548_v19, -inf }
 0x484   : > { %1661 = vmax.xlane.f32.xlu1 %v1660_v24 }
 0x507   : > { %v8471_v15 = vpop.f32.mrb[22].mxu1 }
 0x508   : > { %v8473_v26 = vpop.f32.mrb[23].mxu1 }
 0x510   : > { %v1665_v47 = vpop.xlane.xlu0 %1664 }
 0x511   : > { %v1662_v33 = vpop.xlane.xlu1 %1661  ;;  %v1677_v25 = vsub.f32 %v1553_v14, %v1665_v47 }
 0x512   : > { %v1676_v45 = vsub.f32 %v1548_v19, %v1662_v33 }
 0x513   : > { %v1690_v61 = vmul.f32 1.442695, %v1677_v25 }
 0x514   : > { %v1688_v7 = vmul.f32 1.442695, %v1676_v45 }
 0x515   : > { %7286 = vpow2.f32 %v1690_v61 }
 0x516   : > { %7288 = vpow2.f32 %v1688_v7 }
 0x51f   : > { %v8496_v62 = vpop.eup %7286 }
 0x520   : > { %v8499_v0 = vpop.eup %7288  ;;  %v1711_v19 = vsel %vm1647_vm8, %v8496_v62, 0.0 }
 0x521   : > { %v8475_v49 = vpop.f32.mrb[24].mxu1  ;;  %v1708_v57 = vsel %vm1647_vm8, %v8499_v0, 0.0 }
 0x522   : > { %v8477_v6 = vpop.f32.mrb[25].mxu1 }
 0x525   : > { %v8479_v10 = vpop.f32.mrb[26].mxu1 }
 0x526   : > { %v8481_v17 = vpop.f32.mrb[27].mxu1 }
 0x532   : > { %v6476_v31 = vpop.f32.mrb[28].mxu1 }
 0x533   : > { %v2169_v1 = vpop.f32.mrb[29].mxu1  ;;  %v2175_v37 = vadd.f32 %v6476_v31, %v6079_v9 }
 0x534   : > { %v2170_v40 = vadd.f32 %v6078_v39, %v2169_v1 }
 0x535   : > { %v2454_v55 = vsel %vm1647_vm8, %v2175_v37, -inf }
 0x536   : > { %v2451_v21 = vsel %vm1647_vm8, %v2170_v40, -inf }
 0x53a   : > { %v6483_v32 = vpop.f32.mrb[30].mxu1 }
 0x53b   : > { %v2266_v43 = vadd.f32 %v6483_v32, %v6079_v9  ;;  %v2260_v50 = vpop.f32.mrb[31].mxu1 }
 0x53c   : > { %v2261_v23 = vadd.f32 %v6078_v39, %v2260_v50 }
 0x53d   : > { %v2460_v38 = vsel %vm1647_vm8, %v2266_v43, -inf }
 0x53e   : > { %2461 = vmax.xlane.f32.xlu1 %v2460_v38  ;;  %v2457_v54 = vsel %vm1647_vm8, %v2261_v23, -inf }
 0x53f   : > { %2458 = vmax.xlane.f32.xlu0 %v2457_v54 }
 0x542   : > { %v6490_v4 = vpop.f32.mrb[32].mxu1  ;;  %2455 = vmax.xlane.f32.xlu1 %v2454_v55 }
 0x543   : > { %v2351_v52 = vpop.f32.mrb[33].mxu1  ;;  %2452 = vmax.xlane.f32.xlu0 %v2451_v21  ;;  %v2357_v63 = vadd.f32 %v6490_v4, %v6079_v9 }
 0x544   : > { %v2352_v13 = vadd.f32 %v6078_v39, %v2351_v52 }
 0x545   : > { %v2466_v59 = vsel %vm1647_vm8, %v2357_v63, -inf }
 0x546   : > { %v2463_v14 = vsel %vm1647_vm8, %v2352_v13, -inf }
 0x54a   : > { %v6497_v51 = vpop.f32.mrb[34].mxu1 }
 0x54b   : > { %v2448_v5 = vadd.f32 %v6497_v51, %v6079_v9  ;;  %v2442_v22 = vpop.f32.mrb[35].mxu1 }
 0x54c   : > { %v2443_v20 = vadd.f32 %v6078_v39, %v2442_v22 }
 0x54d   : > { %v2472_v2 = vsel %vm1647_vm8, %v2448_v5, -inf }
 0x54e   : > { %2473 = vmax.xlane.f32.xlu1 %v2472_v2  ;;  %v2469_v46 = vsel %vm1647_vm8, %v2443_v20, -inf }
 0x54f   : > { %2470 = vmax.xlane.f32.xlu0 %v2469_v46 }
 0x552   : > { %2467 = vmax.xlane.f32.xlu1 %v2466_v59 }
 0x553   : > { %2464 = vmax.xlane.f32.xlu0 %v2463_v14 }
 0x556   : > { %1712 = vadd.xlane.f32.xlu1 %v1711_v19 }
 0x557   : > { %1709 = vadd.xlane.f32.xlu0 %v1708_v57 }
 0x567   : > { %7131 = vrot.lane.b32.xlu1 %v8196_v48, %s7627_s8 }
 0x56b   : > { %7136 = vrot.lane.b32.xlu1 %v8205_v53, %s7627_s8 }
 0x56d   : > { %7126 = vrot.lane.b32.xlu0 %v8239_v3, %s7623_s21  ;;  %s7629_s21 = smov 112  }
 0x56f   : > { %7146 = vrot.lane.b32.xlu1 %v8239_v3, %s7627_s8 }
 0x571   : > { %7141 = vrot.lane.b32.xlu0 %v8228_v44, %s7627_s8  ;;  %s7635_s8 = smov 16  }
 0x573   : > { %7156 = vrot.lane.b32.xlu1 %v8205_v53, %s7628_s9 }
 0x575   : > { %7151 = vrot.lane.b32.xlu0 %v8196_v48, %s7628_s9 }
 0x5cb   : > { %v2462_v24 = vpop.xlane.xlu1 %2461 }
 0x5cc   : > { %v2459_v31 = vpop.xlane.xlu0 %2458  ;;  %v2478_v1 = vsub.f32 %v2266_v43, %v2462_v24 }
 0x5cd   : > { %v2477_v9 = vsub.f32 %v2261_v23, %v2459_v31 }
 0x5ce   : > { %v2489_v38 = vmul.f32 1.442695, %v2478_v1 }
 0x5cf   : > { %v2456_v32 = vpop.xlane.xlu1 %2455  ;;  %v2487_v54 = vmul.f32 1.442695, %v2477_v9 }
 0x5d0   : > { %v2476_v39 = vsub.f32 %v2175_v37, %v2456_v32  ;;  %v2453_v50 = vpop.xlane.xlu0 %2452 }
 0x5d1   : > { %v2475_v47 = vsub.f32 %v2170_v40, %v2453_v50 }
 0x5d2   : > { %v2485_v33 = vmul.f32 1.442695, %v2476_v39 }
 0x5d3   : > { %v2483_v25 = vmul.f32 1.442695, %v2475_v47 }
 0x5d4   : > { %7290 = vpow2.f32 %v2485_v33 }
 0x5d5   : > { %7292 = vpow2.f32 %v2483_v25 }
 0x5d6   : > { %7294 = vpow2.f32 %v2489_v38 }
 0x5d7   : > { %7296 = vpow2.f32 %v2487_v54 }
 0x5db   : > { %v2474_v45 = vpop.xlane.xlu1 %2473 }
 0x5dc   : > { %v2482_v55 = vsub.f32 %v2448_v5, %v2474_v45  ;;  %v2471_v4 = vpop.xlane.xlu0 %2470 }
 0x5dd   : > { %v2481_v21 = vsub.f32 %v2443_v20, %v2471_v4 }
 0x5de   : > { %v8515_v52 = vpop.eup %7290  ;;  %v2497_v43 = vmul.f32 1.442695, %v2482_v55 }
 0x5df   : > { %v8517_v23 = vpop.eup %7292  ;;  %v2495_v37 = vmul.f32 1.442695, %v2481_v21  ;;  %v2468_v61 = vpop.xlane.xlu1 %2467  ;;  %v2502_v40 = vsel %vm1647_vm8, %v8515_v52, 0.0 }
 0x5e0   : > { %v8521_v7 = vpop.eup %7294  ;;  %v2480_v51 = vsub.f32 %v2357_v63, %v2468_v61  ;;  %v2465_v22 = vpop.xlane.xlu0 %2464  ;;  %2503 = vadd.xlane.f32.xlu1 %v2502_v40  ;;  %v2499_v5 = vsel %vm1647_vm8, %v8517_v23, 0.0  ;;  %7298 = vpow2.f32 %v2497_v43 }
 0x5e1   : > { %v8525_v2 = vpop.eup %7296  ;;  %v2479_v20 = vsub.f32 %v2352_v13, %v2465_v22  ;;  %2500 = vadd.xlane.f32.xlu0 %v2499_v5  ;;  %7300 = vpow2.f32 %v2495_v37  ;;  %v2508_v19 = vsel %vm1647_vm8, %v8521_v7, 0.0 }
 0x5e2   : > { %v2493_v46 = vmul.f32 1.442695, %v2480_v51  ;;  %v2505_v63 = vsel %vm1647_vm8, %v8525_v2, 0.0 }
 0x5e3   : > { %v2491_v59 = vmul.f32 1.442695, %v2479_v20  ;;  %v1713_v14 = vpop.xlane.xlu1 %1712 }
 0x5e4   : > { %7302 = vpow2.f32 %v2493_v46  ;;  %v1710_v57 = vpop.xlane.xlu0 %1709  ;;  %2509 = vadd.xlane.f32.xlu1 %v2508_v19 }
 0x5e5   : > { %7304 = vpow2.f32 %v2491_v59  ;;  %2506 = vadd.xlane.f32.xlu0 %v2505_v63 }
 0x5e6   : > { %7306 = vrcp.f32 %v1713_v14 }
 0x5e7   : > { %7308 = vrcp.f32 %v1710_v57  ;;  %v7132_v13 = vpop.permute.xlu1 %7131 }
 0x5e8   : > { %v7134_v24 = vunpack.i.h.bf16 %v7132_v13  ;;  %v7133_v31 = vunpack.i.l.bf16 %v7132_v13  ;;  %v7127_v1 = vpop.permute.xlu0 %7126 }
 0x5e9   : > { %v7129_v9 = vunpack.i.h.bf16 %v7127_v1  ;;  %v7128_v32 = vunpack.i.l.bf16 %v7127_v1 }
 0x5ea   : > { %v6754_v39 = vpack.c.bf16 %v7134_v24, %v7133_v31  ;;  %v8531_v38 = vpop.eup %7298 }
 0x5eb   : > { %v7137_v50 = vpop.permute.xlu1 %7136  ;;  %v6718_v47 = vpack.c.bf16 %v7129_v9, %v7128_v32  ;;  %v8533_v45 = vpop.eup %7300  ;;  %v2520_v63 = vsel %vm1647_vm8, %v8531_v38, 0.0 }
 0x5ec   : > { %v7139_v33 = vunpack.i.h.bf16 %v7137_v50  ;;  %v7138_v54 = vunpack.i.l.bf16 %v7137_v50  ;;  %v7142_v25 = vpop.permute.xlu0 %7141  ;;  %6755 = vmatprep.subr.bf16.mxu1 %v6754_v39  ;;  %v2517_v13 = vsel %vm1647_vm8, %v8533_v45, 0.0 }
 0x5ed   : > { %v7144_v55 = vunpack.i.h.bf16 %v7142_v25  ;;  %v7143_v4 = vunpack.i.l.bf16 %v7142_v25  ;;  %6719 = vmatprep.subr.bf16.mxu0 %v6718_v47  ;;  %6757 = vmatpush3.bf16.msra.mxu1 %v6754_v39 }
 0x5ee   : > { %v8535_v21 = vpop.eup %7302  ;;  %6721 = vmatpush3.bf16.msra.mxu0 %v6718_v47  ;;  %v6750_v43 = vpack.c.bf16 %v7139_v33, %v7138_v54 }
 0x5ef   : > { %v8537_v37 = vpop.eup %7304  ;;  %v8539_v61 = vpack.c.bf16 %v7144_v55, %v7143_v4  ;;  %v7147_v40 = vpop.permute.xlu1 %7146  ;;  %v2514_v51 = vsel %vm1647_vm8, %v8535_v21, 0.0 }
 0x5f0   : > { %v7307_v22 = vpop.eup %7306  ;;  %v7149_v5 = vunpack.i.h.bf16 %v7147_v40  ;;  %v7148_v20 = vunpack.i.l.bf16 %v7147_v40  ;;  %2515 = vadd.xlane.f32.xlu1 %v2514_v51  ;;  %6751 = vmatprep.subr.bf16.mxu0 %v6750_v43  ;;  %v2511_v46 = vsel %vm1647_vm8, %v8537_v37, 0.0 }
 0x5f1   : > { %v7309_v59 = vpop.eup %7308  ;;  %2512 = vadd.xlane.f32.xlu0 %v2511_v46  ;;  %6763 = vmatprep.subr.bf16.mxu1 %v8539_v61  ;;  %v1733_v57 = vmul.f32 %v7307_v22, %v8496_v62 }
 0x5f2   : > { %v1732_v14 = vmul.f32 %v7309_v59, %v8499_v0  ;;  %v6758_v19 = vpack.c.bf16 %v7149_v5, %v7148_v20  ;;  %v7152_v0 = vpop.permute.xlu0 %7151 }
 0x5f3   : > { %v7157_v62 = vpop.permute.xlu1 %7156  ;;  %v7154_v4 = vunpack.i.h.bf16 %v7152_v0 }
 0x5f4   : > { %6460 = vmatprep.mubr.msk.f32.mxu0 %vm1647_vm8, %v1732_v14  ;;  %2521 = vadd.xlane.f32.xlu1 %v2520_v63  ;;  %v7159_v50 = vunpack.i.h.bf16 %v7157_v62  ;;  %v7158_v47 = vunpack.i.l.bf16 %v7157_v62 }
 0x5f5   : > { %6461 = vmatmul.mubr.msk.f32.vlgmr.msra.gmra.mrb[18].mxu0 %vm1647_vm8, %v1733_v57  ;;  %2518 = vadd.xlane.f32.xlu0 %v2517_v13 }
 0x5f6   : > { %6753 = vmatpush3.bf16.msra.mxu0 %v6750_v43  ;;  %v7153_v43 = vunpack.i.l.bf16 %v7152_v0  ;;  %v6766_v40 = vpack.c.bf16 %v7159_v50, %v7158_v47 }
 0x5f7   : > { %6759 = vmatprep.subr.bf16.mxu0 %v6758_v19 }
 0x605   : > { %7161 = vrot.lane.b32.xlu1 %v8228_v44, %s7628_s9 }
 0x609   : > { %2890 = vrot.lane.b32.xlu1 %v8202_v42, %s7629_s21 }
 0x60b   : > { %2981 = vrot.lane.b32.xlu0 %v8298_v36, %s7629_s21 }
 0x60d   : > { %2892 = vrot.lane.b32.xlu1 %v8291_v29, %s7629_s21 }
 0x60f   : > { %2983 = vrot.lane.b32.xlu0 %v8319_v58, %s7629_s21 }
 0x611   : > { %3165 = vrot.lane.b32.xlu1 %v8340_v8, %s7629_s21 }
 0x613   : > { %7166 = vrot.lane.b32.xlu0 %v8239_v3, %s7628_s9  ;;  %s7636_s9 = smov 24  }
 0x615   : > { %3074 = vrot.lane.b32.xlu1 %v8413_v60, %s7629_s21 }
 0x617   : > { %3163 = vrot.lane.b32.xlu0 %v8331_v35, %s7629_s21 }
 0x619   : > { %7171 = vrot.lane.b32.xlu1 %v8196_v48, %s7630_s25 }
 0x61b   : > { %3072 = vrot.lane.b32.xlu0 %v8324_v12, %s7629_s21 }
 0x61d   : > { %7181 = vrot.lane.b32.xlu1 %v8228_v44, %s7630_s25 }
 0x61f   : > { %7176 = vrot.lane.b32.xlu0 %v8205_v53, %s7630_s25 }
 0x621   : > { %7186 = vrot.lane.b32.xlu1 %v8239_v3, %s7630_s25 }
 0x66d   : > { %v2504_v24 = vpop.xlane.xlu1 %2503 }
 0x66e   : > { %7310 = vrcp.f32 %v2504_v24  ;;  %v2501_v31 = vpop.xlane.xlu0 %2500 }
 0x66f   : > { %7312 = vrcp.f32 %v2501_v31 }
 0x671   : > { %v2510_v1 = vpop.xlane.xlu1 %2509 }
 0x672   : > { %7314 = vrcp.f32 %v2510_v1  ;;  %v2507_v9 = vpop.xlane.xlu0 %2506 }
 0x673   : > { %7316 = vrcp.f32 %v2507_v9 }
 0x678   : > { %v7311_v32 = vpop.eup %7310 }
 0x679   : > { %v7313_v39 = vpop.eup %7312  ;;  %v2532_v54 = vmul.f32 %v7311_v32, %v8515_v52  ;;  %v6772_v52 = vpack.c.bf16 %v7154_v4, %v7153_v43 }
 0x67a   : > { %v2531_v33 = vmul.f32 %v7313_v39, %v8517_v23 }
 0x67c   : > { %v7315_v25 = vpop.eup %7314  ;;  %6502 = vmatprep.mubr.msk.f32.mxu0 %vm1647_vm8, %v2531_v33 }
 0x67d   : > { %v7317_v55 = vpop.eup %7316  ;;  %v2516_v51 = vpop.xlane.xlu1 %2515  ;;  %6503 = vmatmul.mubr.msk.f32.vlgmr.msra.gmra.mrb[20].mxu0 %vm1647_vm8, %v2532_v54  ;;  %v2534_v20 = vmul.f32 %v7315_v25, %v8521_v7 }
 0x67e   : > { %7318 = vrcp.f32 %v2516_v51  ;;  %6761 = vmatpush3.bf16.msra.mxu0 %v6758_v19  ;;  %v2513_v22 = vpop.xlane.xlu0 %2512  ;;  %v2533_v5 = vmul.f32 %v7317_v55, %v8525_v2 }
 0x67f   : > { %7320 = vrcp.f32 %v2513_v22  ;;  %6768 = vmatprep.subr.msk.bf16.mxu0 %vm8265_vm7, %v6766_v40 }
 0x680   : > { %6509 = vmatprep.mubr.msk.f32.mxu1 %vm1647_vm8, %v2533_v5 }
 0x681   : > { %v2522_v23 = vpop.xlane.xlu1 %2521  ;;  %6510 = vmatmul.mubr.msk.f32.vlgmr.msra.gmra.mrb[36].mxu1 %vm1647_vm8, %v2534_v20 }
 0x682   : > { %7322 = vrcp.f32 %v2522_v23  ;;  %6765 = vmatpush3.bf16.msra.mxu1 %v8539_v61  ;;  %v2519_v46 = vpop.xlane.xlu0 %2518 }
 0x683   : > { %7324 = vrcp.f32 %v2519_v46  ;;  %6774 = vmatprep.subr.msk.bf16.mxu1 %vm8265_vm7, %v6772_v52 }
 0x685   : > { %v7162_v2 = vpop.permute.xlu1 %7161 }
 0x686   : > { %v2982_v7 = vpop.permute.xlu0 %2981  ;;  %v7164_v61 = vunpack.i.h.bf16 %v7162_v2  ;;  %v7163_v24 = vunpack.i.l.bf16 %v7162_v2 }
 0x688   : > { %v7319_v59 = vpop.eup %7318  ;;  %v6784_v39 = vpack.c.bf16 %v7164_v61, %v7163_v24 }
 0x689   : > { %v7321_v14 = vpop.eup %7320  ;;  %v2891_v19 = vpop.permute.xlu1 %2890  ;;  %v2536_v13 = vmul.f32 %v7319_v59, %v8535_v21 }
 0x68a   : > { %v2984_v57 = vpop.permute.xlu0 %2983  ;;  %v2535_v63 = vmul.f32 %v7321_v14, %v8537_v37 }
 0x68c   : > { %v7323_v62 = vpop.eup %7322  ;;  %6516 = vmatprep.mubr.msk.f32.mxu0 %vm1647_vm8, %v2535_v63 }
 0x68d   : > { %v7325_v0 = vpop.eup %7324  ;;  %v2893_v31 = vpop.permute.xlu1 %2892  ;;  %6517 = vmatmul.mubr.msk.f32.vlgmr.msra.gmra.mrb[22].mxu0 %vm1647_vm8, %v2536_v13  ;;  %v2538_v37 = vmul.f32 %v7323_v62, %v8531_v38 }
 0x68e   : > { %6771 = vmatpush3.bf16.xpose.msk.msra.mxu0 %vm8265_vm7, %v6766_v40  ;;  %v7167_v1 = vpop.permute.xlu0 %7166  ;;  %6530 = vmatprep.mubr.msk.f32.mxu0 %vm1288_vm6, %v2891_v19  ;;  %v2537_v9 = vmul.f32 %v7325_v0, %v8533_v45 }
 0x68f   : > { %v7169_v21 = vunpack.i.h.bf16 %v7167_v1  ;;  %v7168_v32 = vunpack.i.l.bf16 %v7167_v1  ;;  %v6105_v1 = vld [vmem:[%s9856_s4 + $0x28] sm:$0xff] }
 0x690   : > { %6523 = vmatprep.mubr.msk.f32.mxu1 %vm1647_vm8, %v2537_v9 }
 0x691   : > { %v6778_v50 = vpack.c.bf16 %v7169_v21, %v7168_v32  ;;  %v3166_v47 = vpop.permute.xlu1 %3165  ;;  %6524 = vmatmul.mubr.msk.f32.vlgmr.msra.gmra.mrb[38].mxu1 %vm1647_vm8, %v2538_v37  ;;  %v6104_v37 = vld [vmem:[%s9856_s4 + $0x20] sm:$0xff] }
 0x692   : > { %6777 = vmatpush3.bf16.xpose.msk.msra.mxu1 %vm8265_vm7, %v6772_v52  ;;  %v3164_v33 = vpop.permute.xlu0 %3163  ;;  %6537 = vmatprep.mubr.msk.f32.mxu1 %vm1288_vm6, %v2982_v7 }
 0x693   : > { %6786 = vmatprep.subr.msk.bf16.mxu1 %vm8265_vm7, %v6784_v39  ;;  %6780 = vmatprep.subr.msk.bf16.mxu0 %vm8265_vm7, %v6778_v50 }
 0x695   : > { %6531 = vmatmul.mubr.msk.f32.vlgmr.msra.gmra.mrb[24].mxu0 %vm1288_vm6, %v2893_v31  ;;  %v3075_v38 = vpop.permute.xlu1 %3074 }
 0x696   : > { %6783 = vmatpush3.bf16.xpose.msk.msra.mxu0 %vm8265_vm7, %v6778_v50  ;;  %v3073_v45 = vpop.permute.xlu0 %3072 }
 0x697   : > { %6544 = vmatprep.mubr.msk.f32.mxu0 %vm1288_vm6, %v3073_v45 }
 0x699   : > { %6538 = vmatmul.mubr.msk.f32.vlgmr.msra.gmra.mrb[40].mxu1 %vm1288_vm6, %v2984_v57  ;;  %v7172_v54 = vpop.permute.xlu1 %7171 }
 0x69a   : > { %v7174_v25 = vunpack.i.h.bf16 %v7172_v54  ;;  %v7173_v55 = vunpack.i.l.bf16 %v7172_v54  ;;  %6789 = vmatpush3.bf16.xpose.msk.msra.mxu1 %vm8265_vm7, %v6784_v39  ;;  %6551 = vmatprep.mubr.msk.f32.mxu1 %vm1288_vm6, %v3164_v33  ;;  %v7177_v4 = vpop.permute.xlu0 %7176 }
 0x69b   : > { %v7179_v43 = vunpack.i.h.bf16 %v7177_v4  ;;  %v7178_v40 = vunpack.i.l.bf16 %v7177_v4 }
 0x69c   : > { %v6794_v51 = vpack.c.bf16 %v7174_v25, %v7173_v55 }
 0x69d   : > { %v6790_v22 = vpack.c.bf16 %v7179_v43, %v7178_v40  ;;  %6545 = vmatmul.mubr.msk.f32.vlgmr.msra.gmra.mrb[26].mxu0 %vm1288_vm6, %v3075_v38  ;;  %v7182_v5 = vpop.permute.xlu1 %7181 }
 0x69e   : > { %v7184_v20 = vunpack.i.h.bf16 %v7182_v5  ;;  %v7183_v52 = vunpack.i.l.bf16 %v7182_v5  ;;  %6795 = vmatprep.subr.bf16.mxu1 %v6794_v51 }
 0x69f   : > { %6791 = vmatprep.subr.bf16.mxu0 %v6790_v22 }
 0x6a0   : > { %v8610_v23 = vpack.c.bf16 %v7184_v20, %v7183_v52  ;;  %6793 = vmatpush3.bf16.msra.mxu0 %v6790_v22 }
 0x6a1   : > { %6552 = vmatmul.mubr.msk.f32.vlgmr.msra.gmra.mrb[42].mxu1 %vm1288_vm6, %v3166_v47  ;;  %v7187_v46 = vpop.permute.xlu1 %7186 }
 0x6a2   : > { %v7189_v2 = vunpack.i.h.bf16 %v7187_v46  ;;  %v7188_v7 = vunpack.i.l.bf16 %v7187_v46  ;;  %6797 = vmatpush3.bf16.msra.mxu1 %v6794_v51 }
 0x6a3   : > { %6803 = vmatprep.subr.bf16.mxu1 %v8610_v23 }
 0x6a4   : > { %v8614_v59 = vpack.c.bf16 %v7189_v2, %v7188_v7 }
 0x6a6   : > { %6799 = vmatprep.subr.bf16.mxu0 %v8614_v59 }
 0x6c8   : > { %v8617_v14 = vpop.f32.mrb[18].mxu0 }
 0x6c9   : > { %v8619_v19 = vpop.f32.mrb[19].mxu0 }
 0x750   : > { %v8621_v57 = vpop.f32.mrb[20].mxu0 }
 0x751   : > { %v8623_v63 = vpop.f32.mrb[21].mxu0 }
 0x754   : > { %v8625_v13 = vpop.f32.mrb[36].mxu1 }
 0x755   : > { %v8627_v62 = vpop.f32.mrb[37].mxu1 }
 0x760   : > { %v8629_v0 = vpop.f32.mrb[22].mxu0 }
 0x761   : > { %v8631_v61 = vpop.f32.mrb[23].mxu0 }
 0x764   : > { %v8633_v24 = vpop.f32.mrb[38].mxu1 }
 0x765   : > { %v8635_v31 = vpop.f32.mrb[39].mxu1 }
 0x768   : > { %v6532_v9 = vpop.f32.mrb[24].mxu0 }
 0x769   : > { %v2978_v21 = vadd.f32 %v6532_v9, %v6105_v1  ;;  %v2972_v32 = vpop.f32.mrb[25].mxu0 }
 0x76a   : > { %v2973_v39 = vadd.f32 %v6104_v37, %v2972_v32 }
 0x76b   : > { %v3257_v50 = vsel %vm1647_vm8, %v2978_v21, -inf }
 0x76c   : > { %3258 = vmax.xlane.f32.xlu0 %v3257_v50  ;;  %v6539_v47 = vpop.f32.mrb[40].mxu1  ;;  %v3254_v45 = vsel %vm1647_vm8, %v2973_v39, -inf }
 0x76d   : > { %v3069_v33 = vadd.f32 %v6539_v47, %v6105_v1  ;;  %v3063_v38 = vpop.f32.mrb[41].mxu1 }
 0x76e   : > { %v3064_v40 = vadd.f32 %v6104_v37, %v3063_v38 }
 0x76f   : > { %v3263_v54 = vsel %vm1647_vm8, %v3069_v33, -inf }
 0x770   : > { %v6546_v25 = vpop.f32.mrb[26].mxu0  ;;  %3255 = vmax.xlane.f32.xlu0 %v3254_v45  ;;  %3264 = vmax.xlane.f32.xlu1 %v3263_v54  ;;  %v3260_v2 = vsel %vm1647_vm8, %v3064_v40, -inf }
 0x771   : > { %v3160_v55 = vadd.f32 %v6546_v25, %v6105_v1  ;;  %v3154_v4 = vpop.f32.mrb[27].mxu0 }
 0x772   : > { %v3155_v43 = vadd.f32 %v6104_v37, %v3154_v4 }
 0x773   : > { %v3269_v51 = vsel %vm1647_vm8, %v3160_v55, -inf }
 0x774   : > { %3270 = vmax.xlane.f32.xlu0 %v3269_v51  ;;  %v6553_v22 = vpop.f32.mrb[42].mxu1  ;;  %v3266_v5 = vsel %vm1647_vm8, %v3155_v43, -inf }
 0x775   : > { %3267 = vmax.xlane.f32.xlu1 %v3266_v5  ;;  %v3245_v20 = vpop.f32.mrb[43].mxu1  ;;  %v3251_v46 = vadd.f32 %v6553_v22, %v6105_v1 }
 0x776   : > { %v3246_v52 = vadd.f32 %v6104_v37, %v3245_v20 }
 0x777   : > { %v3275_v9 = vsel %vm1647_vm8, %v3251_v46, -inf }
 0x778   : > { %3261 = vmax.xlane.f32.xlu0 %v3260_v2  ;;  %v3272_v7 = vsel %vm1647_vm8, %v3246_v52, -inf }
 0x779   : > { %3273 = vmax.xlane.f32.xlu1 %v3272_v7 }
 0x77c   : > { %3276 = vmax.xlane.f32.xlu0 %v3275_v9 }
 0x78a   : > { %7196 = vrot.lane.b32.xlu1 %v8205_v53, %s7631_s27 }
 0x792   : > { %7191 = vrot.lane.b32.xlu0 %v8196_v48, %s7631_s27 }
 0x7f9   : > { %v3259_v32 = vpop.xlane.xlu0 %3258 }
 0x7fa   : > { %v3279_v50 = vsub.f32 %v2978_v21, %v3259_v32 }
 0x7fc   : > { %v3288_v37 = vmul.f32 1.442695, %v3279_v50 }
 0x7fd   : > { %v3256_v1 = vpop.xlane.xlu0 %3255  ;;  %v3265_v47 = vpop.xlane.xlu1 %3264 }
 0x7fe   : > { %7326 = vpow2.f32 %v3288_v37  ;;  %v3278_v38 = vsub.f32 %v2973_v39, %v3256_v1  ;;  %v3281_v45 = vsub.f32 %v3069_v33, %v3265_v47 }
 0x800   : > { %v3286_v54 = vmul.f32 1.442695, %v3278_v38  ;;  %v3292_v25 = vmul.f32 1.442695, %v3281_v45 }
 0x801   : > { %v3271_v33 = vpop.xlane.xlu0 %3270 }
 0x802   : > { %7328 = vpow2.f32 %v3286_v54  ;;  %v3268_v2 = vpop.xlane.xlu1 %3267  ;;  %v3283_v9 = vsub.f32 %v3160_v55, %v3271_v33 }
 0x803   : > { %7330 = vpow2.f32 %v3292_v25  ;;  %v3282_v50 = vsub.f32 %v3155_v43, %v3268_v2 }
 0x804   : > { %v3296_v1 = vmul.f32 1.442695, %v3283_v9 }
 0x805   : > { %v3262_v20 = vpop.xlane.xlu0 %3261  ;;  %v3294_v45 = vmul.f32 1.442695, %v3282_v50 }
 0x806   : > { %v3280_v7 = vsub.f32 %v3064_v40, %v3262_v20  ;;  %v3274_v47 = vpop.xlane.xlu1 %3273 }
 0x807   : > { %v3284_v54 = vsub.f32 %v3246_v52, %v3274_v47 }
 0x808   : > { %v8655_v4 = vpop.eup %7326  ;;  %v3290_v37 = vmul.f32 1.442695, %v3280_v7 }
 0x809   : > { %v3305_v51 = vsel %vm1647_vm8, %v8655_v4, 0.0  ;;  %v3277_v32 = vpop.xlane.xlu0 %3276 }
 0x80a   : > { %3306 = vadd.xlane.f32.xlu0 %v3305_v51  ;;  %v3285_v38 = vsub.f32 %v3251_v46, %v3277_v32  ;;  %7332 = vpow2.f32 %v3290_v37  ;;  %v7197_v2 = vpop.permute.xlu1 %7196 }
 0x80b   : > { %7334 = vpow2.f32 %v3296_v1  ;;  %v7199_v32 = vunpack.i.h.bf16 %v7197_v2  ;;  %v7198_v50 = vunpack.i.l.bf16 %v7197_v2 }
 0x80c   : > { %v7329_v22 = vpop.eup %7328  ;;  %v3300_v25 = vmul.f32 1.442695, %v3285_v38  ;;  %7336 = vpow2.f32 %v3294_v45 }
 0x80d   : > { %v8659_v5 = vpop.eup %7330  ;;  %v3302_v21 = vsel %vm1647_vm8, %v7329_v22, 0.0 }
 0x80e   : > { %3303 = vadd.xlane.f32.xlu1 %v3302_v21  ;;  %v3311_v39 = vsel %vm1647_vm8, %v8659_v5, 0.0  ;;  %7338 = vpow2.f32 %v3300_v25 }
 0x80f   : > { %3312 = vadd.xlane.f32.xlu0 %v3311_v39 }
 0x814   : > { %v7333_v51 = vpop.eup %7332 }
 0x815   : > { %v8668_v21 = vpop.eup %7334  ;;  %v3308_v55 = vsel %vm1647_vm8, %v7333_v51, 0.0 }
 0x816   : > { %v8671_v40 = vpop.eup %7336  ;;  %v3317_v43 = vsel %vm1647_vm8, %v8668_v21, 0.0 }
 0x817   : > { %v3314_v52 = vsel %vm1647_vm8, %v8671_v40, 0.0 }
 0x818   : > { %v8675_v46 = vpop.eup %7338 }
 0x819   : > { %v3323_v33 = vsel %vm1647_vm8, %v8675_v46, 0.0 }
 0x81f   : > { %3784 = vrot.lane.b32.xlu1 %v8298_v36, %s7632_s18  ;;  %v3298_v36 = vmul.f32 1.442695, %v3284_v54 }
 0x821   : > { %7340 = vpow2.f32 %v3298_v36 }
 0x825   : > { %7201 = vrot.lane.b32.xlu0 %v8228_v44, %s7631_s27 }
 0x82b   : > { %v8679_v39 = vpop.eup %7340 }
 0x82c   : > { %v3320_v20 = vsel %vm1647_vm8, %v8679_v39, 0.0 }
 0x843   : > { %3309 = vadd.xlane.f32.xlu1 %v3308_v55 }
 0x844   : > { %3318 = vadd.xlane.f32.xlu0 %v3317_v43 }
 0x847   : > { %3315 = vadd.xlane.f32.xlu1 %v3314_v52 }
 0x848   : > { %3324 = vadd.xlane.f32.xlu0 %v3323_v33 }
 0x84b   : > { %3321 = vadd.xlane.f32.xlu1 %v3320_v20 }
 0x85c   : > { %3786 = vrot.lane.b32.xlu1 %v8319_v58, %s7632_s18  ;;  %v7192_v58 = vpop.permute.xlu0 %7191 }
 0x85d   : > { %v7194_v36 = vunpack.i.h.bf16 %v7192_v58  ;;  %v7193_v55 = vunpack.i.l.bf16 %v7192_v58 }
 0x85e   : > { %7206 = vrot.lane.b32.xlu0 %v8239_v3, %s7631_s27  ;;  %s7637_s27 = smov [#allocation11]  }
 0x85f   : > { %v6812_v2 = vpack.c.bf16 %v7194_v36, %v7193_v55 }
 0x860   : > { %3695 = vrot.lane.b32.xlu1 %v8291_v29, %s7632_s18 }
 0x862   : > { %3693 = vrot.lane.b32.xlu0 %v8202_v42, %s7632_s18 }
 0x864   : > { %3968 = vrot.lane.b32.xlu1 %v8340_v8, %s7632_s18 }
 0x866   : > { %3966 = vrot.lane.b32.xlu0 %v8331_v35, %s7632_s18  ;;  %v6806_v35 = vpack.c.bf16 %v7199_v32, %v7198_v50 }
 0x868   : > { %3877 = vrot.lane.b32.xlu1 %v8413_v60, %s7632_s18 }
 0x86a   : > { %3875 = vrot.lane.b32.xlu0 %v8324_v12, %s7632_s18  ;;  %s7542_s18 = sshll.u32 %s7637_s27, 4  ;;  %s7543_s18 = int_to_ptr.vmem [resolvable:$false] %s7542_s18 }
 0x897   : > { %v3307_v7 = vpop.xlane.xlu0 %3306 }
 0x898   : > { %7342 = vrcp.f32 %v3307_v7 }
 0x89b   : > { %v3304_v29 = vpop.xlane.xlu1 %3303 }
 0x89c   : > { %7344 = vrcp.f32 %v3304_v29  ;;  %v3313_v12 = vpop.xlane.xlu0 %3312 }
 0x89d   : > { %7346 = vrcp.f32 %v3313_v12 }
 0x89f   : > { %v3785_v60 = vpop.permute.xlu1 %3784 }
 0x8a0   : > { %v7202_v1 = vpop.permute.xlu0 %7201 }
 0x8a2   : > { %v7343_v9 = vpop.eup %7342 }
 0x8a3   : > { %v3335_v37 = vmul.f32 %v7343_v9, %v8655_v4 }
 0x8a6   : > { %v7345_v42 = vpop.eup %7344 }
 0x8a7   : > { %v3334_v8 = vmul.f32 %v7345_v42, %v7329_v22  ;;  %v7347_v25 = vpop.eup %7346 }
 0x8a8   : > { %v3337_v52 = vmul.f32 %v7347_v25, %v8659_v5  ;;  %v6131_v25 = vld [vmem:[%s9856_s4 + $0x38] sm:$0xff] }
 0x8a9   : > { %6558 = vmatprep.mubr.msk.f32.mxu0 %vm1647_vm8, %v3334_v8  ;;  %v7204_v8 = vunpack.i.h.bf16 %v7202_v1 }
 0x8aa   : > { %6559 = vmatmul.mubr.msk.f32.vlgmr.msra.gmra.mrb[28].mxu0 %vm1647_vm8, %v3335_v37  ;;  %v7203_v37 = vunpack.i.l.bf16 %v7202_v1 }
 0x8ab   : > { %6801 = vmatpush3.bf16.msra.mxu0 %v8614_v59 }
 0x8ac   : > { %6808 = vmatprep.subr.msk.bf16.mxu0 %vm8265_vm7, %v6806_v35 }
 0x8d0   : > { %v3310_v47 = vpop.xlane.xlu1 %3309 }
 0x8d1   : > { %7348 = vrcp.f32 %v3310_v47  ;;  %v3319_v38 = vpop.xlane.xlu0 %3318  ;;  %v6824_v47 = vpack.c.bf16 %v7204_v8, %v7203_v37 }
 0x8d2   : > { %7350 = vrcp.f32 %v3319_v38 }
 0x8d4   : > { %v3316_v22 = vpop.xlane.xlu1 %3315 }
 0x8d5   : > { %7352 = vrcp.f32 %v3316_v22  ;;  %v3325_v4 = vpop.xlane.xlu0 %3324 }
 0x8d6   : > { %7354 = vrcp.f32 %v3325_v4 }
 0x8d8   : > { %v3322_v45 = vpop.xlane.xlu1 %3321 }
 0x8d9   : > { %7356 = vrcp.f32 %v3322_v45  ;;  %v7207_v54 = vpop.permute.xlu0 %7206 }
 0x8da   : > { %v7209_v7 = vunpack.i.h.bf16 %v7207_v54  ;;  %v7208_v29 = vunpack.i.l.bf16 %v7207_v54 }
 0x8db   : > { %v7349_v59 = vpop.eup %7348 }
 0x8dc   : > { %v3336_v43 = vmul.f32 %v7349_v59, %v7333_v51  ;;  %v7351_v33 = vpop.eup %7350  ;;  %v3787_v42 = vpop.permute.xlu1 %3786  ;;  %v6818_v50 = vpack.c.bf16 %v7209_v7, %v7208_v29  ;;  %v6130_v59 = vld [vmem:[%s9856_s4 + $0x30] sm:$0xff] }
 0x8dd   : > { %v3694_v9 = vpop.permute.xlu0 %3693  ;;  %v3339_v58 = vmul.f32 %v7351_v33, %v8668_v21 }
 0x8de   : > { %6565 = vmatprep.mubr.msk.f32.mxu1 %vm1647_vm8, %v3336_v43 }
 0x8df   : > { %v7353_v20 = vpop.eup %7352  ;;  %6566 = vmatmul.mubr.msk.f32.vlgmr.msra.gmra.mrb[44].mxu1 %vm1647_vm8, %v3337_v52 }
 0x8e0   : > { %6805 = vmatpush3.bf16.msra.mxu1 %v8610_v23  ;;  %v3338_v32 = vmul.f32 %v7353_v20, %v8671_v40  ;;  %v7355_v5 = vpop.eup %7354  ;;  %v3696_v12 = vpop.permute.xlu1 %3695 }
 0x8e1   : > { %6814 = vmatprep.subr.msk.bf16.mxu1 %vm8265_vm7, %v6812_v2  ;;  %v3341_v21 = vmul.f32 %v7355_v5, %v8675_v46  ;;  %v3967_v40 = vpop.permute.xlu0 %3966 }
 0x8e2   : > { %6572 = vmatprep.mubr.msk.f32.mxu0 %vm1647_vm8, %v3338_v32 }
 0x8e3   : > { %v7357_v51 = vpop.eup %7356  ;;  %6573 = vmatmul.mubr.msk.f32.vlgmr.msra.gmra.mrb[30].mxu0 %vm1647_vm8, %v3339_v58 }
 0x8e4   : > { %6811 = vmatpush3.bf16.xpose.msk.msra.mxu0 %vm8265_vm7, %v6806_v35  ;;  %6586 = vmatprep.mubr.msk.f32.mxu0 %vm1288_vm6, %v3694_v9  ;;  %v3340_v23 = vmul.f32 %v7357_v51, %v8679_v39  ;;  %v3969_v46 = vpop.permute.xlu1 %3968 }
 0x8e5   : > { %6820 = vmatprep.subr.msk.bf16.mxu0 %vm8265_vm7, %v6818_v50  ;;  %v3876_v39 = vpop.permute.xlu0 %3875 }
 0x8e6   : > { %6579 = vmatprep.mubr.msk.f32.mxu1 %vm1647_vm8, %v3340_v23 }
 0x8e7   : > { %6580 = vmatmul.mubr.msk.f32.vlgmr.msra.gmra.mrb[46].mxu1 %vm1647_vm8, %v3341_v21 }
 0x8e8   : > { %6593 = vmatprep.mubr.msk.f32.mxu1 %vm1288_vm6, %v3785_v60  ;;  %v3878_v35 = vpop.permute.xlu1 %3877 }
 0x8e9   : > { %6817 = vmatpush3.bf16.xpose.msk.msra.mxu1 %vm8265_vm7, %v6812_v2 }
 0x8ea   : > { %6826 = vmatprep.subr.msk.bf16.mxu1 %vm8265_vm7, %v6824_v47 }
 0x8eb   : > { %6587 = vmatmul.mubr.msk.f32.vlgmr.msra.gmra.mrb[32].mxu0 %vm1288_vm6, %v3696_v12 }
 0x8ec   : > { %6823 = vmatpush3.bf16.xpose.msk.msra.mxu0 %vm8265_vm7, %v6818_v50  ;;  %6600 = vmatprep.mubr.msk.f32.mxu0 %vm1288_vm6, %v3876_v39 }
 0x8f0   : > { %6594 = vmatmul.mubr.msk.f32.vlgmr.msra.gmra.mrb[48].mxu1 %vm1288_vm6, %v3787_v42 }
 0x8f1   : > { %6829 = vmatpush3.bf16.xpose.msk.msra.mxu1 %vm8265_vm7, %v6824_v47  ;;  %6607 = vmatprep.mubr.msk.f32.mxu1 %vm1288_vm6, %v3967_v40 }
 0x8f3   : > { %6601 = vmatmul.mubr.msk.f32.vlgmr.msra.gmra.mrb[34].mxu0 %vm1288_vm6, %v3878_v35 }
 0x8f8   : > { %6608 = vmatmul.mubr.msk.f32.vlgmr.msra.gmra.mrb[50].mxu1 %vm1288_vm6, %v3969_v46 }
 0x97d   : > { %v8741_v60 = vpop.f32.mrb[28].mxu0 }
 0x97e   : > { %v8743_v1 = vpop.f32.mrb[29].mxu0 }
 0x9b2   : > { %v8745_v38 = vpop.f32.mrb[44].mxu1 }
 0x9b3   : > { %v8747_v22 = vpop.f32.mrb[45].mxu1 }
 0x9b6   : > { %v8749_v4 = vpop.f32.mrb[30].mxu0 }
 0x9b7   : > { %v8751_v45 = vpop.f32.mrb[31].mxu0 }
 0x9ba   : > { %v8753_v16 = vpop.f32.mrb[46].mxu1 }
 0x9bb   : > { %v8755_v54 = vpop.f32.mrb[47].mxu1 }
 0x9be   : > { %v6588_v36 = vpop.f32.mrb[32].mxu0 }
 0x9bf   : > { %v3781_v55 = vadd.f32 %v6588_v36, %v6131_v25  ;;  %v3775_v43 = vpop.f32.mrb[33].mxu0 }
 0x9c0   : > { %v3776_v52 = vadd.f32 %v6130_v59, %v3775_v43 }
 0x9c1   : > { %v4060_v33 = vsel %vm1647_vm8, %v3781_v55, -inf }
 0x9c2   : > { %4061 = vmax.xlane.f32.xlu0 %v4060_v33  ;;  %v4057_v20 = vsel %vm1647_vm8, %v3776_v52, -inf }
 0x9c3   : > { %4058 = vmax.xlane.f32.xlu1 %v4057_v20  ;;  %v6595_v2 = vpop.f32.mrb[48].mxu1 }
 0x9c4   : > { %v3872_v7 = vadd.f32 %v6595_v2, %v6131_v25  ;;  %v3866_v29 = vpop.f32.mrb[49].mxu1 }
 0x9c5   : > { %v3867_v9 = vadd.f32 %v6130_v59, %v3866_v29 }
 0x9c6   : > { %v6602_v42 = vpop.f32.mrb[34].mxu0  ;;  %v4066_v32 = vsel %vm1647_vm8, %v3872_v7, -inf }
 0x9c7   : > { %v3957_v58 = vpop.f32.mrb[35].mxu0  ;;  %4067 = vmax.xlane.f32.xlu0 %v4066_v32  ;;  %v4063_v50 = vsel %vm1647_vm8, %v3867_v9, -inf  ;;  %v3963_v40 = vadd.f32 %v6602_v42, %v6131_v25 }
 0x9c8   : > { %v3958_v5 = vadd.f32 %v6130_v59, %v3957_v58 }
 0x9c9   : > { %v4072_v39 = vsel %vm1647_vm8, %v3963_v40, -inf }
 0x9ca   : > { %v4069_v51 = vsel %vm1647_vm8, %v3958_v5, -inf }
 0x9cb   : > { %4070 = vmax.xlane.f32.xlu1 %v4069_v51  ;;  %v6609_v8 = vpop.f32.mrb[50].mxu1  ;;  %4064 = vmax.xlane.f32.xlu0 %v4063_v50 }
 0x9cc   : > { %v4054_v37 = vadd.f32 %v6609_v8, %v6131_v25  ;;  %v4048_v23 = vpop.f32.mrb[51].mxu1 }
 0x9cd   : > { %v8768_v21 = vadd.f32 %v6130_v59, %v4048_v23 }
 0x9ce   : > { %v4078_v12 = vsel %vm1647_vm8, %v4054_v37, -inf }
 0x9cf   : > { %4079 = vmax.xlane.f32.xlu0 %v4078_v12  ;;  %v4075_v47 = vsel %vm1647_vm8, %v8768_v21, -inf }
 0x9d0   : > { %4076 = vmax.xlane.f32.xlu1 %v4075_v47 }
 0x9d3   : > { %4073 = vmax.xlane.f32.xlu0 %v4072_v39 }
 0x9e1   : > { %7211 = vrot.lane.b32.xlu1 %v8196_v48, %s7633_s23 }
 0xa4f   : > { %v4062_v46 = vpop.xlane.xlu0 %4061 }
 0xa50   : > { %v4082_v35 = vsub.f32 %v3781_v55, %v4062_v46  ;;  %v4059_v36 = vpop.xlane.xlu1 %4058 }
 0xa51   : > { %v4081_v59 = vsub.f32 %v3776_v52, %v4059_v36 }
 0xa52   : > { %v4091_v43 = vmul.f32 1.442695, %v4082_v35 }
 0xa53   : > { %v4089_v25 = vmul.f32 1.442695, %v4081_v59 }
 0xa54   : > { %7358 = vpow2.f32 %v4091_v43  ;;  %v4068_v33 = vpop.xlane.xlu0 %4067 }
 0xa55   : > { %v4084_v20 = vsub.f32 %v3872_v7, %v4068_v33  ;;  %7360 = vpow2.f32 %v4089_v25 }
 0xa57   : > { %v4095_v2 = vmul.f32 1.442695, %v4084_v20 }
 0xa58   : > { %v4071_v29 = vpop.xlane.xlu1 %4070  ;;  %v4065_v42 = vpop.xlane.xlu0 %4064 }
 0xa59   : > { %7362 = vpow2.f32 %v4095_v2  ;;  %v4085_v32 = vsub.f32 %v3958_v5, %v4071_v29  ;;  %v4083_v58 = vsub.f32 %v3867_v9, %v4065_v42 }
 0xa5b   : > { %v4093_v51 = vmul.f32 1.442695, %v4083_v58  ;;  %v4097_v50 = vmul.f32 1.442695, %v4085_v32 }
 0xa5c   : > { %v4080_v8 = vpop.xlane.xlu0 %4079 }
 0xa5d   : > { %v4077_v48 = vpop.xlane.xlu1 %4076  ;;  %7364 = vpow2.f32 %v4093_v51  ;;  %v4088_v55 = vsub.f32 %v4054_v37, %v4080_v8 }
 0xa5e   : > { %v8776_v23 = vpop.eup %7358  ;;  %7366 = vpow2.f32 %v4097_v50  ;;  %v4087_v58 = vsub.f32 %v8768_v21, %v4077_v48 }
 0xa5f   : > { %v4108_v52 = vsel %vm1647_vm8, %v8776_v23, 0.0  ;;  %v8780_v12 = vpop.eup %7360  ;;  %v4103_v35 = vmul.f32 1.442695, %v4088_v55 }
 0xa60   : > { %4109 = vadd.xlane.f32.xlu0 %v4108_v52  ;;  %v4074_v7 = vpop.xlane.xlu0 %4073  ;;  %v4105_v59 = vsel %vm1647_vm8, %v8780_v12, 0.0  ;;  %v4101_v51 = vmul.f32 1.442695, %v4087_v58 }
 0xa61   : > { %v4086_v47 = vsub.f32 %v3963_v40, %v4074_v7  ;;  %v7212_v39 = vpop.permute.xlu1 %7211 }
 0xa62   : > { %v7214_v5 = vunpack.i.h.bf16 %v7212_v39  ;;  %v7213_v9 = vunpack.i.l.bf16 %v7212_v39 }
 0xa63   : > { %v8782_v46 = vpop.eup %7362  ;;  %v4099_v36 = vmul.f32 1.442695, %v4086_v47 }
 0xa64   : > { %v6834_v37 = vpack.c.bf16 %v7214_v5, %v7213_v9  ;;  %4106 = vadd.xlane.f32.xlu0 %v4105_v59  ;;  %v4114_v43 = vsel %vm1647_vm8, %v8782_v46, 0.0 }
 0xa65   : > { %7368 = vpow2.f32 %v4099_v36  ;;  %4115 = vadd.xlane.f32.xlu1 %v4114_v43 }
 0xa66   : > { %6835 = vmatprep.subr.bf16.mxu1 %v6834_v37  ;;  %7370 = vpow2.f32 %v4103_v35 }
 0xa67   : > { %6837 = vmatpush3.bf16.msra.mxu1 %v6834_v37  ;;  %v7365_v40 = vpop.eup %7364  ;;  %7372 = vpow2.f32 %v4101_v51 }
 0xa68   : > { %v4111_v25 = vsel %vm1647_vm8, %v7365_v40, 0.0  ;;  %v8789_v33 = vpop.eup %7366 }
 0xa69   : > { %4112 = vadd.xlane.f32.xlu1 %v4111_v25  ;;  %v4117_v20 = vsel %vm1647_vm8, %v8789_v33, 0.0 }
 0xa6d   : > { %4118 = vadd.xlane.f32.xlu1 %v4117_v20 }
 0xa6f   : > { %v8793_v2 = vpop.eup %7368 }
 0xa70   : > { %v4120_v29 = vsel %vm1647_vm8, %v8793_v2, 0.0  ;;  %v8797_v42 = vpop.eup %7370 }
 0xa71   : > { %4121 = vadd.xlane.f32.xlu0 %v4120_v29  ;;  %v4126_v32 = vsel %vm1647_vm8, %v8797_v42, 0.0 }
 0xa75   : > { %4127 = vadd.xlane.f32.xlu0 %v4126_v32 }
 0xa7e   : > { %7221 = vrot.lane.b32.xlu1 %v8228_v44, %s7633_s23  ;;  %v8814_v44 = vpop.eup %7372 }
 0xa8b   : > { %7216 = vrot.lane.b32.xlu0 %v8205_v53, %s7633_s23  ;;  %v4123_v53 = vsel %vm1647_vm8, %v8814_v44, 0.0 }
 0xa8f   : > { %4501 = vrot.lane.b32.xlu0 %v8623_v63, %s7634_s24 }
 0xa93   : > { %4503 = vrot.lane.b32.xlu0 %v8621_v57, %s7634_s24 }
 0xa97   : > { %4533 = vrot.lane.b32.xlu0 %v8743_v1, %s7635_s8 }
 0xa9b   : > { %4535 = vrot.lane.b32.xlu0 %v8741_v60, %s7635_s8 }
 0xa9f   : > { %4513 = vrot.lane.b32.xlu0 %v8635_v31, %s7634_s24 }
 0xaa2   : > { %4124 = vadd.xlane.f32.xlu1 %v4123_v53 }
 0xaa3   : > { %4509 = vrot.lane.b32.xlu0 %v8631_v61, %s7634_s24 }
 0xaa7   : > { %4541 = vrot.lane.b32.xlu0 %v8751_v45, %s7635_s8 }
 0xaab   : > { %4511 = vrot.lane.b32.xlu0 %v8629_v0, %s7634_s24 }
 0xab3   : > { %7226 = vrot.lane.b32.xlu1 %v8239_v3, %s7633_s23  ;;  %s525_s23 = scalar_lea.vmem [#allocation11], %s6020_s16 }
 0xab4   : > { %s5894_s21 = sshll.u32 %s525_s23, 4  ;;  %s9804_s21 = int_to_ptr.vmem [resolvable:$true] %s5894_s21 }
 0xab5   : > { %s7538_s29 = scalar_lea.vmem %s9804_s21, 1024  ;;  %p7545_p8 = scmp.lt.s32.totalorder %s9804_s21, %s7543_s18 }
 0xab6   : > { %p7539_p2 = scmp.ne.s32.totalorder %s9804_s21, %s7538_s29 }
 0xab7   : > { %4505 = vrot.lane.b32.xlu1 %v8627_v62, %s7634_s24 }
 0xabb   : > { %4507 = vrot.lane.b32.xlu1 %v8625_v13, %s7634_s24 }
 0xabf   : > { %4537 = vrot.lane.b32.xlu1 %v8747_v22, %s7635_s8 }
 0xac3   : > { %4539 = vrot.lane.b32.xlu1 %v8745_v38, %s7635_s8 }
 0xac7   : > { %4545 = vrot.lane.b32.xlu1 %v8755_v54, %s7635_s8 }
 0xacb   : > { %4515 = vrot.lane.b32.xlu1 %v8633_v24, %s7634_s24 }
 0xaed   : > { %v4110_v57 = vpop.xlane.xlu0 %4109 }
 0xaf1   : > { %v4107_v3 = vpop.xlane.xlu0 %4106 }
 0xaf2   : > { %7374 = vrcp.f32 %v4107_v3  ;;  %v4116_v63 = vpop.xlane.xlu1 %4115  ;;  %v7250_v3 = vld [vmem:[%s9858_s6] sm:$0xff]  }
 0xaf3   : > { %7376 = vrcp.f32 %v4116_v63 }
 0xaf6   : > { %v4113_v62 = vpop.xlane.xlu1 %4112 }
 0xaf7   : > { %7378 = vrcp.f32 %v4113_v62 }
 0xaf8   : > { %7380 = vrcp.f32 %v4110_v57 }
 0xafa   : > { %v4119_v13 = vpop.xlane.xlu1 %4118 }
 0xafb   : > { %7382 = vrcp.f32 %v4119_v13 }
 0xafc   : > { %v7375_v0 = vpop.eup %7374 }
 0xafd   : > { %v4137_v61 = vmul.f32 %v7375_v0, %v8780_v12  ;;  %v7377_v22 = vpop.eup %7376 }
 0xafe   : > { %v4122_v31 = vpop.xlane.xlu0 %4121  ;;  %v7222_v60 = vpop.permute.xlu1 %7221  ;;  %v4140_v50 = vmul.f32 %v7377_v22, %v8782_v46 }
 0xaff   : > { %6614 = vmatprep.mubr.msk.f32.mxu0 %vm1647_vm8, %v4137_v61  ;;  %v7224_v1 = vunpack.i.h.bf16 %v7222_v60  ;;  %v7223_v38 = vunpack.i.l.bf16 %v7222_v60  ;;  %7384 = vrcp.f32 %v4122_v31 }
 0xb01   : > { %v7379_v24 = vpop.eup %7378  ;;  %v6842_v45 = vpack.c.bf16 %v7224_v1, %v7223_v38 }
 0xb02   : > { %v4128_v54 = vpop.xlane.xlu0 %4127  ;;  %v4139_v21 = vmul.f32 %v7379_v24, %v7365_v40  ;;  %v7381_v12 = vpop.eup %7380  ;;  %v4961_v24 = vlaneseq }
 0xb03   : > { %6843 = vmatprep.subr.bf16.mxu1 %v6842_v45  ;;  %v4138_v47 = vmul.f32 %v7381_v12, %v8776_v23  ;;  %7386 = vrcp.f32 %v4128_v54 }
 0xb04   : > { %6621 = vmatprep.mubr.msk.f32.mxu1 %vm1647_vm8, %v4139_v21 }
 0xb05   : > { %6622 = vmatmul.mubr.msk.f32.vlgmr.msra.gmra.mrb[52].mxu1 %vm1647_vm8, %v4140_v50  ;;  %v7383_v7 = vpop.eup %7382 }
 0xb06   : > { %v7217_v8 = vpop.permute.xlu0 %7216  ;;  %6845 = vmatpush3.bf16.msra.mxu1 %v6842_v45  ;;  %v4141_v39 = vmul.f32 %v7383_v7, %v8789_v33 }
 0xb07   : > { %v7219_v48 = vunpack.i.h.bf16 %v7217_v8  ;;  %v7218_v55 = vunpack.i.l.bf16 %v7217_v8 }
 0xb09   : > { %v6830_v52 = vpack.c.bf16 %v7219_v48, %v7218_v55  ;;  %v7385_v59 = vpop.eup %7384 }
 0xb0a   : > { %v4142_v23 = vmul.f32 %v7385_v59, %v8793_v2 }
 0xb0b   : > { %6831 = vmatprep.subr.bf16.mxu0 %v6830_v52 }
 0xb0c   : > { %6833 = vmatpush3.bf16.msra.mxu0 %v6830_v52 }
 0xb0d   : > { %v7387_v37 = vpop.eup %7386 }
 0xb0e   : > { %v4144_v25 = vmul.f32 %v7387_v37, %v8797_v42 }
 0xb0f   : > { %6615 = vmatmul.mubr.msk.f32.vlgmr.msra.gmra.mrb[36].mxu0 %vm1647_vm8, %v4138_v47  ;;  %v8877_v47 = vshrl.u32 %v4961_v24, 7 }
 0xb10   : > { %6628 = vmatprep.mubr.msk.f32.mxu0 %vm1647_vm8, %v4141_v39 }
 0xb2f   : > { %v4125_v5 = vpop.xlane.xlu1 %4124 }
 0xb30   : > { %7388 = vrcp.f32 %v4125_v5 }
 0xb33   : > { %v7227_v9 = vpop.permute.xlu1 %7226 }
 0xb34   : > { %v7229_v46 = vunpack.i.h.bf16 %v7227_v9  ;;  %v7228_v35 = vunpack.i.l.bf16 %v7227_v9 }
 0xb36   : > { %v6838_v36 = vpack.c.bf16 %v7229_v46, %v7228_v35 }
 0xb37   : > { %v4506_v57 = vpop.permute.xlu1 %4505 }
 0xb38   : > { %6839 = vmatprep.subr.bf16.mxu0 %v6838_v36  ;;  %v4591_v12 = vsel %vm1288_vm6, %v8477_v6, %v4506_v57 }
 0xb39   : > { %6841 = vmatpush3.bf16.msra.mxu0 %v6838_v36 }
 0xb3a   : > { %v7389_v43 = vpop.eup %7388  ;;  %6638 = vmatprep.subr.bf16.mxu0 %v7250_v3 }
 0xb3b   : > { %v4143_v40 = vmul.f32 %v7389_v43, %v8814_v44  ;;  %v4502_v44 = vpop.permute.xlu0 %4501 }
 0xb3c   : > { %6629 = vmatmul.mubr.msk.f32.vlgmr.msra.gmra.mrb[38].mxu0 %vm1647_vm8, %v4142_v23  ;;  %v4589_v45 = vsel %vm1288_vm6, %v8473_v26, %v4502_v44 }
 0xb3d   : > { %6635 = vmatprep.mubr.msk.f32.mxu1 %vm1647_vm8, %v4143_v40  ;;  %6639 = vmatpush3.bf16.msra.mxu0 %v7250_v3  ;;  %v5033_v40 = vsub.s32 1, %v8877_v47 }
 0xb3e   : > { %6636 = vmatmul.mubr.msk.f32.vlgmr.msra.gmra.mrb[54].mxu1 %vm1647_vm8, %v4144_v25  ;;  %v5053_v25 = vsub.s32 5, %v8877_v47 }
 0xb3f   : > { %v4504_v53 = vpop.permute.xlu0 %4503 }
 0xb40   : > { %v4590_v21 = vsel %vm1288_vm6, %v8471_v15, %v4504_v53 }
 0xb43   : > { %v4534_v63 = vpop.permute.xlu0 %4533 }
 0xb44   : > { %v4597_v50 = vsel %vm1647_vm8, %v4589_v45, %v4534_v63 }
 0xb47   : > { %v4536_v62 = vpop.permute.xlu0 %4535 }
 0xb48   : > { %v4598_v48 = vsel %vm1647_vm8, %v4590_v21, %v4536_v62 }
 0xb4b   : > { %v4514_v0 = vpop.permute.xlu0 %4513 }
 0xb4c   : > { %v4595_v15 = vsel %vm1288_vm6, %v8481_v17, %v4514_v0 }
 0xb4f   : > { %v4510_v31 = vpop.permute.xlu0 %4509 }
 0xb50   : > { %v4593_v55 = vsel %vm1288_vm6, %v8619_v19, %v4510_v31 }
 0xb53   : > { %v4542_v1 = vpop.permute.xlu0 %4541 }
 0xb54   : > { %v8882_v39 = vsel %vm1647_vm8, %v4593_v55, %v4542_v1 }
 0xb57   : > { %v4512_v22 = vpop.permute.xlu0 %4511 }
 0xb58   : > { %v8889_v6 = vsel %vm1288_vm6, %v8617_v14, %v4512_v22  ;;  %v4963_v14 = vsub.s32 0, %v8877_v47 }
 0xbd8   : > { %v6623_v33 = vpop.f32.mrb[52].mxu1 }
 0xbd9   : > { %v4310_v20 = vpop.f32.mrb[53].mxu1 }
 0xbe2   : > { %v6616_v29 = vpop.f32.mrb[36].mxu0 }
 0xbe3   : > { %4567 = vrot.lane.b32.xlu1 %v6616_v29, %s7636_s9  ;;  %v4223_v32 = vpop.f32.mrb[37].mxu0 }
 0xbe4   : > { %4565 = vrot.lane.b32.xlu0 %v4223_v32, %s7636_s9  ;;  %v8915_v32 = vld [vmem:[%s9857_s5] sm:$0xff] }
 0xbe5   : > { %v8927_v63 = vrot.slane %v8915_v32, %v4963_v14  ;;  %v8935_v62 = vrot.slane %v8915_v32, %v5053_v25 }
 0xbe7   : > { %4569 = vrot.lane.b32.xlu1 %v4310_v20, %s7636_s9  ;;  %9921 = vst [vmem:[#allocation26_spill] sm:$0xff] %v8935_v62 }
 0xbe8   : > { %4571 = vrot.lane.b32.xlu0 %v6623_v33, %s7636_s9 }
 0xbec   : > { %4543 = vrot.lane.b32.xlu0 %v8749_v4, %s7635_s8  ;;  %v4508_v4 = vpop.permute.xlu1 %4507 }
 0xbed   : > { %v4592_v5 = vsel %vm1288_vm6, %v8475_v49, %v4508_v4  ;;  %v8930_v4 = vrot.slane %v8915_v32, %v5033_v40 }
 0xbef   : > { %9920 = vst [vmem:[#allocation25_spill] sm:$0xff] %v8930_v4 }
 0xbf0   : > { %v4538_v13 = vpop.permute.xlu1 %4537 }
 0xbf1   : > { %v4599_v19 = vsel %vm1647_vm8, %v4591_v12, %v4538_v13 }
 0xbf4   : > { %v4540_v61 = vpop.permute.xlu1 %4539 }
 0xbf5   : > { %v4600_v46 = vsel %vm1647_vm8, %v4592_v5, %v4540_v61 }
 0xbf8   : > { %v4546_v60 = vpop.permute.xlu1 %4545 }
 0xbf9   : > { %v8893_v35 = vsel %vm1647_vm8, %v4595_v15, %v4546_v60 }
 0xbfc   : > { %v4516_v38 = vpop.permute.xlu1 %4515 }
 0xbfd   : > { %v8902_v23 = vsel %vm1288_vm6, %v8479_v10, %v4516_v38  ;;  %v8920_v10 = vld [vmem:[%s9857_s5 + $0x8] sm:$0xff] }
 0xbfe   : > { %v8938_v13 = vrot.slane %v8920_v10, %v5033_v40  ;;  %v8960_v55 = vrot.slane %v8920_v10, %v4963_v14 }
 0xc0f   : > { %v6630_v2 = vpop.f32.mrb[38].mxu0 }
 0xc10   : > { %4575 = vrot.lane.b32.xlu0 %v6630_v2, %s7636_s9  ;;  %v4397_v42 = vpop.f32.mrb[39].mxu0 }
 0xc11   : > { %v6637_v58 = vpop.f32.mrb[54].mxu1  ;;  %4573 = vrot.lane.b32.xlu1 %v4397_v42, %s7636_s9 }
 0xc12   : > { %v4484_v51 = vpop.f32.mrb[55].mxu1 }
 0xc15   : > { %4577 = vrot.lane.b32.xlu1 %v4484_v51, %s7636_s9  ;;  %v4975_v51 = vsub.s32 4, %v8877_v47 }
 0xc19   : > { %4547 = vrot.lane.b32.xlu1 %v8753_v16, %s7635_s8  ;;  %v7251_v16 = vld [vmem:[%s9858_s6 + $0x8] sm:$0xff]   ;;  %s6185_s8 = sshll.u32 %s7735_s17, 10  ;;  %s9810_s17 = scalar_lea.sflag [#allocation4], %s523_s22 }
 0xc1a   : > { %6640 = vmatprep.subr.bf16.mxu0 %v7251_v16  ;;  %s9801_s19 = scalar_lea.hbm %s9969_s26, %s6185_s8 }
 0xc1b   : > { %6641 = vmatpush3.bf16.msra.mxu0 %v7251_v16 }
 0xc1d   : > { %4579 = vrot.lane.b32.xlu1 %v6637_v58, %s7636_s9  ;;  %s9968_s9 = sld [smem:[#allocation21_spill]] }
 0xc23   : > { %p9970_p3 = scmp.ne.s32.totalorder %s9968_s9, 0 }
 0xc25   : > { %p7540_p4 = pnand %p7539_p2, %p9970_p3 }
 0xc27   : > { %p7541_p7 = pneg %p7540_p4 }
 0xc55   : > { %v4568_v54 = vpop.permute.xlu1 %4567 }
 0xc56   : > { %v4566_v8 = vpop.permute.xlu0 %4565  ;;  %v4607_v7 = vsel %vm4605_vm9, %v4598_v48, %v4568_v54  ;;  %v8957_v48 = vrot.slane %v8915_v32, %v4975_v51 }
 0xc57   : > { %v4606_v52 = vsel %vm4605_vm9, %v4597_v50, %v4566_v8  ;;  %v4627_v59 = vrot.slane %v4607_v7, 4 }
 0xc58   : > { %v4619_v26 = vrot.slane %v4606_v52, 4 }
 0xc59   : > { %v4570_v9 = vpop.permute.xlu1 %4569 }
 0xc5a   : > { %v4608_v17 = vsel %vm4605_vm9, %v4599_v19, %v4570_v9  ;;  %v4572_v36 = vpop.permute.xlu0 %4571  ;;  %v5139_v19 = vsub.s32 2, %v8877_v47  ;;  %v5159_v9 = vsub.s32 6, %v8877_v47 }
 0xc5b   : > { %v4615_v37 = vrot.slane %v4608_v17, 4  ;;  %v8897_v43 = vsel %vm1245_vm5, %v4619_v26, %v4608_v17  ;;  %v4609_v49 = vsel %vm4605_vm9, %v4600_v46, %v4572_v36  ;;  %v5408_v36 = vsub.s32 3, %v8877_v47 }
 0xc5c   : > { %v4663_v20 = vrot.slane %v8897_v43, 7  ;;  %v8910_v29 = vsel %vm1245_vm5, %v4627_v59, %v4609_v49  ;;  %v4655_v2 = vrot.slane %v8897_v43, 6  ;;  %v4623_v58 = vrot.slane %v4609_v49, 4 }
 0xc5d   : > { %v4617_v33 = vsel %vm1245_vm5, %v4606_v52, %v4615_v37  ;;  %v4745_v60 = vrot.slane %v8897_v43, 1  ;;  %v4810_v38 = vrot.slane %v8897_v43, 2  ;;  %v5428_v59 = vsub.s32 7, %v8877_v47 }
 0xc5e   : > { %v4662_v42 = vrot.slane %v4617_v33, 7  ;;  %v4654_v44 = vrot.slane %v4617_v33, 6  ;;  %v4694_v53 = vmax.f32 %v4617_v33, -1e+30  ;;  %v4695_v57 = vmax.f32 %v4617_v33, %v8897_v43 }
 0xc5f   : > { %v4703_v3 = vadd.f32 %v8897_v43, %v4617_v33  ;;  %v4679_v0 = vsel %vm594_vm2, -1e+30, %v4663_v20  ;;  %v4687_v61 = vsel %vm594_vm2, 0.0, %v4663_v20  ;;  %v4746_v16 = vrot.slane %v4655_v2, 1 }
 0xc60   : > { %v8943_v31 = vmax.f32 %v4694_v53, %v8897_v43  ;;  %v4678_v1 = vsel %vm594_vm2, -1e+30, %v4662_v42  ;;  %v4811_v22 = vrot.slane %v4655_v2, 2  ;;  %v4686_v24 = vsel %vm594_vm2, 0.0, %v4662_v42 }
 0xc61   : > { %v4743_v45 = vrot.slane %v4654_v44, 1  ;;  %v4808_v54 = vrot.slane %v4654_v44, 2  ;;  %v8950_v21 = vsel %vm1245_vm5, %v4607_v7, %v4623_v58  ;;  %v4711_v50 = vmax.f32 %v4679_v0, %v8897_v43 }
 0xc62   : > { %v4719_v8 = vadd.f32 %v4687_v61, %v8897_v43  ;;  %v4742_v52 = vrot.slane %v4617_v33, 1  ;;  %v4747_v12 = vsel %vm619_vm0, %v4745_v60, %v4746_v16  ;;  %v4807_v26 = vrot.slane %v4617_v33, 2 }
 0xc63   : > { %v4812_v15 = vsel %vm4806_vm10, %v4810_v38, %v4811_v22  ;;  %v4710_v7 = vmax.f32 %v4678_v1, %v4617_v33  ;;  %v4718_v5 = vadd.f32 %v4686_v24, %v4617_v33  ;;  %v4775_v37 = vmax.f32 %v4711_v50, %v4747_v12 }
 0xc64   : > { %v4744_v46 = vsel %vm619_vm0, %v4742_v52, %v4743_v45  ;;  %v4809_v17 = vsel %vm4806_vm10, %v4807_v26, %v4808_v54  ;;  %v4783_v49 = vadd.f32 %v4747_v12, %v4719_v8  ;;  %v4840_v14 = vsel %vm619_vm0, %v4812_v15, -1e+30 }
 0xc65   : > { %v4696_v40 = vmax.f32 %v8897_v43, %v8950_v21  ;;  %v4856_v33 = vsel %vm619_vm0, %v4812_v15, 0.0  ;;  %v4704_v2 = vadd.f32 %v8950_v21, %v8897_v43  ;;  %v8980_v42 = vadd.f32 %v8910_v29, %v8950_v21 }
 0xc66   : > { %v4774_v58 = vmax.f32 %v4710_v7, %v4744_v46  ;;  %v4782_v44 = vadd.f32 %v4744_v46, %v4718_v5  ;;  %v4665_v53 = vrot.slane %v8910_v29, 7  ;;  %v4727_v0 = vmax.f32 %v4695_v57, %v8950_v21 }
 0xc67   : > { %v4839_v61 = vsel %vm619_vm0, %v4809_v17, -1e+30  ;;  %v4855_v60 = vsel %vm619_vm0, %v4809_v17, 0.0  ;;  %v8987_v1 = vmax.f32 %v4696_v40, %v8910_v29  ;;  %v4735_v16 = vadd.f32 %v4703_v3, %v8950_v21 }
 0xc68   : > { %v4848_v43 = vmax.f32 %v4775_v37, %v4840_v14  ;;  %v4864_v38 = vadd.f32 %v4856_v33, %v4783_v49  ;;  %v4656_v22 = vrot.slane %v8950_v21, 6  ;;  %v8992_v24 = vadd.f32 %v4704_v2, %v8910_v29 }
 0xc69   : > { %v4664_v45 = vrot.slane %v8950_v21, 7  ;;  %v4790_v57 = vmax.f32 %v8943_v31, %v8950_v21  ;;  %v4791_v54 = vmax.f32 %v4727_v0, %v8910_v29  ;;  %v4799_v50 = vadd.f32 %v4735_v16, %v8910_v29 }
 0xc6a   : > { %v4657_v8 = vrot.slane %v8910_v29, 6  ;;  %v9001_v3 = vmul.f32 0.0, %v8927_v63  ;;  %v9006_v52 = vrot.slane %v8915_v32, %v5159_v9  ;;  %v9009_v12 = vrot.slane %v8920_v10, %v5139_v19 }
 0xc6b   : > { %v4847_v26 = vmax.f32 %v4774_v58, %v4839_v61  ;;  %v4681_v31 = vsel %vm594_vm2, -1e+30, %v4665_v53  ;;  %v4689_v15 = vsel %vm594_vm2, 0.0, %v4665_v53  ;;  %v9014_v7 = vrot.slane %v8915_v32, %v5139_v19 }
 0xc6c   : > { %9922 = vst [vmem:[#allocation27_spill] sm:$0xff] %v9006_v52  ;;  %v4863_v5 = vadd.f32 %v4855_v60, %v4782_v44  ;;  %v4872_v46 = vadd.f32 %v4848_v43, %v4791_v54  ;;  %v9017_v17 = vrot.slane %v8915_v32, %v5408_v36  ;;  %v9022_v37 = vrot.slane %v8915_v32, %v5428_v59 }
 0xc6d   : > { %9923 = vst [vmem:[#allocation28_spill] sm:$0xff] %v9014_v7  ;;  %v4680_v49 = vsel %vm594_vm2, -1e+30, %v4664_v45  ;;  %v4688_v14 = vsel %vm594_vm2, 0.0, %v4664_v45  ;;  %v4749_v40 = vrot.slane %v4656_v22, 1  ;;  %v4880_v33 = vadd.f32 %v4864_v38, %v4799_v50 }
 0xc6e   : > { %9924 = vst [vmem:[#allocation29_spill] sm:$0xff] %v9017_v17  ;;  %9925 = vst [vmem:[#allocation30_spill] sm:$0xff] %v9022_v37  ;;  %v4713_v2 = vmax.f32 %v4681_v31, %v8910_v29  ;;  %v4721_v19 = vadd.f32 %v4689_v15, %v8910_v29  ;;  %v4748_v58 = vrot.slane %v8950_v21, 1  ;;  %v4752_v44 = vrot.slane %v4657_v8, 1 }
 0xc6f   : > { %v4814_v53 = vrot.slane %v4656_v22, 2  ;;  %v4817_v0 = vrot.slane %v4657_v8, 2  ;;  %v4888_v61 = vmul.f32 0.25, %v4880_v33  ;;  %v4871_v60 = vadd.f32 %v4847_v26, %v4790_v57 }
 0xc70   : > { %v4712_v32 = vmax.f32 %v4680_v49, %v8950_v21  ;;  %v4720_v43 = vadd.f32 %v4688_v14, %v8950_v21  ;;  %v4751_v54 = vrot.slane %v8910_v29, 1  ;;  %v4879_v45 = vadd.f32 %v4863_v5, %v4735_v16 }
 0xc71   : > { %v4750_v38 = vsel %vm619_vm0, %v4748_v58, %v4749_v40  ;;  %v4813_v50 = vrot.slane %v8950_v21, 2  ;;  %v4816_v31 = vrot.slane %v8910_v29, 2  ;;  %v4896_v15 = vadd.f32 %v4888_v61, %v4872_v46 }
 0xc72   : > { %v4753_v20 = vsel %vm619_vm0, %v4751_v54, %v4752_v44  ;;  %v4887_v22 = vmul.f32 0.25, %v4879_v45  ;;  %v9039_v57 = vrot.slane %v8920_v10, %v4975_v51  ;;  %v9042_v8 = vrot.slane %v8920_v10, %v5408_v36 }
 0xc73   : > { %v4815_v16 = vsel %vm4806_vm10, %v4813_v50, %v4814_v53  ;;  %v4818_v26 = vsel %vm4806_vm10, %v4816_v31, %v4817_v0  ;;  %v9047_v5 = vadd.f32 %v4896_v15, %v8260_v27  ;;  %v9052_v46 = vrot.slane %v8920_v10, %v5053_v25  ;;  %v4544_v53 = vpop.permute.xlu0 %4543 }
 0xc74   : > { %v9054_v49 = vmax.f32 %v4712_v32, %v4750_v38  ;;  %v4895_v14 = vadd.f32 %v4887_v22, %v4871_v60  ;;  %v9057_v51 = vmul.f32 0.0, %v8930_v4  ;;  %v9062_v36 = vrot.slane %v8920_v10, %v5159_v9 }
 0xc75   : > { %v9064_v40 = vmax.f32 %v4713_v2, %v4753_v20  ;;  %v4784_v27 = vadd.f32 %v4750_v38, %v4720_v43  ;;  %v4785_v33 = vadd.f32 %v4753_v20, %v4721_v19  ;;  %v4938_v58 = vrot.slane %v9047_v5, 7 }
 0xc76   : > { %v9068_v25 = vsel %vm619_vm0, %v4815_v16, -1e+30  ;;  %v4857_v44 = vsel %vm619_vm0, %v4815_v16, 0.0  ;;  %v9072_v0 = vsel %vm619_vm0, %v4818_v26, -1e+30  ;;  %v4903_v61 = vadd.f32 %v4895_v14, %v8256_v30 }
 0xc77   : > { %v4858_v9 = vsel %vm619_vm0, %v4818_v26, 0.0  ;;  %v9077_v2 = vrot.slane %v9047_v5, 6  ;;  %v9080_v20 = vmul.f32 0.0, %v9014_v7  ;;  %v9085_v19 = vrot.slane %v8920_v10, %v5428_v59 }
 0xc78   : > { %v4919_v60 = vrot.slane %v4903_v61, 6  ;;  %v4937_v32 = vrot.slane %v4903_v61, 7  ;;  %v4954_v43 = vsel %vm594_vm2, 0.0, %v4938_v58  ;;  %v9089_v54 = vmul.f32 0.0, %v9017_v17 }
 0xc79   : > { %9926 = vst [vmem:[#allocation31_spill] sm:$0xff] %v9080_v20  ;;  %9927 = vst [vmem:[#allocation32_spill] sm:$0xff] %v9085_v19  ;;  %v9093_v45 = vadd.f32 %v4857_v44, %v4784_v27  ;;  %v4602_v38 = vsel %vm1647_vm8, %v8889_v6, %v4544_v53  ;;  %v9099_v10 = vadd.f32 %v4858_v9, %v4785_v33  ;;  %v5370_v33 = vrot.slane %v9077_v2, 2 }
 0xc7a   : > { %9928 = vst [vmem:[#allocation33_spill] sm:$0xff] %v9089_v54  ;;  %v4953_v59 = vsel %vm594_vm2, 0.0, %v4937_v32  ;;  %v9104_v50 = vmul.f32 %v8935_v62, %v9047_v5  ;;  %v5163_v31 = vmul.f32 %v9006_v52, %v9047_v5  ;;  %v4978_v6 = vmul.f32 %v8957_v48, %v4954_v43 }
 0xc7b   : > { %v4966_v15 = vmul.f32 %v8927_v63, %v4953_v59  ;;  %v4977_v22 = vmul.f32 %v8957_v48, %v4953_v59  ;;  %v5164_v16 = vmul.f32 %v9006_v52, %v9077_v2  ;;  %v5110_v26 = vrot.slane %v4919_v60, 1 }
 0xc7c   : > { %9929 = vst [vmem:[#allocation34_spill] sm:$0xff] %v9104_v50  ;;  %v5162_v14 = vmul.f32 %v9006_v52, %v4919_v60  ;;  %v5237_v27 = vmul.f32 %v9009_v12, %v9047_v5  ;;  %v4997_v53 = vmul.f32 %v8960_v55, %v4954_v43  ;;  %v5238_v9 = vmul.f32 %v9009_v12, %v9077_v2 }
 0xc7d   : > { %v4985_v58 = vadd.f32 %v4977_v22, %v9001_v3  ;;  %v9118_v44 = vadd.f32 %v4978_v6, %v4966_v15  ;;  %v5109_v32 = vrot.slane %v4903_v61, 1  ;;  %v5161_v59 = vmul.f32 %v9006_v52, %v4903_v61 }
 0xc7e   : > { %v5367_v47 = vrot.slane %v4919_v60, 2  ;;  %v5369_v30 = vrot.slane %v9047_v5, 2  ;;  %v9129_v28 = vmul.f32 %v8938_v13, %v9047_v5  ;;  %v5197_v3 = vrot.slane %v5164_v16, 1 }
 0xc7f   : > { %v9125_v54 = vadd.f32 %v4997_v53, %v4985_v58  ;;  %v5366_v15 = vrot.slane %v4903_v61, 2  ;;  %v9132_v19 = vmul.f32 %v8927_v63, %v4954_v43  ;;  %v5111_v20 = vsel %vm619_vm0, %v5109_v32, %v5110_v26 }
 0xc80   : > { %9930 = vst [vmem:[#allocation35_spill] sm:$0xff] %v9129_v28  ;;  %v5194_v50 = vrot.slane %v5162_v14, 1  ;;  %v5371_v60 = vsel %vm4806_vm10, %v5369_v30, %v5370_v33  ;;  %v5196_v53 = vrot.slane %v5163_v31, 1  ;;  %v5266_v52 = vrot.slane %v5238_v9, 1 }
 0xc81   : > { %9931 = vst [vmem:[#allocation36_spill] sm:$0xff] %v9132_v19  ;;  %v5368_v56 = vsel %vm4806_vm10, %v5366_v15, %v5367_v47  ;;  %v9140_v16 = vmul.f32 %v8930_v4, %v4903_v61  ;;  %v9143_v28 = vmul.f32 %v8935_v62, %v4903_v61  ;;  %v5193_v43 = vrot.slane %v5161_v59, 1 }
 0xc82   : > { %v4576_v22 = vpop.permute.xlu0 %4575  ;;  %v5265_v19 = vrot.slane %v5237_v27, 1  ;;  %v9149_v30 = vmul.f32 %v9014_v7, %v5111_v20  ;;  %v5399_v31 = vsel %vm619_vm0, %v5371_v60, 0.0  ;;  %v5398_v61 = vsel %vm619_vm0, %v5368_v56, 0.0 }
 0xc83   : > { %v4574_v6 = vpop.permute.xlu1 %4573  ;;  %v9146_v26 = vsel %vm4605_vm9, %v4602_v38, %v4576_v22  ;;  %v9156_v33 = vsel %vm619_vm0, %v5193_v43, %v5194_v50  ;;  %v5113_v27 = vrot.slane %v9077_v2, 1  ;;  %v9167_v9 = vmul.f32 %v8930_v4, %v9047_v5 }
 0xc84   : > { %v4610_v58 = vsel %vm4605_vm9, %v8882_v39, %v4574_v6  ;;  %v9152_v39 = vsel %vm619_vm0, %v5196_v53, %v5197_v3  ;;  %v9163_v20 = vsel %vm619_vm0, %v5265_v19, %v5266_v52  ;;  %v5112_v32 = vrot.slane %v9047_v5, 1 }
 0xc85   : > { %v4635_v47 = vrot.slane %v4610_v58, 4  ;;  %9932 = vst [vmem:[#allocation37_spill] sm:$0xff] %v9163_v20  ;;  %9933 = vst [vmem:[#allocation38_spill] sm:$0xff] %v9167_v9  ;;  %v9175_v56 = vmul.f32 %v9017_v17, %v5399_v31  ;;  %v9181_v52 = vmul.f32 %v9022_v37, %v5398_v61  ;;  %v9184_v2 = vmul.f32 %v9022_v37, %v5399_v31 }
 0xc86   : > { %v9187_v5 = vmul.f32 %v9042_v8, %v5399_v31  ;;  %v5114_v6 = vsel %vm619_vm0, %v5112_v32, %v5113_v27 }
 0xc87   : > { %v4578_v14 = vpop.permute.xlu1 %4577  ;;  %9934 = vst [vmem:[#allocation39_spill] sm:$0xff] %v9175_v56  ;;  %9936 = vst [vmem:[#allocation41_spill] sm:$0xff] %v9181_v52 }
 0xc88   : > { %v4612_v38 = vsel %vm4605_vm9, %v8893_v35, %v4578_v14  ;;  %v9178_v35 = vmul.f32 %v9017_v17, %v5398_v61  ;;  %9937 = vst [vmem:[#allocation42_spill] sm:$0xff] %v9184_v2  ;;  %9938 = vst [vmem:[#allocation43_spill] sm:$0xff] %v9187_v5 }
 0xc89   : > { %v4631_v50 = vrot.slane %v4612_v38, 4  ;;  %v9172_v3 = vsel %vm1245_vm5, %v4635_v47, %v4612_v38 }
 0xc8a   : > { %9935 = vst [vmem:[#allocation40_spill] sm:$0xff] %v9178_v35  ;;  %v4659_v15 = vrot.slane %v9172_v3, 6  ;;  %v4667_v22 = vrot.slane %v9172_v3, 7 }
 0xc8b   : > { %v9190_v19 = vsel %vm1245_vm5, %v4610_v58, %v4631_v50  ;;  %v9939_v58 = vmax.f32 %v8950_v21, %v8910_v29 }
 0xc8c   : > { %v4658_v60 = vrot.slane %v9190_v19, 6  ;;  %v4666_v53 = vrot.slane %v9190_v19, 7  ;;  %v4698_v43 = vmax.f32 %v8910_v29, %v9190_v19  ;;  %v4706_v31 = vadd.f32 %v9190_v19, %v8910_v29  ;;  %v4548_v29 = vpop.permute.xlu1 %4547 }
 0xc8d   : > { %v4729_v47 = vmax.f32 %v9939_v58, %v9190_v19  ;;  %v4737_v14 = vadd.f32 %v8980_v42, %v9190_v19  ;;  %v4754_v61 = vrot.slane %v9190_v19, 1  ;;  %v4792_v27 = vmax.f32 %v8987_v1, %v9190_v19 }
 0xc8e   : > { %v4682_v38 = vsel %vm594_vm2, -1e+30, %v4666_v53  ;;  %v4690_v32 = vsel %vm594_vm2, 0.0, %v4666_v53  ;;  %v9213_v50 = vmax.f32 %v4698_v43, %v9172_v3  ;;  %v9216_v59 = vadd.f32 %v4706_v31, %v9172_v3 }
 0xc8f   : > { %v4714_v21 = vmax.f32 %v4682_v38, %v9190_v19  ;;  %v4722_v42 = vadd.f32 %v4690_v32, %v9190_v19  ;;  %v4755_v58 = vrot.slane %v4658_v60, 1  ;;  %v4793_v56 = vmax.f32 %v4729_v47, %v9172_v3 }
 0xc90   : > { %v4800_v1 = vadd.f32 %v8992_v24, %v9190_v19  ;;  %v4801_v9 = vadd.f32 %v4737_v14, %v9172_v3  ;;  %v4819_v53 = vrot.slane %v9190_v19, 2  ;;  %v4820_v43 = vrot.slane %v4658_v60, 2 }
 0xc91   : > { %v4756_v5 = vsel %vm619_vm0, %v4754_v61, %v4755_v58  ;;  %v9940_v31 = vmax.f32 %v9054_v49, %v9068_v25  ;;  %v9941_v38 = vmax.f32 %v9064_v40, %v9072_v0  ;;  %v4757_v47 = vrot.slane %v9172_v3, 1 }
 0xc92   : > { %v4821_v52 = vsel %vm4806_vm10, %v4819_v53, %v4820_v43  ;;  %v4881_v24 = vadd.f32 %v9093_v45, %v4800_v1  ;;  %v4604_v14 = vsel %vm1647_vm8, %v8902_v23, %v4548_v29  ;;  %v4822_v60 = vrot.slane %v9172_v3, 2 }
 0xc93   : > { %v4873_v2 = vadd.f32 %v9940_v31, %v4792_v27  ;;  %v4874_v32 = vadd.f32 %v9941_v38, %v4793_v56  ;;  %v9238_v61 = vmax.f32 %v4714_v21, %v4756_v5  ;;  %v4786_v58 = vadd.f32 %v4756_v5, %v4722_v42  ;;  %v4580_v27 = vpop.permute.xlu1 %4579 }
 0xc94   : > { %v4882_v49 = vadd.f32 %v9099_v10, %v4801_v9  ;;  %v4683_v25 = vsel %vm594_vm2, -1e+30, %v4667_v22  ;;  %v9243_v40 = vsel %vm619_vm0, %v4821_v52, -1e+30  ;;  %v4859_v0 = vsel %vm619_vm0, %v4821_v52, 0.0 }
 0xc95   : > { %v4889_v56 = vmul.f32 0.25, %v4881_v24  ;;  %v4691_v45 = vsel %vm594_vm2, 0.0, %v4667_v22  ;;  %v4699_v23 = vmax.f32 %v9190_v19, %v9172_v3  ;;  %v4707_v5 = vadd.f32 %v9172_v3, %v9190_v19 }
 0xc96   : > { %v4890_v1 = vmul.f32 0.25, %v4882_v49  ;;  %v4715_v10 = vmax.f32 %v4683_v25, %v9172_v3  ;;  %v4723_v29 = vadd.f32 %v4691_v45, %v9172_v3  ;;  %v4758_v21 = vrot.slane %v4659_v15, 1 }
 0xc97   : > { %v4897_v9 = vadd.f32 %v4889_v56, %v4873_v2  ;;  %v4823_v42 = vrot.slane %v4659_v15, 2  ;;  %v4613_v22 = vsel %vm4605_vm9, %v4604_v14, %v4580_v27  ;;  %v9257_v43 = vmul.f32 %v9014_v7, %v5114_v6 }
 0xc98   : > { %v4898_v53 = vadd.f32 %v4890_v1, %v4874_v32  ;;  %v4759_v19 = vsel %vm619_vm0, %v4757_v47, %v4758_v21  ;;  %v4639_v38 = vrot.slane %v4613_v22, 4  ;;  %v4867_v24 = vadd.f32 %v4859_v0, %v4786_v58 }
 0xc99   : > { %9942 = vst [vmem:[#allocation44_spill] sm:$0xff] %v9257_v43  ;;  %v9260_v31 = vadd.f32 %v4897_v9, %v8274_v11  ;;  %v4824_v2 = vsel %vm4806_vm10, %v4822_v60, %v4823_v42  ;;  %v4779_v49 = vmax.f32 %v4715_v10, %v4759_v19  ;;  %v4787_v25 = vadd.f32 %v4759_v19, %v4723_v29 }
 0xc9a   : > { %v9265_v15 = vadd.f32 %v4898_v53, %v8280_v18  ;;  %v4844_v32 = vsel %vm619_vm0, %v4824_v2, -1e+30  ;;  %v4860_v14 = vsel %vm619_vm0, %v4824_v2, 0.0  ;;  %v9271_v6 = vsel %vm1245_vm5, %v9146_v26, %v4639_v38 }
 0xc9b   : > { %v9943_v11 = vrot.slane %v9146_v26, 4  ;;  %v4852_v60 = vmax.f32 %v4779_v49, %v4844_v32  ;;  %v4660_v58 = vrot.slane %v9271_v6, 6  ;;  %v9278_v18 = vrot.slane %v9260_v31, 6 }
 0xc9c   : > { %v4668_v56 = vrot.slane %v9271_v6, 7  ;;  %v4700_v27 = vmax.f32 %v9172_v3, %v9271_v6  ;;  %v4708_v26 = vadd.f32 %v9271_v6, %v9172_v3  ;;  %v4731_v9 = vmax.f32 %v4699_v23, %v9271_v6 }
 0xc9d   : > { %v4645_v47 = vsel %vm1245_vm5, %v9943_v11, %v4613_v22  ;;  %v4739_v29 = vadd.f32 %v4707_v5, %v9271_v6  ;;  %v4760_v11 = vrot.slane %v9271_v6, 1  ;;  %v4761_v52 = vrot.slane %v4660_v58, 1 }
 0xc9e   : > { %v4661_v0 = vrot.slane %v4645_v47, 6  ;;  %v4669_v45 = vrot.slane %v4645_v47, 7  ;;  %v4701_v1 = vmax.f32 %v9271_v6, %v4645_v47  ;;  %v4709_v10 = vadd.f32 %v4645_v47, %v9271_v6 }
 0xc9f   : > { %v4684_v21 = vsel %vm594_vm2, -1e+30, %v4668_v56  ;;  %v4692_v53 = vsel %vm594_vm2, 0.0, %v4668_v56  ;;  %v4732_v49 = vmax.f32 %v4700_v27, %v4645_v47  ;;  %v4740_v23 = vadd.f32 %v4708_v26, %v4645_v47 }
 0xca0   : > { %v4685_v42 = vsel %vm594_vm2, -1e+30, %v4669_v45  ;;  %v4693_v22 = vsel %vm594_vm2, 0.0, %v4669_v45  ;;  %v4716_v19 = vmax.f32 %v4684_v21, %v9271_v6  ;;  %v4724_v38 = vadd.f32 %v4692_v53, %v9271_v6 }
 0xca1   : > { %v4717_v2 = vmax.f32 %v4685_v42, %v4645_v47  ;;  %v4725_v3 = vadd.f32 %v4693_v22, %v4645_v47  ;;  %v4733_v32 = vmax.f32 %v4701_v1, %v9271_v6  ;;  %v4741_v5 = vadd.f32 %v4709_v10, %v9271_v6 }
 0xca2   : > { %v4763_v43 = vrot.slane %v4645_v47, 1  ;;  %v4764_v7 = vrot.slane %v4661_v0, 1  ;;  %v4868_v56 = vadd.f32 %v4860_v14, %v4787_v25  ;;  %v4795_v21 = vmax.f32 %v4731_v9, %v4645_v47 }
 0xca3   : > { %v4796_v42 = vmax.f32 %v4732_v49, %v9271_v6  ;;  %v4762_v53 = vsel %vm619_vm0, %v4760_v11, %v4761_v52  ;;  %v4802_v1 = vadd.f32 %v9216_v59, %v9271_v6  ;;  %v4803_v26 = vadd.f32 %v4739_v29, %v4645_v47 }
 0xca4   : > { %v4765_v27 = vsel %vm619_vm0, %v4763_v43, %v4764_v7  ;;  %v4780_v10 = vmax.f32 %v4716_v19, %v4762_v53  ;;  %v4788_v35 = vadd.f32 %v4762_v53, %v4724_v38  ;;  %v4804_v25 = vadd.f32 %v4740_v23, %v9271_v6 }
 0xca5   : > { %v4781_v22 = vmax.f32 %v4717_v2, %v4765_v27  ;;  %v4789_v62 = vadd.f32 %v4765_v27, %v4725_v3  ;;  %v4825_v14 = vrot.slane %v9271_v6, 2  ;;  %v4826_v45 = vrot.slane %v4660_v58, 2 }
 0xca6   : > { %v4828_v9 = vrot.slane %v4645_v47, 2  ;;  %v4829_v4 = vrot.slane %v4661_v0, 2  ;;  %v4876_v49 = vadd.f32 %v4852_v60, %v4795_v21  ;;  %v9307_v20 = vadd.f32 %v4867_v24, %v4802_v1 }
 0xca7   : > { %v4884_v52 = vadd.f32 %v4868_v56, %v4803_v26  ;;  %v4797_v7 = vmax.f32 %v4733_v32, -1e+30  ;;  %v4827_v43 = vsel %vm4806_vm10, %v4825_v14, %v4826_v45  ;;  %v4939_v59 = vrot.slane %v9260_v31, 7 }
 0xca8   : > { %v4940_v29 = vrot.slane %v9265_v15, 7  ;;  %v4830_v19 = vsel %vm4806_vm10, %v4828_v9, %v4829_v4  ;;  %v4845_v2 = vsel %vm619_vm0, %v4827_v43, -1e+30  ;;  %v4861_v38 = vsel %vm619_vm0, %v4827_v43, 0.0 }
 0xca9   : > { %v4892_v58 = vmul.f32 0.25, %v4884_v52  ;;  %v4846_v47 = vsel %vm619_vm0, %v4830_v19, -1e+30  ;;  %v4853_v60 = vmax.f32 %v4780_v10, %v4845_v2  ;;  %v4862_v24 = vsel %vm619_vm0, %v4830_v19, 0.0 }
 0xcaa   : > { %v4869_v0 = vadd.f32 %v4861_v38, %v4788_v35  ;;  %v4854_v3 = vmax.f32 %v4781_v22, %v4846_v47  ;;  %v4870_v32 = vadd.f32 %v4862_v24, %v4789_v62  ;;  %v4955_v11 = vsel %vm594_vm2, 0.0, %v4939_v59  ;;  %v9944_v38 = vld [vmem:[#allocation24_spill] sm:$0xff] }
 0xcab   : > { %v4900_v23 = vadd.f32 %v4892_v58, %v4876_v49  ;;  %v4877_v56 = vadd.f32 %v4853_v60, %v4796_v42  ;;  %v9319_v4 = vrot.slane %v9265_v15, 6  ;;  %v9322_v21 = vsel %vm594_vm2, 0.0, %v4940_v29 }
 0xcac   : > { %v4885_v45 = vadd.f32 %v4869_v0, %v4804_v25  ;;  %v4878_v53 = vadd.f32 %v4854_v3, %v4797_v7  ;;  %v4886_v27 = vadd.f32 %v4870_v32, %v4741_v5  ;;  %v9328_v35 = vmul.f32 %v8927_v63, %v4955_v11 }
 0xcad   : > { %v9325_v1 = vadd.f32 %v4900_v23, %v8364_v34  ;;  %v4979_v26 = vmul.f32 %v8957_v48, %v4955_v11  ;;  %v4998_v42 = vmul.f32 %v8960_v55, %v4955_v11  ;;  %v5016_v10 = vmul.f32 %v9039_v57, %v4955_v11 }
 0xcae   : > { %v4893_v62 = vmul.f32 0.25, %v4885_v45  ;;  %v4894_v22 = vmul.f32 0.25, %v4886_v27  ;;  %v4980_v25 = vmul.f32 %v8957_v48, %v9322_v21  ;;  %v5017_v5 = vmul.f32 %v9039_v57, %v9322_v21  ;;  %v9945_v45 = vld [vmem:[#allocation34_spill] sm:$0xff]  ;;  %v9946_v27 = vld [vmem:[#allocation35_spill] sm:$0xff] }
 0xcaf   : > { %v5076_v34 = vmul.f32 %v8938_v13, %v9260_v31  ;;  %v5005_v9 = vadd.f32 %v4998_v42, %v9118_v44  ;;  %v5023_v49 = vadd.f32 %v5016_v10, %v9125_v54  ;;  %v5094_v52 = vmul.f32 %v9052_v46, %v9260_v31 }
 0xcb0   : > { %v4901_v14 = vadd.f32 %v4893_v62, %v4877_v56  ;;  %v4902_v7 = vadd.f32 %v4894_v22, %v4878_v53  ;;  %v5239_v43 = vmul.f32 %v9009_v12, %v9260_v31  ;;  %v5240_v59 = vmul.f32 %v9009_v12, %v9278_v18 }
 0xcb1   : > { %v5305_v29 = vmul.f32 %v9062_v36, %v9260_v31  ;;  %v5024_v2 = vadd.f32 %v5017_v5, %v5005_v9  ;;  %v5043_v44 = vadd.f32 %v9057_v51, %v5023_v49  ;;  %v5306_v54 = vmul.f32 %v9062_v36, %v9278_v18 }
 0xcb2   : > { %v9350_v19 = vadd.f32 %v4901_v14, %v8375_v41  ;;  %v9356_v58 = vadd.f32 %v4902_v7, %v9944_v38  ;;  %v5268_v47 = vrot.slane %v5239_v43, 1  ;;  %v5269_v60 = vrot.slane %v5240_v59, 1 }
 0xcb3   : > { %v5307_v24 = vmul.f32 %v9062_v36, %v9265_v15  ;;  %v5044_v0 = vadd.f32 %v9140_v16, %v5024_v2  ;;  %v5063_v3 = vadd.f32 %v9143_v28, %v5043_v44  ;;  %v5095_v41 = vmul.f32 %v9052_v46, %v9265_v15 }
 0xcb4   : > { %v5308_v51 = vmul.f32 %v9062_v36, %v9319_v4  ;;  %v5270_v32 = vsel %vm619_vm0, %v5268_v47, %v5269_v60  ;;  %v5331_v23 = vrot.slane %v5305_v29, 1  ;;  %v5332_v11 = vrot.slane %v5306_v54, 1 }
 0xcb5   : > { %v5372_v56 = vrot.slane %v9260_v31, 2  ;;  %v5064_v53 = vadd.f32 %v9945_v45, %v5044_v0  ;;  %v5082_v62 = vadd.f32 %v9946_v27, %v5063_v3  ;;  %v5373_v16 = vrot.slane %v9278_v18, 2  ;;  %v9950_v0 = vld [vmem:[#allocation32_spill] sm:$0xff]  ;;  %v9952_v27 = vld [vmem:[#allocation37_spill] sm:$0xff] }
 0xcb6   : > { %v5335_v42 = vrot.slane %v5308_v51, 1  ;;  %v5334_v28 = vrot.slane %v5307_v24, 1  ;;  %v5375_v10 = vrot.slane %v9265_v15, 2  ;;  %v5376_v22 = vrot.slane %v9319_v4, 2 }
 0xcb7   : > { %v9947_v5 = vmax.f32 %v9213_v50, %v9271_v6  ;;  %v9948_v14 = vmax.f32 %v9238_v61, %v9243_v40  ;;  %v5083_v49 = vadd.f32 %v5076_v34, %v5064_v53  ;;  %v5101_v7 = vadd.f32 %v5094_v52, %v5082_v62  ;;  %v9949_v50 = vld [vmem:[#allocation31_spill] sm:$0xff] }
 0xcb8   : > { %v5333_v43 = vsel %vm619_vm0, %v5331_v23, %v5332_v11  ;;  %v5374_v59 = vsel %vm4806_vm10, %v5372_v56, %v5373_v16  ;;  %v5336_v29 = vsel %vm619_vm0, %v5334_v28, %v5335_v42  ;;  %v5377_v2 = vsel %vm4806_vm10, %v5375_v10, %v5376_v22  ;;  %v9951_v23 = vld [vmem:[#allocation36_spill] sm:$0xff] }
 0xcb9   : > { %v4875_v9 = vadd.f32 %v9948_v14, %v9947_v5  ;;  %v5400_v44 = vsel %vm619_vm0, %v5374_v59, 0.0  ;;  %v4891_v54 = vmul.f32 0.25, %v9307_v20  ;;  %v5102_v38 = vadd.f32 %v5095_v41, %v5083_v49 }
 0xcba   : > { %v5149_v6 = vadd.f32 %v9949_v50, %v5101_v7  ;;  %v9387_v61 = vsel %vm619_vm0, %v5377_v2, 0.0  ;;  %v9390_v40 = vrot.slane %v9325_v1, 6  ;;  %v9393_v34 = vmul.f32 %v9017_v17, %v5400_v44 }
 0xcbb   : > { %v9396_v52 = vmul.f32 %v9022_v37, %v5400_v44  ;;  %v9400_v47 = vmul.f32 %v9022_v37, %v9387_v61  ;;  %v5451_v20 = vmul.f32 %v9042_v8, %v5400_v44  ;;  %v5150_v60 = vadd.f32 %v9149_v30, %v5102_v38 }
 0xcbc   : > { %v5225_v24 = vadd.f32 %v9156_v33, %v5149_v6  ;;  %v5469_v3 = vmul.f32 %v9950_v0, %v5400_v44  ;;  %v4899_v41 = vadd.f32 %v4891_v54, %v4875_v9  ;;  %v4942_v51 = vrot.slane %v9325_v1, 7  ;;  %v9953_v33 = vld [vmem:[#allocation23_spill] sm:$0xff] }
 0xcbd   : > { %v4987_v11 = vadd.f32 %v4979_v26, %v9951_v23  ;;  %v4988_v56 = vadd.f32 %v4980_v25, %v9328_v35  ;;  %v4999_v45 = vmul.f32 %v8960_v55, %v9322_v21  ;;  %v5226_v53 = vadd.f32 %v9152_v39, %v5150_v60  ;;  %v9954_v26 = vld [vmem:[#allocation25_spill] sm:$0xff]  ;;  %v9955_v25 = vld [vmem:[#allocation26_spill] sm:$0xff]  ;;  %v9959_v23 = vld [vmem:[#allocation27_spill] sm:$0xff] }
 0xcbe   : > { %v5293_v62 = vadd.f32 %v9952_v27, %v5225_v24  ;;  %v5470_v30 = vmul.f32 %v9950_v0, %v9387_v61  ;;  %v9416_v42 = vadd.f32 %v4899_v41, %v9953_v33  ;;  %v9419_v16 = vsel %vm594_vm2, 0.0, %v4942_v51  ;;  %v9957_v24 = vld [vmem:[#allocation40_spill] sm:$0xff]  ;;  %v9958_v41 = vld [vmem:[#allocation41_spill] sm:$0xff] }
 0xcbf   : > { %v5006_v28 = vadd.f32 %v4999_v45, %v4987_v11  ;;  %v5038_v35 = vmul.f32 %v9954_v26, %v9260_v31  ;;  %v5057_v10 = vmul.f32 %v9955_v25, %v9260_v31  ;;  %v5294_v22 = vadd.f32 %v5270_v32, %v5226_v53  ;;  %v9956_v32 = vld [vmem:[#allocation33_spill] sm:$0xff] }
 0xcc0   : > { %v5358_v39 = vadd.f32 %v5333_v43, %v5293_v62  ;;  %v4941_v5 = vrot.slane %v9416_v42, 7  ;;  %v5058_v14 = vmul.f32 %v9955_v25, %v9265_v15  ;;  %v9429_v9 = vrot.slane %v9416_v42, 6 }
 0xcc1   : > { %v5019_v49 = vmul.f32 %v9039_v57, %v9419_v16  ;;  %v5077_v7 = vmul.f32 %v8938_v13, %v9265_v15  ;;  %v5078_v59 = vmul.f32 %v8938_v13, %v9416_v42  ;;  %v5359_v2 = vadd.f32 %v5336_v29, %v5294_v22  ;;  %v9960_v22 = vld [vmem:[#allocation42_spill] sm:$0xff] }
 0xcc2   : > { %v5418_v43 = vadd.f32 %v9956_v32, %v5358_v39  ;;  %v9439_v44 = vsel %vm594_vm2, 0.0, %v4941_v5  ;;  %v5096_v54 = vmul.f32 %v9052_v46, %v9416_v42  ;;  %v5115_v6 = vrot.slane %v9260_v31, 1  ;;  %v9961_v5 = vld [vmem:[#allocation43_spill] sm:$0xff] }
 0xcc3   : > { %v5000_v38 = vmul.f32 %v8960_v55, %v9439_v44  ;;  %v5018_v50 = vmul.f32 %v9039_v57, %v9439_v44  ;;  %v5116_v60 = vrot.slane %v9278_v18, 1  ;;  %v5419_v29 = vadd.f32 %v9957_v24, %v5359_v2  ;;  %v9962_v24 = vld [vmem:[#allocation38_spill] sm:$0xff] }
 0xcc4   : > { %v5438_v51 = vadd.f32 %v9958_v41, %v5418_v43  ;;  %v5165_v11 = vmul.f32 %v9959_v23, %v9260_v31  ;;  %v5166_v45 = vmul.f32 %v9959_v23, %v9278_v18  ;;  %v5167_v33 = vmul.f32 %v9959_v23, %v9265_v15 }
 0xcc5   : > { %v5007_v53 = vadd.f32 %v5000_v38, %v4988_v56  ;;  %v5025_v27 = vadd.f32 %v5018_v50, %v5006_v28  ;;  %v5117_v62 = vsel %vm619_vm0, %v5115_v6, %v5116_v60  ;;  %v5439_v39 = vadd.f32 %v9960_v22, %v5419_v29  ;;  %v9963_v56 = vld [vmem:[#allocation28_spill] sm:$0xff] }
 0xcc6   : > { %v5457_v32 = vadd.f32 %v9961_v5, %v5438_v51  ;;  %v5097_v2 = vmul.f32 %v9052_v46, %v9325_v1  ;;  %v5168_v31 = vmul.f32 %v9959_v23, %v9319_v4  ;;  %v5144_v28 = vmul.f32 %v9963_v56, %v5117_v62 }
 0xcc7   : > { %v5026_v43 = vadd.f32 %v5019_v49, %v5007_v53  ;;  %v5045_v18 = vadd.f32 %v9962_v24, %v5025_v27  ;;  %v5200_v38 = vrot.slane %v5166_v45, 1  ;;  %v5458_v50 = vadd.f32 %v5451_v20, %v5439_v39  ;;  %v9964_v24 = vld [vmem:[#allocation44_spill] sm:$0xff] }
 0xcc8   : > { %v5476_v6 = vadd.f32 %v5469_v3, %v5457_v32  ;;  %v5199_v60 = vrot.slane %v5165_v11, 1  ;;  %v5203_v41 = vrot.slane %v5168_v31, 1  ;;  %v5202_v22 = vrot.slane %v5167_v33, 1 }
 0xcc9   : > { %v5046_v37 = vadd.f32 %v5038_v35, %v5026_v43  ;;  %v5065_v29 = vadd.f32 %v5057_v10, %v5045_v18  ;;  %v5241_v51 = vmul.f32 %v9009_v12, %v9265_v15  ;;  %v5477_v5 = vadd.f32 %v5470_v30, %v5458_v50 }
 0xcca   : > { %v5201_v17 = vsel %vm619_vm0, %v5199_v60, %v5200_v38  ;;  %v5242_v49 = vmul.f32 %v9009_v12, %v9319_v4  ;;  %v5243_v53 = vmul.f32 %v9009_v12, %v9416_v42  ;;  %v5204_v3 = vsel %vm619_vm0, %v5202_v22, %v5203_v41 }
 0xccb   : > { %v5066_v45 = vadd.f32 %v5058_v14, %v5046_v37  ;;  %v5084_v20 = vadd.f32 %v5077_v7, %v5065_v29  ;;  %v5244_v35 = vmul.f32 %v9009_v12, %v9429_v9  ;;  %v5484_v10 = vpack.c.bf16 %v5477_v5, %v5476_v6 }
 0xccc   : > { %v5271_v11 = vrot.slane %v5241_v51, 1  ;;  %v5272_v27 = vrot.slane %v5242_v49, 1  ;;  %v5309_v30 = vmul.f32 %v9062_v36, %v9416_v42  ;;  %v5310_v32 = vmul.f32 %v9062_v36, %v9429_v9 }
 0xccd   : > { %v5085_v62 = vadd.f32 %v5078_v59, %v5066_v45  ;;  %v5103_v33 = vadd.f32 %v5096_v54, %v5084_v20  ;;  %v5275_v39 = vrot.slane %v5244_v35, 1  ;;  %6642 = vmatprep.mubr.msk.bf16.mxu0 %vm786_vm1, %v5484_v10  ;;  %v5274_v14 = vrot.slane %v5243_v53, 1 }
 0xcce   : > { %v5273_v37 = vsel %vm619_vm0, %v5271_v11, %v5272_v27  ;;  %v5311_v7 = vmul.f32 %v9062_v36, %v9325_v1  ;;  %v5312_v31 = vmul.f32 %v9062_v36, %v9390_v40  ;;  %v5337_v59 = vrot.slane %v5309_v30, 1 }
 0xccf   : > { %v5104_v43 = vadd.f32 %v5097_v2, %v5085_v62  ;;  %v5151_v18 = vadd.f32 %v9964_v24, %v5103_v33  ;;  %v5338_v54 = vrot.slane %v5310_v32, 1  ;;  %v5378_v6 = vrot.slane %v9416_v42, 2 }
 0xcd0   : > { %v5340_v38 = vrot.slane %v5311_v7, 1  ;;  %v5341_v50 = vrot.slane %v5312_v31, 1  ;;  %v5379_v60 = vrot.slane %v9429_v9, 2  ;;  %v5276_v22 = vsel %vm619_vm0, %v5274_v14, %v5275_v39  ;;  %v9965_v31 = vld [vmem:[#allocation39_spill] sm:$0xff] }
 0xcd1   : > { %v5152_v41 = vadd.f32 %v5144_v28, %v5104_v43  ;;  %v5227_v29 = vadd.f32 %v5201_v17, %v5151_v18  ;;  %v5339_v51 = vsel %vm619_vm0, %v5337_v59, %v5338_v54  ;;  %v5381_v49 = vrot.slane %v9325_v1, 2 }
 0xcd2   : > { %v5342_v5 = vsel %vm619_vm0, %v5340_v38, %v5341_v50  ;;  %v5380_v2 = vsel %vm4806_vm10, %v5378_v6, %v5379_v60  ;;  %v5382_v53 = vrot.slane %v9390_v40, 2  ;;  %v5452_v17 = vmul.f32 %v9042_v8, %v9387_v61 }
 0xcd3   : > { %v5228_v45 = vadd.f32 %v5204_v3, %v5152_v41  ;;  %v5295_v20 = vadd.f32 %v5273_v37, %v5227_v29  ;;  %v9496_v35 = vsel %vm619_vm0, %v5380_v2, 0.0  ;;  %v9506_v27 = vrot.slane %v9350_v19, 6 }
 0xcd4   : > { %v5383_v28 = vsel %vm4806_vm10, %v5381_v49, %v5382_v53  ;;  %v5453_v10 = vmul.f32 %v9042_v8, %v9496_v35  ;;  %v5471_v11 = vmul.f32 %v9950_v0, %v9496_v35  ;;  %v9509_v62 = vrot.slane %v9356_v58, 6 }
 0xcd5   : > { %v5296_v30 = vadd.f32 %v5276_v22, %v5228_v45  ;;  %v5360_v3 = vadd.f32 %v5339_v51, %v5295_v20  ;;  %v4943_v33 = vrot.slane %v9350_v19, 7  ;;  %v9513_v39 = vsel %vm619_vm0, %v5383_v28, 0.0 }
 0xcd6   : > { %v4944_v32 = vrot.slane %v9356_v58, 7  ;;  %v4969_v37 = vmul.f32 %v8927_v63, %v9322_v21  ;;  %v4970_v14 = vmul.f32 %v8927_v63, %v9439_v44  ;;  %v4981_v18 = vmul.f32 %v8957_v48, %v9439_v44 }
 0xcd7   : > { %v5361_v7 = vadd.f32 %v5342_v5, %v5296_v30  ;;  %v5420_v43 = vadd.f32 %v9965_v31, %v5360_v3  ;;  %v9522_v24 = vsel %vm594_vm2, 0.0, %v4943_v33  ;;  %v4982_v54 = vmul.f32 %v8957_v48, %v9419_v16 }
 0xcd8   : > { %v9527_v59 = vsel %vm594_vm2, 0.0, %v4944_v32  ;;  %v5001_v21 = vmul.f32 %v8960_v55, %v9419_v16  ;;  %v9535_v38 = vmul.f32 %v8960_v55, %v9522_v24  ;;  %v4989_v60 = vadd.f32 %v4981_v18, %v4969_v37 }
 0xcd9   : > { %v5421_v50 = vadd.f32 %v9393_v34, %v5361_v7  ;;  %v5440_v6 = vadd.f32 %v9396_v52, %v5420_v43  ;;  %v9541_v44 = vmul.f32 %v9039_v57, %v9522_v24  ;;  %v5472_v41 = vmul.f32 %v9950_v0, %v9513_v39 }
 0xcda   : > { %v4990_v29 = vadd.f32 %v4982_v54, %v4970_v14  ;;  %v5021_v22 = vmul.f32 %v9039_v57, %v9527_v59  ;;  %v5039_v51 = vmul.f32 %v9954_v26, %v9265_v15  ;;  %v5008_v2 = vadd.f32 %v5001_v21, %v4989_v60 }
 0xcdb   : > { %v5441_v5 = vadd.f32 %v9400_v47, %v5421_v50  ;;  %v5459_v34 = vadd.f32 %v5452_v17, %v5440_v6  ;;  %v5040_v52 = vmul.f32 %v9954_v26, %v9416_v42  ;;  %v5059_v53 = vmul.f32 %v9955_v25, %v9416_v42 }
 0xcdc   : > { %v5009_v49 = vadd.f32 %v9535_v38, %v4990_v29  ;;  %v5060_v45 = vmul.f32 %v9955_v25, %v9325_v1  ;;  %v5079_v20 = vmul.f32 %v8938_v13, %v9325_v1  ;;  %v5027_v47 = vadd.f32 %v9541_v44, %v5008_v2 }
 0xcdd   : > { %v5460_v28 = vadd.f32 %v5453_v10, %v5441_v5  ;;  %v5478_v30 = vadd.f32 %v5471_v11, %v5459_v34  ;;  %v9562_v17 = vmul.f32 %v8938_v13, %v9350_v19  ;;  %v9566_v33 = vmul.f32 %v9052_v46, %v9350_v19 }
 0xcde   : > { %v5028_v3 = vadd.f32 %v5021_v22, %v5009_v49  ;;  %v5118_v32 = vrot.slane %v9265_v15, 1  ;;  %v5119_v37 = vrot.slane %v9319_v4, 1  ;;  %v5047_v7 = vadd.f32 %v5039_v51, %v5027_v47 }
 0xcdf   : > { %v5479_v14 = vadd.f32 %v5472_v41, %v5460_v28  ;;  %v5121_v10 = vrot.slane %v9416_v42, 1  ;;  %v5122_v11 = vrot.slane %v9429_v9, 1  ;;  %v5169_v18 = vmul.f32 %v9959_v23, %v9416_v42 }
 0xce0   : > { %v5048_v31 = vadd.f32 %v5040_v52, %v5028_v3  ;;  %v5120_v43 = vsel %vm619_vm0, %v5118_v32, %v5119_v37  ;;  %v5170_v54 = vmul.f32 %v9959_v23, %v9429_v9  ;;  %v5067_v50 = vadd.f32 %v5059_v53, %v5047_v7 }
 0xce1   : > { %v5485_v21 = vpack.c.bf16 %v5479_v14, %v5478_v30  ;;  %v5099_v15 = vmul.f32 %v9052_v46, %v9356_v58  ;;  %v5123_v4 = vsel %vm619_vm0, %v5121_v10, %v5122_v11  ;;  %v5145_v60 = vmul.f32 %v9963_v56, %v5120_v43 }
 0xce2   : > { %v5068_v6 = vadd.f32 %v5060_v45, %v5048_v31  ;;  %v5171_v41 = vmul.f32 %v9959_v23, %v9325_v1  ;;  %v5172_v29 = vmul.f32 %v9959_v23, %v9390_v40  ;;  %v5086_v42 = vadd.f32 %v5079_v20, %v5067_v50 }
 0xce3   : > { %6643 = vmatmul.mubr.msk.bf16.vlgmr.msra.gmra.mrb[40].mxu0 %vm786_vm1, %v5485_v21  ;;  %v5146_v9 = vmul.f32 %v9963_v56, %v5123_v4  ;;  %v5206_v22 = vrot.slane %v5170_v54, 1  ;;  %v5245_v51 = vmul.f32 %v9009_v12, %v9325_v1  ;;  %v5205_v34 = vrot.slane %v5169_v18, 1 }
 0xce4   : > { %v5087_v5 = vadd.f32 %v9562_v17, %v5068_v6  ;;  %v5209_v2 = vrot.slane %v5172_v29, 1  ;;  %v5246_v52 = vmul.f32 %v9009_v12, %v9390_v40  ;;  %v5105_v49 = vadd.f32 %v9566_v33, %v5086_v42 }
 0xce5   : > { %v5208_v53 = vrot.slane %v5171_v41, 1  ;;  %v5247_v45 = vmul.f32 %v9009_v12, %v9350_v19  ;;  %v5248_v20 = vmul.f32 %v9009_v12, %v9506_v27  ;;  %v5207_v30 = vsel %vm619_vm0, %v5205_v34, %v5206_v22 }
 0xce6   : > { %v5106_v28 = vadd.f32 %v5099_v15, %v5087_v5  ;;  %v5277_v47 = vrot.slane %v5245_v51, 1  ;;  %v5278_v3 = vrot.slane %v5246_v52, 1  ;;  %v5153_v32 = vadd.f32 %v5145_v60, %v5105_v49 }
 0xce7   : > { %v5280_v37 = vrot.slane %v5247_v45, 1  ;;  %v5281_v14 = vrot.slane %v5248_v20, 1  ;;  %v5313_v7 = vmul.f32 %v9062_v36, %v9350_v19  ;;  %v5210_v11 = vsel %vm619_vm0, %v5208_v53, %v5209_v2  ;;  %v9966_v53 = vld [vmem:[#allocation29_spill] sm:$0xff] }
 0xce8   : > { %v5154_v10 = vadd.f32 %v5146_v9, %v5106_v28  ;;  %v5314_v31 = vmul.f32 %v9062_v36, %v9506_v27  ;;  %v5315_v43 = vmul.f32 %v9062_v36, %v9356_v58  ;;  %v5229_v18 = vadd.f32 %v5207_v30, %v5153_v32  ;;  %v9967_v32 = vld [vmem:[#allocation30_spill] sm:$0xff] }
 0xce9   : > { %v5279_v54 = vsel %vm619_vm0, %v5277_v47, %v5278_v3  ;;  %v9607_v21 = vsel %vm619_vm0, %v5280_v37, %v5281_v14  ;;  %v5316_v50 = vmul.f32 %v9062_v36, %v9509_v62  ;;  %v5343_v4 = vrot.slane %v5313_v7, 1 }
 0xcea   : > { %v5230_v15 = vadd.f32 %v5210_v11, %v5154_v10  ;;  %v5344_v6 = vrot.slane %v5314_v31, 1  ;;  %v5346_v60 = vrot.slane %v5315_v43, 1  ;;  %v5297_v41 = vadd.f32 %v5279_v54, %v5229_v18 }
 0xceb   : > { %v5347_v29 = vrot.slane %v5316_v50, 1  ;;  %v5384_v42 = vrot.slane %v9350_v19, 2  ;;  %v5385_v9 = vrot.slane %v9506_v27, 2  ;;  %v5387_v5 = vrot.slane %v9356_v58, 2 }
 0xcec   : > { %v5298_v22 = vadd.f32 %v9607_v21, %v5230_v15  ;;  %v9615_v51 = vsel %vm619_vm0, %v5343_v4, %v5344_v6  ;;  %v5388_v34 = vrot.slane %v9509_v62, 2  ;;  %v5414_v45 = vmul.f32 %v9966_v53, %v9387_v61 }
 0xced   : > { %v5348_v2 = vsel %vm619_vm0, %v5346_v60, %v5347_v29  ;;  %v5362_v52 = vadd.f32 %v9615_v51, %v5297_v41  ;;  %v5386_v49 = vsel %vm4806_vm10, %v5384_v42, %v5385_v9  ;;  %v5415_v30 = vmul.f32 %v9966_v53, %v9496_v35 }
 0xcee   : > { %v5363_v20 = vadd.f32 %v5348_v2, %v5298_v22  ;;  %v5389_v28 = vsel %vm4806_vm10, %v5387_v5, %v5388_v34  ;;  %v9628_v47 = vsel %vm619_vm0, %v5386_v49, 0.0  ;;  %v5434_v37 = vmul.f32 %v9967_v32, %v9496_v35 }
 0xcef   : > { %v5422_v3 = vadd.f32 %v5414_v45, %v5362_v52  ;;  %v9633_v14 = vsel %vm619_vm0, %v5389_v28, 0.0  ;;  %v5435_v61 = vmul.f32 %v9967_v32, %v9513_v39  ;;  %v5454_v10 = vmul.f32 %v9042_v8, %v9513_v39 }
 0xcf0   : > { %v5423_v7 = vadd.f32 %v5415_v30, %v5363_v20  ;;  %v4971_v31 = vmul.f32 %v8927_v63, %v9419_v16  ;;  %v4972_v43 = vmul.f32 %v8927_v63, %v9522_v24  ;;  %v4983_v35 = vmul.f32 %v8957_v48, %v9522_v24 }
 0xcf1   : > { %v5442_v11 = vadd.f32 %v5434_v37, %v5422_v3  ;;  %v9647_v54 = vmul.f32 %v9042_v8, %v9628_v47  ;;  %v4984_v50 = vmul.f32 %v8957_v48, %v9527_v59  ;;  %v9653_v4 = vmul.f32 %v9950_v0, %v9628_v47 }
 0xcf2   : > { %v5443_v18 = vadd.f32 %v5435_v61, %v5423_v7  ;;  %v4991_v16 = vadd.f32 %v4983_v35, %v4971_v31  ;;  %v5003_v63 = vmul.f32 %v8960_v55, %v9527_v59  ;;  %v5474_v24 = vmul.f32 %v9950_v0, %v9633_v14 }
 0xcf3   : > { %v5461_v15 = vadd.f32 %v5454_v10, %v5442_v11  ;;  %v4992_v60 = vadd.f32 %v4984_v50, %v4972_v43  ;;  %v5022_v41 = vmul.f32 0.0, %v9039_v57  ;;  %v5041_v5 = vmul.f32 %v9954_v26, %v9325_v1 }
 0xcf4   : > { %v5462_v6 = vadd.f32 %v9647_v54, %v5443_v18  ;;  %v5010_v48 = vadd.f32 %v5003_v63, %v4991_v16  ;;  %v5042_v34 = vmul.f32 %v9954_v26, %v9350_v19  ;;  %v5125_v2 = vrot.slane %v9390_v40, 1 }
 0xcf5   : > { %v5480_v29 = vadd.f32 %v9653_v4, %v5461_v15  ;;  %v5011_v9 = vadd.f32 %v9535_v38, %v4992_v60  ;;  %v5061_v57 = vmul.f32 %v9955_v25, %v9350_v19  ;;  %v5100_v49 = vmul.f32 0.0, %v9052_v46 }
 0xcf6   : > { %v5481_v42 = vadd.f32 %v5474_v24, %v5462_v6  ;;  %v5029_v22 = vadd.f32 %v9541_v44, %v5010_v48  ;;  %v5128_v38 = vrot.slane %v9506_v27, 1  ;;  %v5062_v45 = vmul.f32 %v9955_v25, %v9356_v58 }
 0xcf7   : > { %v5030_v59 = vadd.f32 %v5022_v41, %v5011_v9  ;;  %v5124_v20 = vrot.slane %v9325_v1, 1  ;;  %v5174_v26 = vmul.f32 %v9959_v23, %v9506_v27  ;;  %v5081_v28 = vmul.f32 %v8938_v13, %v9356_v58 }
 0xcf8   : > { %v5486_v55 = vpack.c.bf16 %v5481_v42, %v5480_v29  ;;  %v5049_v52 = vadd.f32 %v5041_v5, %v5029_v22  ;;  %v5127_v30 = vrot.slane %v9350_v19, 1  ;;  %v5176_v46 = vmul.f32 %v9959_v23, %v9509_v62 }
 0xcf9   : > { %v5050_v44 = vadd.f32 %v5042_v34, %v5030_v59  ;;  %v5126_v37 = vsel %vm619_vm0, %v5124_v20, %v5125_v2  ;;  %v5173_v25 = vmul.f32 %v9959_v23, %v9350_v19  ;;  %v5250_v1 = vmul.f32 %v9009_v12, %v9509_v62 }
 0xcfa   : > { %6646 = vmatprep.mubr.msk.bf16.mxu0 %vm786_vm1, %v5486_v55  ;;  %v5069_v40 = vadd.f32 %v5061_v57, %v5049_v52  ;;  %v5129_v27 = vsel %vm619_vm0, %v5127_v30, %v5128_v38  ;;  %v5175_v13 = vmul.f32 %v9959_v23, %v9356_v58  ;;  %v5212_v10 = vrot.slane %v5174_v26, 1 }
 0xcfb   : > { %v5070_v3 = vadd.f32 %v5062_v45, %v5050_v44  ;;  %v5249_v11 = vmul.f32 %v9009_v12, %v9356_v58  ;;  %v5147_v43 = vmul.f32 %v9963_v56, %v5126_v37  ;;  %v5215_v19 = vrot.slane %v5176_v46, 1  ;;  %v7390_v46 = vld [vmem:[%s7906_s28 + $0x18] sm:$0xff]  ;;  %v7391_v37 = vld [vmem:[%s7906_s28] sm:$0xff] }
 0xcfc   : > { %v5088_v7 = vadd.f32 %v5081_v28, %v5069_v40  ;;  %v5317_v35 = vmul.f32 0.0, %v9062_v36  ;;  %v5148_v18 = vmul.f32 %v9963_v56, %v5129_v27  ;;  %v5211_v50 = vrot.slane %v5173_v25, 1  ;;  %v7393_v27 = vld [vmem:[%s7906_s28 + $0x10] sm:$0xff] }
 0xcfd   : > { %v5089_v61 = vadd.f32 %v9562_v17, %v5070_v3  ;;  %v5284_v15 = vrot.slane %v5250_v1, 1  ;;  %v5214_v23 = vrot.slane %v5175_v13, 1  ;;  %v5283_v6 = vrot.slane %v5249_v11, 1  ;;  %v7392_v1 = vld [vmem:[%s7906_s28 + $0x8] sm:$0xff] }
 0xcfe   : > { %v5107_v31 = vadd.f32 %v9566_v33, %v5088_v7  ;;  %v5213_v17 = vsel %vm619_vm0, %v5211_v50, %v5212_v10  ;;  %v5349_v60 = vrot.slane %v5317_v35, 1  ;;  %v5416_v29 = vmul.f32 %v9966_v53, %v9513_v39 }
 0xcff   : > { %v5108_v62 = vadd.f32 %v5100_v49, %v5089_v61  ;;  %v5216_v12 = vsel %vm619_vm0, %v5214_v23, %v5215_v19  ;;  %v5285_v24 = vsel %vm619_vm0, %v5283_v6, %v5284_v15  ;;  %v5417_v42 = vmul.f32 %v9966_v53, %v9628_v47  ;;  %v7253_v49 = vld [vmem:[#allocation7 + $0x8] sm:$0xff]   ;;  %v7394_v15 = vld [vmem:[%s7906_s28 + $0x38] sm:$0xff]  ;;  %v7395_v23 = vld [vmem:[%s7906_s28 + $0x20] sm:$0xff] }
 0xd00   : > { %v5155_v16 = vadd.f32 %v5147_v43, %v5107_v31  ;;  %v5436_v22 = vmul.f32 %v9967_v32, %v9628_v47  ;;  %v5437_v55 = vmul.f32 %v9967_v32, %v9633_v14  ;;  %v5475_v34 = vmul.f32 0.0, %v9950_v0  ;;  %v7252_v47 = vld [vmem:[#allocation7] sm:$0xff]   ;;  %v7256_v32 = vld [vmem:[%s9864_s12 + $0x10] sm:$0xff]  }
 0xd01   : > { %v5156_v63 = vadd.f32 %v5148_v18, %v5108_v62  ;;  %6650 = vmatprep.subr.bf16.mxu1 %v7252_v47  ;;  %v7255_v0 = vld [vmem:[%s9864_s12 + $0x8] sm:$0xff]  }
 0xd02   : > { %v5231_v58 = vadd.f32 %v5213_v17, %v5155_v16  ;;  %6651 = vmatpush3.bf16.msra.mxu1 %v7252_v47  ;;  %v7396_v17 = vld [vmem:[%s7906_s28 + $0x28] sm:$0xff] }
 0xd03   : > { %v5232_v33 = vadd.f32 %v5216_v12, %v5156_v63  ;;  %6652 = vmatprep.subr.bf16.mxu1 %v7253_v49  ;;  %v7397_v12 = vld [vmem:[%s7906_s28 + $0x30] sm:$0xff]  ;;  %s7544_s28 = scalar_lea.vmem %s7543_s18, 2048 }
 0xd04   : > { %v5299_v41 = vadd.f32 %v5285_v24, %v5231_v58  ;;  %p7546_p11 = scmp.lt.s32.totalorder %s7544_s28, %s7538_s29 }
 0xd05   : > { %v5300_v36 = vadd.f32 %v9607_v21, %v5232_v33  ;;  %v5456_v21 = vmul.f32 %v9042_v8, %v9633_v14  ;;  %v7254_v8 = vld [vmem:[%s9864_s12] sm:$0xff]   ;;  %v7257_v14 = vld [vmem:[%s9864_s12 + $0x18] sm:$0xff]  }
 0xd06   : > { %v5364_v56 = vadd.f32 %v9615_v51, %v5299_v41  ;;  %6653 = vmatpush3.bf16.msra.mxu1 %v7253_v49  ;;  %6662 = vmatprep.subr.bf16.mxu0 %v7254_v8  ;;  %v7260_v41 = vld [vmem:[%s9864_s12 + $0x30] sm:$0xff]   ;;  %p7547_p13 = por %p7546_p11, %p7545_p8 }
 0xd07   : > { %v5365_v48 = vadd.f32 %v5349_v60, %v5300_v36  ;;  %6663 = vmatpush3.bf16.msra.mxu0 %v7254_v8  ;;  %v7259_v60 = vld [vmem:[%s9864_s12 + $0x28] sm:$0xff]   ;;  %v7261_v36 = vld [vmem:[%s9864_s12 + $0x38] sm:$0xff]  }
 0xd08   : > { %v5424_v9 = vadd.f32 %v5416_v29, %v5364_v56  ;;  %6664 = vmatprep.subr.bf16.mxu0 %v7255_v0  ;;  %v6163_v56 = vld [vmem:[#allocation8] ss:$0 sm:$0xff]  ;;  %p7548_p1 = pnand %p7547_p13, %p7541_p7 }
 0xd09   : > { %v5425_v5 = vadd.f32 %v5417_v42, %v5365_v48 }
 0xd0a   : > { %v5444_v59 = vadd.f32 %v5436_v22, %v5424_v9 }
 0xd0b   : > { %v5445_v51 = vadd.f32 %v5437_v55, %v5425_v5  ;;  %6665 = vmatpush3.bf16.msra.mxu0 %v7255_v0 }
 0xd0c   : > { %v5463_v39 = vadd.f32 %v5456_v21, %v5444_v59  ;;  %6666 = vmatprep.subr.bf16.mxu0 %v7256_v32 }
 0xd0d   : > { %v5464_v2 = vadd.f32 %v9647_v54, %v5445_v51  ;;  %v7258_v54 = vld [vmem:[%s9864_s12 + $0x20] sm:$0xff]  }
 0xd0e   : > { %v5482_v53 = vadd.f32 %v9653_v4, %v5463_v39  ;;  %v6156_v4 = vld [vmem:[%s9859_s7] ss:$0 sm:$0xff] }
 0xd0f   : > { %v5483_v52 = vadd.f32 %v5475_v34, %v5464_v2  ;;  %6667 = vmatpush3.bf16.msra.mxu0 %v7256_v32 }
 0xd10   : > { %6668 = vmatprep.subr.bf16.mxu0 %v7257_v14 }
 0xd11   : > { %v5487_v57 = vpack.c.bf16 %v5483_v52, %v5482_v53 }
 0xd13   : > { %6647 = vmatmul.mubr.msk.bf16.gmra.mrb[44].mxu0 %vm786_vm1, %v5487_v57 }
 0xd14   : > { %6669 = vmatpush3.bf16.msra.mxu0 %v7257_v14 }
 0xd15   : > { %6670 = vmatprep.subr.bf16.mxu0 %v7258_v54 }
 0xd18   : > { %6671 = vmatpush3.bf16.msra.mxu0 %v7258_v54 }
 0xd19   : > { %6672 = vmatprep.subr.bf16.mxu0 %v7259_v60 }
 0xd1c   : > { %6673 = vmatpush3.bf16.msra.mxu0 %v7259_v60 }
 0xd1d   : > { %6674 = vmatprep.subr.bf16.mxu0 %v7260_v41 }
 0xd20   : > { %6675 = vmatpush3.bf16.msra.mxu0 %v7260_v41 }
 0xd21   : > { %6676 = vmatprep.subr.bf16.mxu0 %v7261_v36 }
 0xd24   : > { %6677 = vmatpush3.bf16.msra.mxu0 %v7261_v36 }
 0xdb6   : > { %v6644_v38 = vpop.f32.mrb[40].mxu0 }
 0xdb7   : > { %v5557_v44 = vpop.f32.mrb[41].mxu0  ;;  %v5566_v26 = vadd.f32 %v6644_v38, %v6156_v4 }
 0xdb8   : > { %v5558_v45 = vadd.f32 %v6156_v4, %v5557_v44  ;;  %v6645_v20 = vpop.f32.mrb[42].mxu0 }
 0xdb9   : > { %v5569_v40 = vadd.f32 %v6645_v20, %v6156_v4  ;;  %v5560_v28 = vpop.f32.mrb[43].mxu0  ;;  %v9746_v13 = vadd.f32 %v7393_v27, %v5566_v26 }
 0xdba   : > { %v5561_v30 = vadd.f32 %v6156_v4, %v5560_v28  ;;  %v9740_v25 = vadd.f32 %v7391_v37, %v5558_v45 }
 0xdbb   : > { %v9737_v3 = vadd.f32 %v7390_v46, %v5569_v40 }
 0xdbc   : > { %v9743_v7 = vadd.f32 %v7392_v1, %v5561_v30 }
 0xdbd   : > { %v5597_v10 = vpack.c.bf16 %v9737_v3, %v9746_v13 }
 0xdbe   : > { %v5596_v61 = vpack.c.bf16 %v9743_v7, %v9740_v25 }
 0xdc0   : > { %6654 = vmatprep.mubr.msk.bf16.mxu1 %vm786_vm1, %v5596_v61 }
 0xdc1   : > { %6655 = vmatmul.mubr.msk.bf16.vlgmr.msra.gmra.mrb[56].mxu1 %vm786_vm1, %v5597_v10  ;;  %v6178_v10 = vld [vmem:[#allocation10] ss:$0 sm:$0xff] }
 0xde6   : > { %v6648_v11 = vpop.f32.mrb[44].mxu0 }
 0xde7   : > { %v5573_v31 = vpop.f32.mrb[45].mxu0  ;;  %v5582_v35 = vadd.f32 %v6648_v11, %v6156_v4 }
 0xde8   : > { %v5574_v43 = vadd.f32 %v6156_v4, %v5573_v31  ;;  %v6649_v19 = vpop.f32.mrb[46].mxu0 }
 0xde9   : > { %v5585_v62 = vadd.f32 %v6649_v19, %v6156_v4  ;;  %v5576_v18 = vpop.f32.mrb[47].mxu0  ;;  %v9764_v58 = vadd.f32 %v7397_v12, %v5582_v35 }
 0xdea   : > { %v5577_v50 = vadd.f32 %v6156_v4, %v5576_v18  ;;  %v9758_v63 = vadd.f32 %v7395_v23, %v5574_v43 }
 0xdeb   : > { %v9755_v16 = vadd.f32 %v7394_v15, %v5585_v62 }
 0xdec   : > { %v9761_v6 = vadd.f32 %v7396_v17, %v5577_v50 }
 0xded   : > { %v5599_v24 = vpack.c.bf16 %v9755_v16, %v9764_v58 }
 0xdee   : > { %v5598_v33 = vpack.c.bf16 %v9761_v6, %v9758_v63 }
 0xdf0   : > { %6658 = vmatprep.mubr.msk.bf16.mxu1 %vm786_vm1, %v5598_v33 }
 0xdf1   : > { %6659 = vmatmul.mubr.msk.bf16.gmra.mrb[60].mxu1 %vm786_vm1, %v5599_v24 }
 0xe94   : > { %v6656_v29 = vpop.f32.mrb[56].mxu1 }
 0xe95   : > { %v5678_v48 = vadd.f32 %v6656_v29, %v6163_v56  ;;  %v5669_v42 = vpop.f32.mrb[57].mxu1 }
 0xe96   : > { %v5670_v9 = vadd.f32 %v6163_v56, %v5669_v42  ;;  %v6657_v22 = vpop.f32.mrb[58].mxu1 }
 0xe97   : > { %v5702_v5 = vmax.f32 %v5678_v48, 0.0  ;;  %v5681_v55 = vadd.f32 %v6657_v22, %v6163_v56  ;;  %v5672_v59 = vpop.f32.mrb[59].mxu1 }
 0xe98   : > { %v5700_v21 = vmax.f32 %v5670_v9, 0.0  ;;  %v5673_v51 = vadd.f32 %v6163_v56, %v5672_v59 }
 0xe99   : > { %v5703_v34 = vmax.f32 %v5681_v55, 0.0  ;;  %v5710_v2 = vmin.f32 %v5702_v5, 6.0 }
 0xe9a   : > { %v5701_v39 = vmax.f32 %v5673_v51, 0.0  ;;  %v5708_v52 = vmin.f32 %v5700_v21, 6.0 }
 0xe9b   : > { %v5711_v53 = vmin.f32 %v5703_v34, 6.0 }
 0xe9c   : > { %v5709_v57 = vmin.f32 %v5701_v39, 6.0 }
 0xe9d   : > { %v5717_v47 = vpack.c.bf16 %v5711_v53, %v5710_v2 }
 0xe9e   : > { %v5716_v49 = vpack.c.bf16 %v5709_v57, %v5708_v52 }
 0xea0   : > { %6678 = vmatprep.mubr.bf16.mxu0 %v5716_v49 }
 0xea1   : > { %6679 = vmatmul.mubr.bf16.vlgmr.msra.gmra.mrb[48].mxu0 %v5717_v47 }
 0xec4   : > { %v6660_v8 = vpop.f32.mrb[60].mxu1 }
 0xec5   : > { %v5694_v0 = vadd.f32 %v6660_v8, %v6163_v56  ;;  %v5685_v32 = vpop.f32.mrb[61].mxu1 }
 0xec6   : > { %v5686_v14 = vadd.f32 %v6163_v56, %v5685_v32  ;;  %v6661_v54 = vpop.f32.mrb[62].mxu1 }
 0xec7   : > { %v5706_v4 = vmax.f32 %v5694_v0, 0.0  ;;  %v5697_v38 = vadd.f32 %v6661_v54, %v6163_v56  ;;  %v5688_v44 = vpop.f32.mrb[63].mxu1 }
 0xec8   : > { %v5704_v45 = vmax.f32 %v5686_v14, 0.0  ;;  %v5689_v20 = vadd.f32 %v6163_v56, %v5688_v44 }
 0xec9   : > { %v5707_v26 = vmax.f32 %v5697_v38, 0.0  ;;  %v5714_v28 = vmin.f32 %v5706_v4, 6.0 }
 0xeca   : > { %v5705_v40 = vmax.f32 %v5689_v20, 0.0  ;;  %v5712_v46 = vmin.f32 %v5704_v45, 6.0 }
 0xecb   : > { %v5715_v30 = vmin.f32 %v5707_v26, 6.0 }
 0xecc   : > { %v5713_v37 = vmin.f32 %v5705_v40, 6.0 }
 0xecd   : > { %v5719_v1 = vpack.c.bf16 %v5715_v30, %v5714_v28 }
 0xece   : > { %v5718_v27 = vpack.c.bf16 %v5713_v37, %v5712_v46 }
 0xed0   : > { %6682 = vmatprep.mubr.bf16.mxu0 %v5718_v27 }
 0xed1   : > { %6683 = vmatmul.mubr.bf16.gmra.mrb[52].mxu0 %v5719_v1 }
 0xf74   : > { %v6680_v61 = vpop.f32.mrb[48].mxu0 }
 0xf75   : > { %v5851_v11 = vadd.f32 %v6680_v61, %v9746_v13  ;;  %v5818_v31 = vpop.f32.mrb[49].mxu0 }
 0xf76   : > { %v5849_v43 = vadd.f32 %v5818_v31, %v9740_v25  ;;  %v6681_v19 = vpop.f32.mrb[50].mxu0 }
 0xf77   : > { %v5866_v35 = vadd.f32 %v6178_v10, %v5851_v11  ;;  %v5852_v62 = vadd.f32 %v6681_v19, %v9737_v3  ;;  %v5821_v18 = vpop.f32.mrb[51].mxu0 }
 0xf78   : > { %v5864_v50 = vadd.f32 %v6178_v10, %v5849_v43  ;;  %v5850_v15 = vadd.f32 %v5821_v18, %v9743_v7 }
 0xf79   : > { %5874 = vst.msk [vmem:[%s525_s23 + $0x10] sm:$0xff] %vm786_vm1, %v5866_v35  ;;  %v5867_v23 = vadd.f32 %v6178_v10, %v5852_v62 }
 0xf7a   : > { %5872 = vst.msk [vmem:[%s525_s23] sm:$0xff] %vm786_vm1, %v5864_v50  ;;  %v5865_v17 = vadd.f32 %v6178_v10, %v5850_v15 }
 0xf7b   : > { %5875 = vst.msk [vmem:[%s525_s23 + $0x18] sm:$0xff] %vm786_vm1, %v5867_v23 }
 0xf7c   : > { %5873 = vst.msk [vmem:[%s525_s23 + $0x8] sm:$0xff] %vm786_vm1, %v5865_v17 }
 0xfa4   : > { %v6684_v25 = vpop.f32.mrb[52].mxu0 }
 0xfa5   : > { %v5855_v13 = vadd.f32 %v6684_v25, %v9764_v58  ;;  %v5834_v3 = vpop.f32.mrb[53].mxu0 }
 0xfa6   : > { %v5853_v12 = vadd.f32 %v5834_v3, %v9758_v63  ;;  %v6685_v33 = vpop.f32.mrb[54].mxu0 }
 0xfa7   : > { %v5870_v7 = vadd.f32 %v6178_v10, %v5855_v13  ;;  %v5856_v24 = vadd.f32 %v6685_v33, %v9755_v16  ;;  %v5837_v60 = vpop.f32.mrb[55].mxu0 }
 0xfa8   : > { %v5868_v41 = vadd.f32 %v6178_v10, %v5853_v12  ;;  %v5854_v36 = vadd.f32 %v5837_v60, %v9761_v6 }
 0xfa9   : > { %5878 = vst.msk [vmem:[%s525_s23 + $0x30] sm:$0xff] %vm786_vm1, %v5870_v7  ;;  %v5871_v56 = vadd.f32 %v6178_v10, %v5856_v24 }
 0xfaa   : > { %5876 = vst.msk [vmem:[%s525_s23 + $0x20] sm:$0xff] %vm786_vm1, %v5868_v41  ;;  %v5869_v63 = vadd.f32 %v6178_v10, %v5854_v36 }
 0xfab   : > { %5879 = vst.msk [vmem:[%s525_s23 + $0x38] sm:$0xff] %vm786_vm1, %v5871_v56 }
 0xfac   : > { %5877 = vst.msk [vmem:[%s525_s23 + $0x28] sm:$0xff] %vm786_vm1, %v5869_v63 }
 0xfad   : > { %7551 = shalt.err (!%p7548_p1)
}
 0xfae   : > { %s7552_s15 = scalar_lea.hbm %s9801_s19, 1024  ;;  %s7556_s16 = scalar_lea.hbm %s9969_s26, 2048 }
 0xfaf   : > { %p7553_p0 = scmp.ne.s32.totalorder %s9801_s19, %s7552_s15  ;;  %p7557_p9 = scmp.lt.u32.totalorder %s9801_s19, %s9969_s26 }
 0xfb0   : > { %p7558_p12 = scmp.lt.u32.totalorder %s7556_s16, %s7552_s15  ;;  %p7560_p2 = scmp.lt.u32.totalorder %s7552_s15, %s9801_s19 }
 0xfb1   : > { %p7554_p6 = pnand %p7553_p0, %p9970_p3 }
 0xfb2   : > { %p7559_p10 = por %p7558_p12, %p7557_p9 }
 0xfb3   : > { %p7555_p5 = pneg %p7554_p6 }
 0xfb4   : > { %p7561_p4 = por %p7560_p2, %p7559_p10 }
 0xfb6   : > { %p7562_p7 = pnand %p7561_p4, %p7555_p5 }
 0xfb8   : > { %7565 = shalt.err (!%p7562_p7)
}
 0xfb9   : > { %s7638_s25 = smov 128  }
 0xfba   : > { %6866 = dma.vmem_to_hbm [thread:$0]  (%p9970_p3), %s9804_s21, 1024, %s9801_s19, %s9810_s17, %s7638_s25, %s7638_s25, %s7634_s24  }
 0xfbb PF: > { %s9971_s20 = sld [smem:[#allocation18_spill]]  ;;  %s9972_s29 = sld [smem:[#allocation16_spill]] }
 0xfbc   : > { %s9973_s27 = sld [smem:[#allocation22_spill]] }
 0xfc1   : > { %p6898_p8 = scmp.ge.s32.totalorder %s9971_s20, 2  ;;  %s5909_s18 = sand.u32 1, %s9972_s29  }
 0xfc2   : > { %p9974_p11 = scmp.ne.s32.totalorder %s9973_s27, 0  ;;  %s5910_s28 = scalar_lea.sflag [#allocation4], %s5909_s18 }
 0xfc4   : > { %p6885_p13 = pnand %p6898_p8, %p9974_p11 }
 0xfc6   : > { %7595 = dma.done.wait (!%p6885_p13), %s5910_s28, 1024  }
 0xfc7   : > { %7597 = vsyncadd (!%p6885_p13), %s5910_s28, 4294966272  ;;  %s9975_s16 = sld [smem:[#allocation19_spill]]  ;;  %s9976_s15 = sld [smem:[#allocation17_spill]] }
 0xfc8   : > { %s9977_s9 = sld [smem:[#allocation20_spill]]  ;;  %s9978_s29 = smov %s7604_s30 }
 0xfcd   : > { %p27_p1 = scmp.ge.s32.totalorder %s9975_s16, 4   ;;  %s9979_s30 = smov %s9976_s15 }
 0xfce   : > { %s9980_s15 = smov %s9977_s9 }
 0xfcf   :  { %29 = sbr.rel (!%p27_p1) target bundleno = 10 (0xa), region = 135 }
 0xfd6   :  { %5915 = vsyncpa [#allocation3], 1 }
 0xfd7   :  { %5917 = vsyncpa [#allocation3 + $0x1], 1 }
 0xfd8   :  { %5918 = vsyncpa [#allocation6], 1 }
 0xfd9   :  { %5919 = vsyncpa [#allocation9], 1 }
 0xfda   :  { %5920 = vsyncpa [#allocation4], 1 }
 0xfdb   :  { %5922 = vsyncpa [#allocation4 + $0x1], 1 }

</bundles_post_ra>
